<compile_context>
chip_gen: v7x
topology: tpu7x:2x2x1
jax: 0.10.0
libtpu: 0.0.40
codegen_flags: <defaults>
</compile_context>

<pallas_src>
import jax
import jax.numpy as jnp
from jax.experimental import pallas as pl
from jax.experimental.pallas import tpu as pltpu

_SMALL_N = 256 * 1024                   # below this, XLA beats kernel launch
_TARGET_TILE_BYTES = 4 * 1024 * 1024    # ~4 MiB per buffer (2in+2out = 16 MiB)
_LANE_CANDIDATES = (512, 256, 128)      # lane-dense widths (multiples of 128)


def _softplus_clip(x):
    """PyTorch-faithful: F.softplus (threshold=20) then clamp to [1e-4, 1e4]."""
    xf = x.astype(jnp.float32)
    # Clamp the exp argument so the dead branch never overflows.
    sp = jnp.where(xf > 20.0, xf, jnp.log1p(jnp.exp(jnp.minimum(xf, 20.0))))
    return jnp.clip(sp, 0.0001, 10000.0).astype(x.dtype)


def _dispact_kernel(x_ref, o_ref):
    o_ref[...] = _softplus_clip(x_ref[...])


def dispact(x):
    """clamp(softplus(x), 1e-4, 1e4), elementwise, any shape (f32/bf16)."""
    orig_shape = x.shape
    n = x.size

    # Fast path: tiny tensors -- launch/reshape overhead dominates, XLA wins.
    if n < _SMALL_N:
        return _softplus_clip(x)

    # Pick a lane-dense width that divides n exactly (free reshape, no pad).
    cols = next((c for c in _LANE_CANDIDATES if n % c == 0), None)
    if cols is None:
        # Ragged size: pure XLA is 1R+1W of HBM; feeding Pallas would require
        # an extra slice/pad copy that can't fuse into the custom call.
        return _softplus_clip(x)

    itemsize = jnp.dtype(x.dtype).itemsize
    sub = 16 if itemsize == 2 else 8    # min sublane tile (bf16 vs f32)
    rows = n // cols

    def _round_up(v, m):
        return ((v + m - 1) // m) * m

    # ~4 MiB tiles for big inputs, but keep >= ~4 grid steps for mid-size so
    # v7x can shard the grid across both TensorCores.
    target_rows = max(sub, (_TARGET_TILE_BYTES // (cols * itemsize)) // sub * sub)
    quarter_rows = _round_up(pl.cdiv(rows, 4), sub)
    block_rows = max(sub, min(target_rows, quarter_rows))
    grid = (pl.cdiv(rows, block_rows),)

    x2d = x.reshape(rows, cols)         # free: n == rows * cols

    out2d = pl.pallas_call(
        _dispact_kernel,
        out_shape=jax.ShapeDtypeStruct((rows, cols), x.dtype),
        grid=grid,
        in_specs=[pl.BlockSpec((block_rows, cols), lambda i: (i, 0))],
        out_specs=pl.BlockSpec((block_rows, cols), lambda i: (i, 0)),
        compiler_params=pltpu.CompilerParams(
            dimension_semantics=("parallel",),   # v7x: shard steps across 2 TCs
            vmem_limit_bytes=32 * 1024 * 1024,   # <=16 MiB of buffers + headroom
        ),
    )(x2d)

    return out2d.reshape(orig_shape)


if __name__ == "__main__":
    key = jax.random.PRNGKey(0)
    k1, k2, k3 = jax.random.split(key, 3)

    def _ref(v):
        return jnp.clip(jax.nn.softplus(v), 0.0001, 10000.0)

    # 1) Small NCHW input consistent with the module's usage (fast path).
    x1 = jax.random.normal(k1, (2, 4, 16, 16), dtype=jnp.float32) * 5.0
    o1 = dispact(x1)
    jax.block_until_ready(o1)
    assert o1.shape == x1.shape
    assert jnp.allclose(o1, _ref(x1), atol=1e-5, rtol=1e-5), "mismatch (small)"

    # 2) Aligned multi-step Pallas path: n=524288 -> (1024, 512) slab,
    #    block_rows=256, grid=(4,) -> two steps per v7x TensorCore.
    x2 = jax.random.normal(k2, (8, 8, 64, 128), dtype=jnp.float32) * 10.0
    o2 = dispact(x2)
    jax.block_until_ready(o2)
    assert o2.shape == x2.shape
    assert jnp.allclose(o2, _ref(x2), atol=1e-5, rtol=1e-5), "mismatch (tiled)"

    # 3) Larger aligned input that reaches the full 4 MiB tile:
    #    n=4194304 -> (8192, 512), block_rows=2048, grid=(4,).
    x3 = jax.random.normal(k3, (2048, 2048), dtype=jnp.float32) * 10.0
    o3 = dispact(x3)
    jax.block_until_ready(o3)
    assert o3.shape == x3.shape
    assert jnp.allclose(o3, _ref(x3), atol=1e-5, rtol=1e-5), "mismatch (large)"

    # 4) Ragged size (odd element count) -> copy-free pure-XLA fallback.
    x4 = jax.random.normal(k1, (521, 1013), dtype=jnp.float32) * 10.0
    o4 = dispact(x4)
    jax.block_until_ready(o4)
    assert o4.shape == x4.shape
    assert jnp.allclose(o4, _ref(x4), atol=1e-5, rtol=1e-5), "mismatch (ragged)"

    print("KERNEL_OK")
</pallas_src>

<mosaic_0001>
module attributes {stable_mosaic.version = 11 : i64} {
  func.func @_dispact_kernel(%arg0: i32, %arg1: memref<256x512xf32, #tpu.memory_space<vmem>>, %arg2: memref<256x512xf32, #tpu.memory_space<vmem>>) attributes {dimension_semantics = [#tpu.dimension_semantics<parallel>], iteration_bounds = array<i64: 4>, scalar_prefetch = 0 : i64, scratch_operands = 0 : i64, tpu.core_type = #tpu.core_type<tc>, window_params = [{transform_indices = @transform_0, window_bounds = array<i64: 256, 512>}, {transform_indices = @transform_1, window_bounds = array<i64: 256, 512>}]} {
    %c0 = arith.constant 0 : index
    %c0_0 = arith.constant 0 : index
    %0 = vector.load %arg1[%c0, %c0_0] : memref<256x512xf32, #tpu.memory_space<vmem>>, vector<256x512xf32>
    %cst = arith.constant 2.000000e+01 : f32
    %1 = vector.broadcast %cst : f32 to vector<256x512xf32>
    %2 = arith.cmpf ogt, %0, %1 : vector<256x512xf32>
    %cst_1 = arith.constant 2.000000e+01 : f32
    %3 = vector.broadcast %cst_1 : f32 to vector<256x512xf32>
    %4 = arith.minimumf %0, %3 : vector<256x512xf32>
    %5 = math.exp %4 : vector<256x512xf32>
    %6 = math.log1p %5 : vector<256x512xf32>
    %7 = arith.select %2, %0, %6 : vector<256x512xi1>, vector<256x512xf32>
    %cst_2 = arith.constant 9.99999974E-5 : f32
    %cst_3 = arith.constant 1.000000e+04 : f32
    %8 = vector.broadcast %cst_2 : f32 to vector<256x512xf32>
    %9 = arith.maximumf %8, %7 : vector<256x512xf32>
    %10 = vector.broadcast %cst_3 : f32 to vector<256x512xf32>
    %11 = arith.minimumf %10, %9 : vector<256x512xf32>
    %c0_4 = arith.constant 0 : index
    %c0_5 = arith.constant 0 : index
    %12 = vector.load %arg2[%c0_4, %c0_5] : memref<256x512xf32, #tpu.memory_space<vmem>>, vector<256x512xf32>
    tpu.vector_store %arg2[%c0_4, %c0_5], %11 {strides = array<i32>} : memref<256x512xf32, #tpu.memory_space<vmem>>, vector<256x512xf32>,
    return
  }
  func.func @transform_0(%arg0: i32) -> (i32, i32) {
    %c0_i32 = arith.constant 0 : i32
    %c0_i32_0 = arith.constant 0 : i32
    return %arg0, %c0_i32 : i32, i32
  }
  func.func @transform_1(%arg0: i32) -> (i32, i32) {
    %c0_i32 = arith.constant 0 : i32
    %c0_i32_0 = arith.constant 0 : i32
    return %arg0, %c0_i32 : i32, i32
  }
}

</mosaic_0001>

<bundles_post_ra>
// kernel: tpu_custom_call.1
= control target key start
LH: loop header
LB: loop body
LE: loop exit
PB: predicated region body
PF: predicated region fallthrough
CT: control target
= control target key end

     0   :  { %6 = vsyncpa [#allocation3], 0  ;;  %s5570_s0 = inlined_call_operand.hbm [shape: f32[1024,512], index: 0, kind: input, shape index: {}]   ;;  %s5571_s1 = inlined_call_operand.hbm [shape: f32[1024,512], index: 1, kind: output, shape index: {}]  }
   0x1   :  { %8 = vsyncpa [#allocation3 + $0x1], 0 }
   0x2   :  { %9 = vsyncpa [#allocation4], 0 }
   0x3   :  { %11 = vsyncpa [#allocation4 + $0x1], 0  ;;  %s3226_s6 = smov 0   ;;  %s3228_s7 = smov 0  }
   0x4   :  { %s3230_s8 = smov 0   ;;  %s3232_s9 = smov 0  }
   0x5 LB: > { %s3247_s10 = sadd.s32 4294967295, %s3208_s9   ;;  %s2530_s11 = sadd.s32 4294967294, %s3208_s9   ;;  %s3208_s9 = sphi %s3232_s9, %s5829_s9   ;;  %s3204_s8 = sphi %s3230_s8, %s5828_s8   ;;  %s3200_s7 = sphi %s3228_s7, %s5827_s7   ;;  %s3196_s6 = sphi %s3226_s6, %s5826_s6  }
   0x6   : > { %s3251_s12 = sadd.s32 1, %s3208_s9   ;;  %s24_s13 = sadd.s32 1, %s3204_s8 }
   0x7   : > { %s21_s14 = ssub.s32 %s3208_s9, %s3251_s12  ;;  %p31_p0 = scmp.ne.s32.totalorder %s3204_s8, %s3200_s7 }
   0x8   : > { %p22_p1 = scmp.eq.s32.totalorder %s21_s14, 0  ;;  %p32_p2 = scmp.eq.s32.totalorder %s3208_s9, 0 }
   0x9   : > { %p37_p3 = scmp.ne.s32.totalorder %s3200_s7, %s3196_s6  ;;  %p38_p4 = scmp.eq.s32.totalorder %s3247_s10, 0 }
   0xa   : > { %s3263_s15 = scalar_select %p22_p1, %s3204_s8, %s24_s13  }
   0xb   : > { %p3265_p5 = por %p32_p2, %p31_p0  ;;  %p3269_p6 = por %p38_p4, %p37_p3 }
   0xc   : > { %p61_p7 = scmp.eq.s32.totalorder %s3247_s10, 3  ;;  %p67_p8 = scmp.eq.s32.totalorder %s2530_s11, 3 }
   0xd   : > { %p2562_p9 = scmp.lt.s32.totalorder %s3208_s9, 4  ;;  %s87_s20 = sand.u32 1, %s3204_s8  }
   0xe   : > { %p3275_p10 = por %p61_p7, %p31_p0  ;;  %p3279_p11 = por %p67_p8, %p37_p3 }
   0xf   : > { %s2547_s21 = sshll.u32 %s3208_s9, 14  ;;  %s2533_s22 = sshll.u32 %s87_s20, 10 }
  0x10   : > { %s5575_s18 = scalar_select %p3275_p10, 1, 0 }
  0x11   : > { %s5576_s19 = scalar_select %p3279_p11, 1, 0 }
  0x12   : > { %s3288_s25 = scalar_lea.hbm %s5570_s0, %s2547_s21  ;;  %s91_s26 = scalar_lea.vmem [#allocation2], %s2533_s22 }
  0x13   : > { %s99_s27 = sshll.u32 %s91_s26, 4  ;;  %p3292_p12 = pnand %p2562_p9, %p3265_p5  ;;  %s3296_s27 = int_to_ptr.vmem [resolvable:$true] %s99_s27 }
  0x14   : > { %s3298_s29 = scalar_lea.sflag [#allocation3], %s87_s20  ;;  %s3112_s30 = scalar_lea.hbm %s3288_s25, 16384 }
  0x15   : > { %p3113_p13 = scmp.ne.s32.totalorder %s3288_s25, %s3112_s30  ;;  %p3114_p0 = pneg %p3292_p12 }
  0x16   : > { %s3117_s4 = scalar_lea.hbm %s5570_s0, 65536  ;;  %p3118_p3 = scmp.lt.u32.totalorder %s3288_s25, %s5570_s0 }
  0x17   : > { %p3115_p1 = pnand %p3114_p0, %p3113_p13  ;;  %p3119_p4 = scmp.lt.u32.totalorder %s3117_s4, %s3112_s30 }
  0x18   : > { %p3121_p7 = scmp.lt.u32.totalorder %s3112_s30, %s3288_s25 }
  0x19   : > { %p3116_p2 = pneg %p3115_p1  ;;  %p3120_p5 = por %p3119_p4, %p3118_p3 }
  0x1b   : > { %p3122_p8 = por %p3121_p7, %p3120_p5 }
  0x1d   : > { %p3123_p9 = pnand %p3122_p8, %p3116_p2 }
  0x1f   : > { %3126 = shalt.err (!%p3123_p9)
}
  0x20   : > { %s3127_s13 = scalar_lea.vmem %s3296_s27, 16384  ;;  %s3210_s14 = smov [#allocation2]  }
  0x21   : > { %p3128_p13 = scmp.ne.s32.totalorder %s3296_s27, %s3127_s13  ;;  %s3132_s16 = sshll.u32 %s3210_s14, 4  ;;  %s3133_s16 = int_to_ptr.vmem [resolvable:$false] %s3132_s16 }
  0x22   : > { %s3134_s20 = scalar_lea.vmem %s3133_s16, 32768  ;;  %p3135_p10 = scmp.lt.s32.totalorder %s3296_s27, %s3133_s16 }
  0x23   : > { %p3130_p1 = pnand %p3128_p13, %p3114_p0  ;;  %p3136_p3 = scmp.lt.s32.totalorder %s3134_s20, %s3127_s13 }
  0x25   : > { %p3131_p11 = pneg %p3130_p1  ;;  %p3137_p4 = por %p3136_p3, %p3135_p10 }
  0x27   : > { %p3138_p5 = pnand %p3137_p4, %p3131_p11 }
  0x29   : > { %3141 = shalt.err (!%p3138_p5)
}
  0x2a   : > { %s3211_s21 = smov 512   ;;  %s3212_s22 = smov 32  }
  0x2b   : > { %2557 = dma.hbm_to_vmem [thread:$0]  (!%p3292_p12), %s3288_s25, 16384, %s3296_s27, %s3298_s29, %s3211_s21, %s3211_s21, %s3212_s22  }
  0x2c   : > { %p2537_p0 = scmp.ge.s32.totalorder %s3208_s9, 1  ;;  %p107_p2 = scmp.lt.s32.totalorder %s3208_s9, 5 }
  0x2e   : > { %p108_p7 = pnand %p2537_p0, %p107_p2 }
  0x2f   : > { %s3329_s23 = sand.u32 (!%p108_p7), 1, %s3200_s7  }
  0x30   : > { %111 = sbr.rel (%p108_p7) target bundleno = 608 (0x260), region = 24  ;;  %s2538_s24 = sshll.u32 (!%p108_p7), %s3329_s23, 10 }
  0x31   : > { %s114_s26 = scalar_lea.sflag (!%p108_p7), [#allocation3], %s3329_s23  ;;  %s3335_s30 = scalar_lea.vmem (!%p108_p7), [#allocation2], %s2538_s24 }
  0x37   : > { %3187 = dma.done.wait (%p3269_p6), %s114_s26, 16384  }
  0x38   : > { %3189 = vsyncadd (%p3269_p6), %s114_s26, 4294950912  ;;  %v3342_v0 = vld [vmem:[%s3335_s30] sm:$0xff]  ;;  %v3345_v1 = vld [vmem:[%s3335_s30 + $0x8] sm:$0xff]  ;;  %s3489_s17 = scalar_lea.vmem [#allocation5], %s2538_s24  ;;  %s2549_s25 = sshll.u32 %s3247_s10, 14 }
  0x39   : > { %v3348_v2 = vld [vmem:[%s3335_s30 + $0x10] sm:$0xff]  ;;  %v394_v3 = vmin.f32 %v3342_v0, 20.0  ;;  %v395_v4 = vmin.f32 %v3345_v1, 20.0  ;;  %v3353_v5 = vld [vmem:[%s3335_s30 + $0x18] sm:$0xff]  ;;  %v3356_v6 = vld [vmem:[%s3335_s30 + $0x20] sm:$0xff]  ;;  %vm266_vm1 = vcmp.gt.f32.partialorder %v3342_v0, 20.0  ;;  %s5524_s2 = scalar_lea.hbm %s5571_s1, %s2549_s25 }
  0x3a   : > { %v396_v7 = vmin.f32 %v3348_v2, 20.0  ;;  %v397_v8 = vmin.f32 %v3353_v5, 20.0  ;;  %v3361_v9 = vld [vmem:[%s3335_s30 + $0x28] sm:$0xff]  ;;  %v3364_v10 = vld [vmem:[%s3335_s30 + $0x30] sm:$0xff]  ;;  %v398_v13 = vmin.f32 %v3356_v6, 20.0  ;;  %v3370_v19 = vld [vmem:[%s3335_s30 + $0x38] sm:$0xff] }
  0x3b   : > { %v522_v11 = vmul.f32 1.442695, %v394_v3  ;;  %v524_v12 = vmul.f32 1.442695, %v395_v4  ;;  %v399_v16 = vmin.f32 %v3361_v9, 20.0  ;;  %v400_v18 = vmin.f32 %v3364_v10, 20.0 }
  0x3c   : > { %v526_v14 = vmul.f32 1.442695, %v396_v7  ;;  %v528_v15 = vmul.f32 1.442695, %v397_v8  ;;  %v530_v17 = vmul.f32 1.442695, %v398_v13 }
  0x3d   : > { %2600 = vpow2.f32 %v522_v11  ;;  %v3373_v20 = vld [vmem:[%s3335_s30 + $0x40] sm:$0xff]  ;;  %v532_v21 = vmul.f32 1.442695, %v399_v16  ;;  %v401_v22 = vmin.f32 %v3370_v19, 20.0  ;;  %v3377_v23 = vld [vmem:[%s3335_s30 + $0x48] sm:$0xff]  ;;  %v3380_v24 = vld [vmem:[%s3335_s30 + $0x50] sm:$0xff] }
  0x3e   : > { %2602 = vpow2.f32 %v524_v12  ;;  %v534_v25 = vmul.f32 1.442695, %v400_v18  ;;  %v402_v26 = vmin.f32 %v3373_v20, 20.0  ;;  %v3384_v27 = vld [vmem:[%s3335_s30 + $0x58] sm:$0xff]  ;;  %v403_v29 = vmin.f32 %v3377_v23, 20.0  ;;  %v3388_v30 = vld [vmem:[%s3335_s30 + $0x60] sm:$0xff] }
  0x3f   : > { %2604 = vpow2.f32 %v526_v14  ;;  %v536_v28 = vmul.f32 1.442695, %v401_v22  ;;  %v404_v32 = vmin.f32 %v3380_v24, 20.0  ;;  %v405_v34 = vmin.f32 %v3384_v27, 20.0  ;;  %v3394_v37 = vld [vmem:[%s3335_s30 + $0x68] sm:$0xff]  ;;  %v3398_v42 = vld [vmem:[%s3335_s30 + $0x70] sm:$0xff] }
  0x40   : > { %2606 = vpow2.f32 %v528_v15  ;;  %v538_v31 = vmul.f32 1.442695, %v402_v26  ;;  %v540_v33 = vmul.f32 1.442695, %v403_v29  ;;  %v406_v36 = vmin.f32 %v3388_v30, 20.0  ;;  %v3401_v51 = vld [vmem:[%s3335_s30 + $0x78] sm:$0xff] }
  0x41   : > { %2608 = vpow2.f32 %v530_v17  ;;  %v542_v35 = vmul.f32 1.442695, %v404_v32  ;;  %v544_v38 = vmul.f32 1.442695, %v405_v34  ;;  %v407_v40 = vmin.f32 %v3394_v37, 20.0  ;;  %s2457_s27 = sshll.u32 %s3489_s17, 4  ;;  %s5526_s27 = int_to_ptr.vmem [resolvable:$true] %s2457_s27 }
  0x42   : > { %2610 = vpow2.f32 %v532_v21  ;;  %v546_v39 = vmul.f32 1.442695, %v406_v36  ;;  %v408_v55 = vmin.f32 %v3398_v42, 20.0  ;;  %v409_v63 = vmin.f32 %v3401_v51, 20.0  ;;  %s2443_s3 = scalar_lea.sflag [#allocation4], %s3329_s23  ;;  %s3142_s10 = scalar_lea.vmem %s5526_s27, 16384 }
  0x43   : > { %2612 = vpow2.f32 %v534_v25  ;;  %v3403_v54 = vmul.f32 1.442695, %v407_v40  ;;  %vm267_vm3 = vcmp.gt.f32.partialorder %v3345_v1, 20.0  ;;  %vm268_vm4 = vcmp.gt.f32.partialorder %v3348_v2, 20.0  ;;  %p3143_p6 = scmp.ne.s32.totalorder %s5526_s27, %s3142_s10  ;;  %p5824_p10 = scmp.ne.s32.totalorder %s5575_s18, 0 }
  0x44   : > { %2614 = vpow2.f32 %v536_v28  ;;  %vm269_vm6 = vcmp.gt.f32.partialorder %v3353_v5, 20.0  ;;  %vm270_vm8 = vcmp.gt.f32.partialorder %v3356_v6, 20.0  ;;  %vm271_vm10 = vcmp.gt.f32.partialorder %v3361_v9, 20.0  ;;  %s3213_s4 = smov [#allocation5]  }
  0x45   : > { %2616 = vpow2.f32 %v538_v31  ;;  %vm272_vm12 = vcmp.gt.f32.partialorder %v3364_v10, 20.0  ;;  %vm273_vm14 = vcmp.gt.f32.partialorder %v3370_v19, 20.0  ;;  %p3144_p11 = pnand %p3143_p6, %p5824_p10  ;;  %s3146_s5 = sshll.u32 %s3213_s4, 4  ;;  %s3147_s5 = int_to_ptr.vmem [resolvable:$false] %s3146_s5 }
  0x46   : > { %2618 = vpow2.f32 %v540_v33  ;;  %s3148_s11 = scalar_lea.vmem %s3147_s5, 32768  ;;  %p3149_p8 = scmp.lt.s32.totalorder %s5526_s27, %s3147_s5 }
  0x47   : > { %v2601_v41 = vpop.eup %2600  ;;  %2620 = vpow2.f32 %v542_v35  ;;  %p3145_p12 = pneg %p3144_p11  ;;  %p3150_p9 = scmp.lt.s32.totalorder %s3148_s11, %s3142_s10 }
  0x48   : > { %v2603_v43 = vpop.eup %2602  ;;  %v778_v44 = vadd.f32 1.0, %v2601_v41  ;;  %v781_v45 = vmul.f32 -0.5, %v2601_v41  ;;  %v784_v46 = vand.u32 2147483647, %v2601_v41  ;;  %2622 = vpow2.f32 %v544_v38 }
  0x49   : > { %v2605_v47 = vpop.eup %2604  ;;  %v787_v48 = vadd.f32 1.0, %v2603_v43  ;;  %v790_v49 = vmul.f32 -0.5, %v2603_v43  ;;  %v793_v50 = vand.u32 2147483647, %v2603_v43  ;;  %2624 = vpow2.f32 %v546_v39  ;;  %p3151_p13 = por %p3150_p9, %p3149_p8 }
  0x4a   : > { %v2607_v52 = vpop.eup %2606  ;;  %2626 = vlog2.f32 %v778_v44  ;;  %v796_v53 = vadd.f32 1.0, %v2605_v47  ;;  %v782_v57 = vadd.f32 1.0, %v781_v45  ;;  %v799_v59 = vmul.f32 -0.5, %v2605_v47 }
  0x4b   : > { %v2609_v56 = vpop.eup %2608  ;;  %2628 = vlog2.f32 %v787_v48  ;;  %v791_v58 = vadd.f32 1.0, %v790_v49  ;;  %vm3406_vm0 = vcmp.lt.f32.partialorder %v784_v46, 0.0004427343  ;;  %v805_v62 = vadd.f32 1.0, %v2607_v52  ;;  %p3152_p1 = pnand %p3151_p13, %p3145_p12 }
  0x4c   : > { %v2611_v60 = vpop.eup %2610  ;;  %2630 = vlog2.f32 %v796_v53  ;;  %vm3412_vm2 = vcmp.lt.f32.partialorder %v793_v50, 0.0004427343  ;;  %v800_v7 = vadd.f32 1.0, %v799_v59  ;;  %v802_v8 = vand.u32 2147483647, %v2605_v47 }
  0x4d   : > { %v2613_v3 = vpop.eup %2612  ;;  %v808_v11 = vmul.f32 -0.5, %v2607_v52  ;;  %2632 = vlog2.f32 %v805_v62  ;;  %v811_v13 = vand.u32 2147483647, %v2607_v52  ;;  %v814_v14 = vadd.f32 1.0, %v2609_v56 }
  0x4e   : > { %v3416_v12 = vpop.eup %2614  ;;  %v817_v15 = vmul.f32 -0.5, %v2609_v56  ;;  %v783_v17 = vmul.f32 %v2601_v41, %v782_v57  ;;  %v792_v18 = vmul.f32 %v2603_v43, %v791_v58  ;;  %v820_v22 = vand.u32 2147483647, %v2609_v56 }
  0x4f   : > { %v3419_v16 = vpop.eup %2616  ;;  %v809_v21 = vadd.f32 1.0, %v808_v11  ;;  %2634 = vlog2.f32 %v814_v14  ;;  %v823_v28 = vadd.f32 1.0, %v2611_v60  ;;  %v826_v29 = vmul.f32 -0.5, %v2611_v60 }
  0x50   : > { %v3422_v25 = vpop.eup %2618  ;;  %v818_v26 = vadd.f32 1.0, %v817_v15  ;;  %v801_v32 = vmul.f32 %v2605_v47, %v800_v7  ;;  %vm3426_vm5 = vcmp.lt.f32.partialorder %v802_v8, 0.0004427343  ;;  %v829_v34 = vand.u32 2147483647, %v2611_v60 }
  0x51   : > { %v3424_v31 = vpop.eup %2620  ;;  %v832_v35 = vadd.f32 1.0, %v2613_v3  ;;  %vm3433_vm7 = vcmp.lt.f32.partialorder %v811_v13, 0.0004427343  ;;  %2636 = vlog2.f32 %v823_v28  ;;  %v827_v39 = vadd.f32 1.0, %v826_v29 }
  0x52   : > { %v3431_v36 = vpop.eup %2622  ;;  %v835_v40 = vmul.f32 -0.5, %v2613_v3  ;;  %v810_v43 = vmul.f32 %v2607_v52, %v809_v21  ;;  %v838_v44 = vand.u32 2147483647, %v2613_v3  ;;  %v841_v45 = vadd.f32 1.0, %v3416_v12 }
  0x53   : > { %v3437_v41 = vpop.eup %2624  ;;  %2638 = vlog2.f32 %v832_v35  ;;  %v819_v47 = vmul.f32 %v2609_v56, %v818_v26  ;;  %vm3441_vm9 = vcmp.lt.f32.partialorder %v820_v22, 0.0004427343  ;;  %v844_v50 = vmul.f32 -0.5, %v3416_v12 }
  0x54   : > { %v2627_v46 = vpop.eup %2626  ;;  %v836_v49 = vadd.f32 1.0, %v835_v40  ;;  %vm3447_vm11 = vcmp.lt.f32.partialorder %v829_v34, 0.0004427343  ;;  %2640 = vlog2.f32 %v841_v45  ;;  %v850_v58 = vadd.f32 1.0, %v3419_v16 }
  0x55   : > { %v2629_v53 = vpop.eup %2628  ;;  %v780_v57 = vmul.f32 0.6931472, %v2627_v46  ;;  %v828_v62 = vmul.f32 %v2611_v60, %v827_v39  ;;  %vm3453_vm13 = vcmp.lt.f32.partialorder %v838_v44, 0.0004427343  ;;  %v847_v8 = vand.u32 2147483647, %v3416_v12 }
  0x56   : > { %v2631_v59 = vpop.eup %2630  ;;  %v789_v56 = vmul.f32 0.6931472, %v2629_v53  ;;  %v837_v14 = vmul.f32 %v2613_v3, %v836_v49  ;;  %2642 = vlog2.f32 %v850_v58  ;;  %v845_v22 = vadd.f32 1.0, %v844_v50 }
  0x57   : > { %v786_v11 = vsel %vm3406_vm0, %v783_v17, %v780_v57  ;;  %v798_v13 = vmul.f32 0.6931472, %v2631_v59  ;;  %v2633_v15 = vpop.eup %2632  ;;  %v853_v26 = vmul.f32 -0.5, %v3419_v16  ;;  %vm3475_vm15 = vcmp.lt.f32.partialorder %v847_v8, 0.0004427343 }
  0x58   : > { %v1930_v21 = vsel %vm266_vm1, %v3342_v0, %v786_v11  ;;  %v795_v60 = vsel %vm3412_vm2, %v792_v18, %v789_v56  ;;  %v807_v17 = vmul.f32 0.6931472, %v2633_v15  ;;  %vm274_vm0 = vcmp.gt.f32.partialorder %v3373_v20, 20.0 }
  0x59   : > { %v2058_v28 = vmax.f32 %v1930_v21, 0.0001  ;;  %v1931_v61 = vsel %vm267_vm3, %v3345_v1, %v795_v60  ;;  %v804_v3 = vsel %vm3426_vm5, %v801_v32, %v798_v13  ;;  %v2635_v29 = vpop.eup %2634  ;;  %v856_v34 = vand.u32 2147483647, %v3419_v16 }
  0x5a   : > { %v2059_v0 = vmax.f32 %v1931_v61, 0.0001  ;;  %v1932_v4 = vsel %vm268_vm4, %v3348_v2, %v804_v3  ;;  %v813_v32 = vsel %vm3433_vm7, %v810_v43, %v807_v17  ;;  %v816_v33 = vmul.f32 0.6931472, %v2635_v29 }
  0x5b   : > { %v2186_v1 = vmin.f32 %v2058_v28, 10000.0  ;;  %v2060_v35 = vmax.f32 %v1932_v4, 0.0001  ;;  %v2637_v39 = vpop.eup %2636  ;;  %v1933_v2 = vsel %vm269_vm6, %v3353_v5, %v813_v32  ;;  %v854_v44 = vadd.f32 1.0, %v853_v26  ;;  %v3526_v28 = vld [vmem:[%s3335_s30 + $0x80] sm:$0xff] }
  0x5c   : > { %v2187_v40 = vmin.f32 %v2059_v0, 10000.0  ;;  %v859_v45 = vadd.f32 1.0, %v3422_v25  ;;  %v2061_v43 = vmax.f32 %v1933_v2, 0.0001  ;;  %v822_v49 = vsel %vm3441_vm9, %v819_v47, %v816_v33 }
  0x5d   : > { %v2639_v46 = vpop.eup %2638  ;;  %2314 = vst [vmem:[%s3489_s17] sm:$0xff] %v2186_v1  ;;  %v2188_v38 = vmin.f32 %v2060_v35, 10000.0  ;;  %v825_v50 = vmul.f32 0.6931472, %v2637_v39  ;;  %v1934_v5 = vsel %vm270_vm8, %v3356_v6, %v822_v49  ;;  %v846_v57 = vmul.f32 %v3416_v12, %v845_v22 }
  0x5e   : > { %2315 = vst [vmem:[%s3489_s17 + $0x8] sm:$0xff] %v2187_v40  ;;  %v834_v53 = vmul.f32 0.6931472, %v2639_v46  ;;  %2644 = vlog2.f32 %v859_v45  ;;  %v2641_v58 = vpop.eup %2640  ;;  %v2189_v59 = vmin.f32 %v2061_v43, 10000.0  ;;  %v2062_v56 = vmax.f32 %v1934_v5, 0.0001 }
  0x5f   : > { %2316 = vst [vmem:[%s3489_s17 + $0x10] sm:$0xff] %v2188_v38  ;;  %v831_v8 = vsel %vm3447_vm11, %v828_v62, %v825_v50  ;;  %v862_v47 = vmul.f32 -0.5, %v3422_v25  ;;  %v843_v11 = vmul.f32 0.6931472, %v2641_v58  ;;  %v855_v12 = vmul.f32 %v3419_v16, %v854_v44  ;;  %v3554_v45 = vld [vmem:[%s3335_s30 + $0x88] sm:$0xff]  ;;  %v3565_v43 = vld [vmem:[%s3335_s30 + $0x90] sm:$0xff] }
  0x60   : > { %v1935_v48 = vsel %vm271_vm10, %v3361_v9, %v831_v8  ;;  %v840_v6 = vsel %vm3453_vm13, %v837_v14, %v834_v53  ;;  %v2643_v13 = vpop.eup %2642  ;;  %2317 = vst [vmem:[%s3489_s17 + $0x18] sm:$0xff] %v2189_v59  ;;  %v2190_v15 = vmin.f32 %v2062_v56, 10000.0  ;;  %vm3513_vm1 = vcmp.lt.f32.partialorder %v856_v34, 0.0004427343  ;;  %v3570_v5 = vld [vmem:[%s3335_s30 + $0x98] sm:$0xff]  ;;  %v3578_v58 = vld [vmem:[%s3335_s30 + $0xa0] sm:$0xff] }
  0x61   : > { %v2063_v21 = vmax.f32 %v1935_v48, 0.0001  ;;  %v1936_v52 = vsel %vm272_vm12, %v3364_v10, %v840_v6  ;;  %v849_v7 = vsel %vm3475_vm15, %v846_v57, %v843_v11  ;;  %v852_v14 = vmul.f32 0.6931472, %v2643_v13 }
  0x62   : > { %v2064_v9 = vmax.f32 %v1936_v52, 0.0001  ;;  %v865_v16 = vand.u32 2147483647, %v3422_v25  ;;  %2318 = vst [vmem:[%s3489_s17 + $0x20] sm:$0xff] %v2190_v15  ;;  %v1937_v22 = vsel %vm273_vm14, %v3370_v19, %v849_v7  ;;  %v863_v10 = vadd.f32 1.0, %v862_v47 }
  0x63   : > { %v2191_v60 = vmin.f32 %v2063_v21, 10000.0  ;;  %v868_v26 = vadd.f32 1.0, %v3424_v31  ;;  %v2065_v3 = vmax.f32 %v1937_v22, 0.0001  ;;  %v858_v17 = vsel %vm3513_vm1, %v855_v12, %v852_v14  ;;  %v3583_v47 = vld [vmem:[%s3335_s30 + $0xa8] sm:$0xff]  ;;  %v3591_v7 = vld [vmem:[%s3335_s30 + $0xb0] sm:$0xff] }
  0x64   : > { %v2192_v61 = vmin.f32 %v2064_v9, 10000.0  ;;  %v871_v29 = vmul.f32 -0.5, %v3424_v31  ;;  %v1938_v0 = vsel %vm274_vm0, %v3373_v20, %v858_v17  ;;  %v877_v19 = vadd.f32 1.0, %v3431_v36 }
  0x65   : > { %2319 = vst [vmem:[%s3489_s17 + $0x28] sm:$0xff] %v2191_v60  ;;  %2646 = vlog2.f32 %v868_v26  ;;  %v550_v4 = vmul.f32 1.442695, %v408_v55  ;;  %v2193_v18 = vmin.f32 %v2065_v3, 10000.0  ;;  %v2066_v34 = vmax.f32 %v1938_v0, 0.0001 }
  0x66   : > { %2320 = vst [vmem:[%s3489_s17 + $0x30] sm:$0xff] %v2192_v61  ;;  %v874_v1 = vand.u32 2147483647, %v3424_v31  ;;  %v410_v35 = vmin.f32 %v3526_v28, 20.0  ;;  %v864_v32 = vmul.f32 %v3422_v25, %v863_v10  ;;  %2648 = vlog2.f32 %v877_v19 }
  0x67   : > { %v880_v20 = vmul.f32 -0.5, %v3431_v36  ;;  %v886_v33 = vadd.f32 1.0, %v3437_v41  ;;  %2321 = vst [vmem:[%s3489_s17 + $0x38] sm:$0xff] %v2193_v18  ;;  %v2194_v55 = vmin.f32 %v2066_v34, 10000.0  ;;  %vm275_vm2 = vcmp.gt.f32.partialorder %v3377_v23, 20.0 }
  0x68   : > { %v2645_v39 = vpop.eup %2644  ;;  %vm3546_vm3 = vcmp.lt.f32.partialorder %v865_v16, 0.0004427343  ;;  %v872_v2 = vadd.f32 1.0, %v871_v29  ;;  %vm276_vm4 = vcmp.gt.f32.partialorder %v3380_v24, 20.0  ;;  %v552_v25 = vmul.f32 1.442695, %v409_v63 }
  0x69   : > { %v861_v44 = vmul.f32 0.6931472, %v2645_v39  ;;  %2650 = vlog2.f32 %v886_v33  ;;  %2322 = vst [vmem:[%s3489_s17 + $0x40] sm:$0xff] %v2194_v55  ;;  %vm3557_vm5 = vcmp.lt.f32.partialorder %v874_v1, 0.0004427343  ;;  %vm277_vm6 = vcmp.gt.f32.partialorder %v3384_v27, 20.0 }
  0x6a   : > { %v889_v38 = vmul.f32 -0.5, %v3437_v41  ;;  %2652 = vpow2.f32 %v3403_v54  ;;  %v881_v49 = vadd.f32 1.0, %v880_v20  ;;  %v554_v50 = vmul.f32 1.442695, %v410_v35 }
  0x6b   : > { %v867_v63 = vsel %vm3546_vm3, %v864_v32, %v861_v44  ;;  %2654 = vpow2.f32 %v550_v4  ;;  %v873_v57 = vmul.f32 %v3424_v31, %v872_v2  ;;  %v411_v54 = vmin.f32 %v3554_v45, 20.0 }
  0x6c   : > { %v1939_v53 = vsel %vm275_vm2, %v3377_v23, %v867_v63  ;;  %2656 = vpow2.f32 %v552_v25  ;;  %v883_v56 = vand.u32 2147483647, %v3431_v36  ;;  %v412_v8 = vmin.f32 %v3565_v43, 20.0 }
  0x6d   : > { %v2067_v59 = vmax.f32 %v1939_v53, 0.0001  ;;  %2658 = vpow2.f32 %v554_v50  ;;  %v890_v48 = vadd.f32 1.0, %v889_v38  ;;  %v892_v23 = vand.u32 2147483647, %v3437_v41 }
  0x6e   : > { %v556_v6 = vmul.f32 1.442695, %v411_v54  ;;  %v413_v31 = vmin.f32 %v3570_v5, 20.0  ;;  %v882_v13 = vmul.f32 %v3431_v36, %v881_v49  ;;  %v558_v15 = vmul.f32 1.442695, %v412_v8 }
  0x6f   : > { %v2647_v11 = vpop.eup %2646  ;;  %v2195_v12 = vmin.f32 %v2067_v59, 10000.0  ;;  %v414_v21 = vmin.f32 %v3578_v58, 20.0  ;;  %v415_v9 = vmin.f32 %v3583_v47, 20.0  ;;  %vm3594_vm7 = vcmp.lt.f32.partialorder %v883_v56, 0.0004427343 }
  0x70   : > { %v870_v52 = vmul.f32 0.6931472, %v2647_v11  ;;  %2660 = vpow2.f32 %v556_v6  ;;  %v560_v62 = vmul.f32 1.442695, %v413_v31  ;;  %v2649_v14 = vpop.eup %2648  ;;  %vm278_vm8 = vcmp.gt.f32.partialorder %v3388_v30, 20.0 }
  0x71   : > { %2323 = vst [vmem:[%s3489_s17 + $0x48] sm:$0xff] %v2195_v12  ;;  %2662 = vpow2.f32 %v558_v15  ;;  %v562_v36 = vmul.f32 1.442695, %v414_v21  ;;  %v879_v22 = vmul.f32 0.6931472, %v2649_v14  ;;  %v891_v10 = vmul.f32 %v3437_v41, %v890_v48 }
  0x72   : > { %v876_v60 = vsel %vm3557_vm5, %v873_v57, %v870_v52  ;;  %v564_v26 = vmul.f32 1.442695, %v415_v9  ;;  %vm3605_vm9 = vcmp.lt.f32.partialorder %v892_v23, 0.0004427343  ;;  %2664 = vpow2.f32 %v560_v62 }
  0x73   : > { %v2651_v61 = vpop.eup %2650  ;;  %v1940_v3 = vsel %vm276_vm4, %v3380_v24, %v876_v60  ;;  %v416_v29 = vmin.f32 %v3591_v7, 20.0  ;;  %v885_v4 = vsel %vm3594_vm7, %v882_v13, %v879_v22  ;;  %2666 = vpow2.f32 %v562_v36 }
  0x74   : > { %v2653_v0 = vpop.eup %2652  ;;  %v2068_v19 = vmax.f32 %v1940_v3, 0.0001  ;;  %v888_v18 = vmul.f32 0.6931472, %v2651_v61  ;;  %v1941_v24 = vsel %vm277_vm6, %v3384_v27, %v885_v4  ;;  %2668 = vpow2.f32 %v564_v26 }
  0x75   : > { %v2655_v41 = vpop.eup %2654  ;;  %v895_v34 = vadd.f32 1.0, %v2653_v0  ;;  %v898_v1 = vmul.f32 -0.5, %v2653_v0  ;;  %v2069_v20 = vmax.f32 %v1941_v24, 0.0001  ;;  %v901_v44 = vand.u32 2147483647, %v2653_v0 }
  0x76   : > { %v2657_v35 = vpop.eup %2656  ;;  %v2196_v32 = vmin.f32 %v2068_v19, 10000.0  ;;  %v894_v33 = vsel %vm3605_vm9, %v891_v10, %v888_v18  ;;  %v904_v39 = vadd.f32 1.0, %v2655_v41  ;;  %v907_v46 = vmul.f32 -0.5, %v2655_v41 }
  0x77   : > { %v2659_v55 = vpop.eup %2658  ;;  %v1942_v40 = vsel %vm278_vm8, %v3388_v30, %v894_v33  ;;  %2670 = vlog2.f32 %v895_v34  ;;  %v899_v2 = vadd.f32 1.0, %v898_v1  ;;  %v2197_v27 = vmin.f32 %v2069_v20, 10000.0 }
  0x78   : > { %2324 = vst [vmem:[%s3489_s17 + $0x50] sm:$0xff] %v2196_v32  ;;  %v2070_v25 = vmax.f32 %v1942_v40, 0.0001  ;;  %2672 = vlog2.f32 %v904_v39  ;;  %v910_v38 = vand.u32 2147483647, %v2655_v41  ;;  %v913_v63 = vadd.f32 1.0, %v2657_v35 }
  0x79   : > { %v916_v49 = vmul.f32 -0.5, %v2657_v35  ;;  %2325 = vst [vmem:[%s3489_s17 + $0x58] sm:$0xff] %v2197_v27  ;;  %vm279_vm10 = vcmp.gt.f32.partialorder %v3394_v37, 20.0  ;;  %v908_v57 = vadd.f32 1.0, %v907_v46  ;;  %v922_v54 = vadd.f32 1.0, %v2659_v55  ;;  %v3733_v32 = vld [vmem:[%s3335_s30 + $0xd0] sm:$0xff] }
  0x7a   : > { %v2661_v50 = vpop.eup %2660  ;;  %v2198_v53 = vmin.f32 %v2070_v25, 10000.0  ;;  %v3623_v30 = vmul.f32 1.442695, %v416_v29  ;;  %vm3625_vm11 = vcmp.lt.f32.partialorder %v901_v44, 0.0004427343  ;;  %vm280_vm12 = vcmp.gt.f32.partialorder %v3398_v42, 20.0 }
  0x7b   : > { %v2663_v59 = vpop.eup %2662  ;;  %2674 = vlog2.f32 %v913_v63  ;;  %v919_v8 = vand.u32 2147483647, %v2657_v35  ;;  %v925_v48 = vmul.f32 -0.5, %v2659_v55  ;;  %v900_v23 = vmul.f32 %v2653_v0, %v899_v2 }
  0x7c   : > { %2326 = vst [vmem:[%s3489_s17 + $0x60] sm:$0xff] %v2198_v53  ;;  %v917_v6 = vadd.f32 1.0, %v916_v49  ;;  %2676 = vlog2.f32 %v922_v54  ;;  %v928_v31 = vand.u32 2147483647, %v2659_v55  ;;  %v2665_v11 = vpop.eup %2664  ;;  %vm3631_vm13 = vcmp.lt.f32.partialorder %v910_v38, 0.0004427343 }
  0x7d   : > { %v926_v13 = vadd.f32 1.0, %v925_v48  ;;  %v931_v15 = vadd.f32 1.0, %v2661_v50  ;;  %v934_v21 = vmul.f32 -0.5, %v2661_v50  ;;  %v3635_v52 = vpop.eup %2666  ;;  %v909_v62 = vmul.f32 %v2655_v41, %v908_v57 }
  0x7e   : > { %vm281_vm14 = vcmp.gt.f32.partialorder %v3401_v51, 20.0  ;;  %v937_v9 = vand.u32 2147483647, %v2661_v50  ;;  %v940_v14 = vadd.f32 1.0, %v2663_v59  ;;  %v943_v16 = vmul.f32 -0.5, %v2663_v59  ;;  %v3638_v36 = vpop.eup %2668 }
  0x7f   : > { %vm3640_vm15 = vcmp.lt.f32.partialorder %v919_v8, 0.0004427343  ;;  %vm282_vm0 = vcmp.gt.f32.partialorder %v3526_v28, 20.0  ;;  %2678 = vlog2.f32 %v931_v15  ;;  %v935_v22 = vadd.f32 1.0, %v934_v21 }
  0x80   : > { %v946_v10 = vand.u32 2147483647, %v2663_v59  ;;  %v918_v26 = vmul.f32 %v2657_v35, %v917_v6  ;;  %vm3645_vm1 = vcmp.lt.f32.partialorder %v928_v31, 0.0004427343  ;;  %2680 = vlog2.f32 %v940_v14  ;;  %v3689_v31 = vld [vmem:[%s3335_s30 + $0xb8] sm:$0xff] }
  0x81   : > { %v949_v3 = vadd.f32 1.0, %v2665_v11  ;;  %v2671_v17 = vpop.eup %2670  ;;  %v927_v29 = vmul.f32 %v2659_v55, %v926_v13  ;;  %v944_v0 = vadd.f32 1.0, %v943_v16  ;;  %v952_v19 = vmul.f32 -0.5, %v2665_v11 }
  0x82   : > { %v955_v4 = vand.u32 2147483647, %v2665_v11  ;;  %v2673_v18 = vpop.eup %2672  ;;  %v897_v41 = vmul.f32 0.6931472, %v2671_v17  ;;  %vm283_vm2 = vcmp.gt.f32.partialorder %v3554_v45, 20.0  ;;  %v958_v34 = vadd.f32 1.0, %v3635_v52 }
  0x83   : > { %vm3650_vm3 = vcmp.lt.f32.partialorder %v937_v9, 0.0004427343  ;;  %2682 = vlog2.f32 %v949_v3  ;;  %v906_v1 = vmul.f32 0.6931472, %v2673_v18  ;;  %v936_v35 = vmul.f32 %v2661_v50, %v935_v22 }
  0x84   : > { %vm284_vm4 = vcmp.gt.f32.partialorder %v3565_v43, 20.0  ;;  %vm3656_vm5 = vcmp.lt.f32.partialorder %v946_v10, 0.0004427343  ;;  %v961_v20 = vmul.f32 -0.5, %v3635_v52  ;;  %v903_v33 = vsel %vm3625_vm11, %v900_v23, %v897_v41  ;;  %v3706_v10 = vld [vmem:[%s3335_s30 + $0xc0] sm:$0xff] }
  0x85   : > { %v953_v39 = vadd.f32 1.0, %v952_v19  ;;  %2684 = vlog2.f32 %v958_v34  ;;  %v967_v55 = vadd.f32 1.0, %v3638_v36  ;;  %v2675_v40 = vpop.eup %2674  ;;  %v1943_v2 = vsel %vm279_vm10, %v3394_v37, %v903_v33  ;;  %v3726_v34 = vld [vmem:[%s3335_s30 + $0xc8] sm:$0xff] }
  0x86   : > { %v912_v44 = vsel %vm3631_vm13, %v909_v62, %v906_v1  ;;  %v945_v27 = vmul.f32 %v2663_v59, %v944_v0  ;;  %vm285_vm6 = vcmp.gt.f32.partialorder %v3570_v5, 20.0  ;;  %vm3670_vm7 = vcmp.lt.f32.partialorder %v955_v4, 0.0004427343  ;;  %v2677_v46 = vpop.eup %2676 }
  0x87   : > { %v2071_v38 = vmax.f32 %v1943_v2, 0.0001  ;;  %v1944_v63 = vsel %vm280_vm12, %v3398_v42, %v912_v44  ;;  %v915_v49 = vmul.f32 0.6931472, %v2675_v40  ;;  %v964_v37 = vand.u32 2147483647, %v3635_v52 }
  0x88   : > { %v2072_v50 = vmax.f32 %v1944_v63, 0.0001  ;;  %v924_v53 = vmul.f32 0.6931472, %v2677_v46  ;;  %vm286_vm8 = vcmp.gt.f32.partialorder %v3578_v58, 20.0  ;;  %v962_v57 = vadd.f32 1.0, %v961_v20 }
  0x89   : > { %2686 = vlog2.f32 %v967_v55  ;;  %v2199_v54 = vmin.f32 %v2071_v38, 10000.0  ;;  %v921_v59 = vsel %vm3640_vm15, %v918_v26, %v915_v49  ;;  %v954_v56 = vmul.f32 %v2665_v11, %v953_v39  ;;  %v2679_v42 = vpop.eup %2678  ;;  %v3748_v63 = vld [vmem:[%s3335_s30 + $0xd8] sm:$0xff] }
  0x8a   : > { %v970_v8 = vmul.f32 -0.5, %v3638_v36  ;;  %v2200_v48 = vmin.f32 %v2072_v50, 10000.0  ;;  %v1945_v23 = vsel %vm281_vm14, %v3401_v51, %v921_v59  ;;  %v930_v6 = vsel %vm3645_vm1, %v927_v29, %v924_v53  ;;  %v2681_v12 = vpop.eup %2680  ;;  %v3756_v59 = vld [vmem:[%s3335_s30 + $0xe8] sm:$0xff] }
  0x8b   : > { %2688 = vpow2.f32 %v3623_v30  ;;  %2327 = vst [vmem:[%s3489_s17 + $0x68] sm:$0xff] %v2199_v54  ;;  %v2073_v13 = vmax.f32 %v1945_v23, 0.0001  ;;  %v1946_v11 = vsel %vm282_vm0, %v3526_v28, %v930_v6  ;;  %v933_v15 = vmul.f32 0.6931472, %v2679_v42  ;;  %v3761_v42 = vld [vmem:[%s3335_s30 + $0xf0] sm:$0xff] }
  0x8c   : > { %v973_v21 = vand.u32 2147483647, %v3638_v36  ;;  %2328 = vst [vmem:[%s3489_s17 + $0x70] sm:$0xff] %v2200_v48  ;;  %v2074_v51 = vmax.f32 %v1946_v11, 0.0001  ;;  %v963_v9 = vmul.f32 %v3635_v52, %v962_v57  ;;  %v971_v28 = vadd.f32 1.0, %v970_v8 }
  0x8d   : > { %v942_v62 = vmul.f32 0.6931472, %v2681_v12  ;;  %vm3698_vm9 = vcmp.lt.f32.partialorder %v964_v37, 0.0004427343  ;;  %v2683_v14 = vpop.eup %2682  ;;  %v2201_v16 = vmin.f32 %v2073_v13, 10000.0  ;;  %v939_v60 = vsel %vm3650_vm3, %v936_v35, %v933_v15  ;;  %v3753_v57 = vld [vmem:[%s3335_s30 + $0xe0] sm:$0xff] }
  0x8e   : > { %v417_v22 = vmin.f32 %v3689_v31, 20.0  ;;  %v2202_v26 = vmin.f32 %v2074_v51, 10000.0  ;;  %v1947_v52 = vsel %vm283_vm2, %v3554_v45, %v939_v60  ;;  %v951_v3 = vmul.f32 0.6931472, %v2683_v14  ;;  %v3764_v48 = vld [vmem:[%s3335_s30 + $0xf8] sm:$0xff] }
  0x8f   : > { %v948_v61 = vsel %vm3656_vm5, %v945_v27, %v942_v62  ;;  %v2685_v17 = vpop.eup %2684  ;;  %2329 = vst [vmem:[%s3489_s17 + $0x78] sm:$0xff] %v2201_v16  ;;  %v2075_v29 = vmax.f32 %v1947_v52, 0.0001  ;;  %vm3717_vm10 = vcmp.lt.f32.partialorder %v973_v21, 0.0004427343  ;;  %v418_v24 = vmin.f32 %v3706_v10, 20.0 }
  0x90   : > { %v1948_v0 = vsel %vm284_vm4, %v3565_v43, %v948_v61  ;;  %v568_v4 = vmul.f32 1.442695, %v417_v22  ;;  %2330 = vst [vmem:[%s3489_s17 + $0x80] sm:$0xff] %v2202_v26  ;;  %v957_v18 = vsel %vm3670_vm7, %v954_v56, %v951_v3  ;;  %v960_v41 = vmul.f32 0.6931472, %v2685_v17  ;;  %v3772_v52 = vld [vmem:[%s3335_s30 + $0x100] sm:$0xff] }
  0x91   : > { %v2076_v45 = vmax.f32 %v1948_v0, 0.0001  ;;  %v2203_v1 = vmin.f32 %v2075_v29, 10000.0  ;;  %v1949_v43 = vsel %vm285_vm6, %v3570_v5, %v957_v18  ;;  %v972_v35 = vmul.f32 %v3638_v36, %v971_v28  ;;  %v3776_v0 = vld [vmem:[%s3335_s30 + $0x108] sm:$0xff] }
  0x92   : > { %2690 = vpow2.f32 %v568_v4  ;;  %v2077_v39 = vmax.f32 %v1949_v43, 0.0001  ;;  %v966_v55 = vsel %vm3698_vm9, %v963_v9, %v960_v41  ;;  %v570_v40 = vmul.f32 1.442695, %v418_v24 }
  0x93   : > { %v2687_v20 = vpop.eup %2686  ;;  %v2204_v33 = vmin.f32 %v2076_v45, 10000.0  ;;  %2331 = vst [vmem:[%s3489_s17 + $0x88] sm:$0xff] %v2203_v1  ;;  %v1950_v2 = vsel %vm286_vm8, %v3578_v58, %v966_v55  ;;  %vm287_vm11 = vcmp.gt.f32.partialorder %v3583_v47, 20.0  ;;  %v419_v36 = vmin.f32 %v3726_v34, 20.0 }
  0x94   : > { %v969_v5 = vmul.f32 0.6931472, %v2687_v20  ;;  %v2205_v27 = vmin.f32 %v2077_v39, 10000.0  ;;  %v2078_v25 = vmax.f32 %v1950_v2, 0.0001  ;;  %2692 = vpow2.f32 %v570_v40 }
  0x95   : > { %v2689_v44 = vpop.eup %2688  ;;  %2332 = vst [vmem:[%s3489_s17 + $0x90] sm:$0xff] %v2204_v33  ;;  %v420_v46 = vmin.f32 %v3733_v32, 20.0  ;;  %v572_v50 = vmul.f32 1.442695, %v419_v36  ;;  %v421_v8 = vmin.f32 %v3748_v63, 20.0  ;;  %v423_v12 = vmin.f32 %v3756_v59, 20.0 }
  0x96   : > { %v975_v38 = vsel %vm3717_vm10, %v972_v35, %v969_v5  ;;  %v976_v58 = vadd.f32 1.0, %v2689_v44  ;;  %2333 = vst [vmem:[%s3489_s17 + $0x98] sm:$0xff] %v2205_v27  ;;  %v2206_v49 = vmin.f32 %v2078_v25, 10000.0  ;;  %v979_v56 = vmul.f32 -0.5, %v2689_v44 }
  0x97   : > { %v1951_v37 = vsel %vm287_vm11, %v3583_v47, %v975_v38  ;;  %v574_v53 = vmul.f32 1.442695, %v420_v46  ;;  %v422_v47 = vmin.f32 %v3753_v57, 20.0  ;;  %v576_v6 = vmul.f32 1.442695, %v421_v8 }
  0x98   : > { %v2079_v54 = vmax.f32 %v1951_v37, 0.0001  ;;  %2694 = vlog2.f32 %v976_v58  ;;  %2334 = vst [vmem:[%s3489_s17 + $0xa0] sm:$0xff] %v2206_v49  ;;  %v982_v11 = vand.u32 2147483647, %v2689_v44  ;;  %v424_v21 = vmin.f32 %v3761_v42, 20.0 }
  0x99   : > { %2696 = vpow2.f32 %v572_v50  ;;  %v578_v15 = vmul.f32 1.442695, %v422_v47  ;;  %v425_v51 = vmin.f32 %v3764_v48, 20.0  ;;  %v980_v62 = vadd.f32 1.0, %v979_v56 }
  0x9a   : > { %v2207_v23 = vmin.f32 %v2079_v54, 10000.0  ;;  %2698 = vpow2.f32 %v574_v53  ;;  %v580_v16 = vmul.f32 1.442695, %v423_v12  ;;  %v582_v60 = vmul.f32 1.442695, %v424_v21 }
  0x9b   : > { %2700 = vpow2.f32 %v576_v6  ;;  %v584_v26 = vmul.f32 1.442695, %v425_v51  ;;  %vm288_vm12 = vcmp.gt.f32.partialorder %v3591_v7, 20.0  ;;  %v981_v29 = vmul.f32 %v2689_v44, %v980_v62 }
  0x9c   : > { %v2691_v13 = vpop.eup %2690  ;;  %2335 = vst [vmem:[%s3489_s17 + $0xa8] sm:$0xff] %v2207_v23  ;;  %2702 = vpow2.f32 %v578_v15  ;;  %vm3778_vm13 = vcmp.lt.f32.partialorder %v982_v11, 0.0004427343  ;;  %vm289_vm14 = vcmp.gt.f32.partialorder %v3689_v31, 20.0  ;;  %v426_v18 = vmin.f32 %v3772_v52, 20.0 }
  0x9d   : > { %v985_v9 = vadd.f32 1.0, %v2691_v13  ;;  %v988_v30 = vmul.f32 -0.5, %v2691_v13  ;;  %v991_v14 = vand.u32 2147483647, %v2691_v13  ;;  %v427_v55 = vmin.f32 %v3776_v0, 20.0 }
  0x9e   : > { %v2693_v28 = vpop.eup %2692  ;;  %vm290_vm1 = vcmp.gt.f32.partialorder %v3706_v10, 20.0  ;;  %v3799_v25 = vmul.f32 1.442695, %v426_v18  ;;  %vm291_vm2 = vcmp.gt.f32.partialorder %v3726_v34, 20.0  ;;  %vm292_vm4 = vcmp.gt.f32.partialorder %v3733_v32, 20.0 }
  0x9f   : > { %2704 = vlog2.f32 %v985_v9  ;;  %v989_v22 = vadd.f32 1.0, %v988_v30  ;;  %v994_v61 = vadd.f32 1.0, %v2693_v28  ;;  %v997_v3 = vmul.f32 -0.5, %v2693_v28 }
  0xa0   : > { %v1000_v17 = vand.u32 2147483647, %v2693_v28  ;;  %2706 = vpow2.f32 %v580_v16  ;;  %vm3783_vm15 = vcmp.lt.f32.partialorder %v991_v14, 0.0004427343  ;;  %vm293_vm7 = vcmp.gt.f32.partialorder %v3748_v63, 20.0 }
  0xa1   : > { %2708 = vpow2.f32 %v582_v60  ;;  %v990_v1 = vmul.f32 %v2691_v13, %v989_v22  ;;  %v998_v43 = vadd.f32 1.0, %v997_v3  ;;  %vm294_vm8 = vcmp.gt.f32.partialorder %v3753_v57, 20.0 }
  0xa2   : > { %v2695_v19 = vpop.eup %2694  ;;  %2710 = vlog2.f32 %v994_v61  ;;  %vm3788_vm0 = vcmp.lt.f32.partialorder %v1000_v17, 0.0004427343  ;;  %vm295_vm10 = vcmp.gt.f32.partialorder %v3756_v59, 20.0 }
  0xa3   : > { %v2697_v41 = vpop.eup %2696  ;;  %v978_v24 = vmul.f32 0.6931472, %v2695_v19  ;;  %2712 = vpow2.f32 %v584_v26  ;;  %v999_v58 = vmul.f32 %v2693_v28, %v998_v43 }
  0xa4   : > { %v2699_v35 = vpop.eup %2698  ;;  %v1003_v33 = vadd.f32 1.0, %v2697_v41  ;;  %v1006_v39 = vmul.f32 -0.5, %v2697_v41  ;;  %v1009_v2 = vand.u32 2147483647, %v2697_v41 }
  0xa5   : > { %v984_v40 = vsel %vm3778_vm13, %v981_v29, %v978_v24  ;;  %v1012_v5 = vadd.f32 1.0, %v2699_v35  ;;  %v1015_v36 = vmul.f32 -0.5, %v2699_v35  ;;  %v1018_v27 = vand.u32 2147483647, %v2699_v35  ;;  %v2701_v46 = vpop.eup %2700 }
  0xa6   : > { %v1952_v44 = vsel %vm288_vm12, %v3591_v7, %v984_v40  ;;  %2714 = vlog2.f32 %v1003_v33  ;;  %v1007_v49 = vadd.f32 1.0, %v1006_v39  ;;  %v2703_v37 = vpop.eup %2702  ;;  %v1021_v53 = vadd.f32 1.0, %v2701_v46 }
  0xa7   : > { %v2080_v38 = vmax.f32 %v1952_v44, 0.0001  ;;  %2716 = vlog2.f32 %v1012_v5  ;;  %v1016_v50 = vadd.f32 1.0, %v1015_v36  ;;  %v1024_v54 = vmul.f32 -0.5, %v2701_v46 }
  0xa8   : > { %v1027_v56 = vand.u32 2147483647, %v2701_v46  ;;  %vm3802_vm3 = vcmp.lt.f32.partialorder %v1009_v2, 0.0004427343  ;;  %v1030_v47 = vadd.f32 1.0, %v2703_v37  ;;  %v1033_v6 = vmul.f32 -0.5, %v2703_v37 }
  0xa9   : > { %v2705_v8 = vpop.eup %2704  ;;  %v2208_v23 = vmin.f32 %v2080_v38, 10000.0  ;;  %vm3807_vm5 = vcmp.lt.f32.partialorder %v1018_v27, 0.0004427343  ;;  %2718 = vlog2.f32 %v1021_v53  ;;  %v1025_v15 = vadd.f32 1.0, %v1024_v54  ;;  %v3856_v53 = vld [vmem:[%s3335_s30 + $0x110] sm:$0xff] }
  0xaa   : > { %v2707_v12 = vpop.eup %2706  ;;  %v987_v13 = vmul.f32 0.6931472, %v2705_v8  ;;  %v1008_v51 = vmul.f32 %v2697_v41, %v1007_v49  ;;  %2720 = vlog2.f32 %v1030_v47  ;;  %v1034_v62 = vadd.f32 1.0, %v1033_v6 }
  0xab   : > { %v2709_v21 = vpop.eup %2708  ;;  %2336 = vst [vmem:[%s3489_s17 + $0xb0] sm:$0xff] %v2208_v23  ;;  %v1039_v9 = vadd.f32 1.0, %v2707_v12  ;;  %v1017_v16 = vmul.f32 %v2699_v35, %v1016_v50  ;;  %vm3814_vm6 = vcmp.lt.f32.partialorder %v1027_v56, 0.0004427343  ;;  %v1042_v28 = vmul.f32 -0.5, %v2707_v12  ;;  %v3921_v50 = vld [vmem:[%s3335_s30 + $0x140] sm:$0xff] }
  0xac   : > { %v2711_v30 = vpop.eup %2710  ;;  %v993_v14 = vsel %vm3783_vm15, %v990_v1, %v987_v13  ;;  %v1026_v3 = vmul.f32 %v2701_v46, %v1025_v15  ;;  %v1036_v17 = vand.u32 2147483647, %v2703_v37  ;;  %v1035_v19 = vmul.f32 %v2703_v37, %v1034_v62 }
  0xad   : > { %v3818_v22 = vpop.eup %2712  ;;  %v1953_v26 = vsel %vm289_vm14, %v3689_v31, %v993_v14  ;;  %v996_v61 = vmul.f32 0.6931472, %v2711_v30  ;;  %2722 = vlog2.f32 %v1039_v9  ;;  %v1045_v4 = vand.u32 2147483647, %v2707_v12 }
  0xae   : > { %v2081_v29 = vmax.f32 %v1953_v26, 0.0001  ;;  %v1043_v18 = vadd.f32 1.0, %v1042_v28  ;;  %v1048_v41 = vadd.f32 1.0, %v2709_v21  ;;  %v1051_v24 = vmul.f32 -0.5, %v2709_v21  ;;  %v3938_v26 = vld [vmem:[%s3335_s30 + $0x150] sm:$0xff] }
  0xaf   : > { %v1002_v45 = vsel %vm3788_vm0, %v999_v58, %v996_v61  ;;  %v1054_v35 = vand.u32 2147483647, %v2709_v21  ;;  %v1057_v33 = vadd.f32 1.0, %v3818_v22  ;;  %vm3831_vm9 = vcmp.lt.f32.partialorder %v1036_v17, 0.0004427343 }
  0xb0   : > { %v2715_v1 = vpop.eup %2714  ;;  %v2209_v31 = vmin.f32 %v2081_v29, 10000.0  ;;  %v1954_v43 = vsel %vm290_vm1, %v3706_v10, %v1002_v45  ;;  %2724 = vlog2.f32 %v1048_v41  ;;  %vm3837_vm11 = vcmp.lt.f32.partialorder %v1045_v4, 0.0004427343 }
  0xb1   : > { %v2717_v39 = vpop.eup %2716  ;;  %v2082_v40 = vmax.f32 %v1954_v43, 0.0001  ;;  %v1005_v2 = vmul.f32 0.6931472, %v2715_v1  ;;  %v1052_v10 = vadd.f32 1.0, %v1051_v24  ;;  %2726 = vlog2.f32 %v1057_v33 }
  0xb2   : > { %2337 = vst [vmem:[%s3489_s17 + $0xb8] sm:$0xff] %v2209_v31  ;;  %v1014_v20 = vmul.f32 0.6931472, %v2717_v39  ;;  %v1044_v46 = vmul.f32 %v2707_v12, %v1043_v18  ;;  %v1060_v38 = vmul.f32 -0.5, %v3818_v22  ;;  %vm296_vm12 = vcmp.gt.f32.partialorder %v3761_v42, 20.0  ;;  %v3906_v39 = vld [vmem:[%s3335_s30 + $0x130] sm:$0xff] }
  0xb3   : > { %v2210_v44 = vmin.f32 %v2082_v40, 10000.0  ;;  %v1011_v27 = vsel %vm3802_vm3, %v1008_v51, %v1005_v2  ;;  %v2719_v58 = vpop.eup %2718  ;;  %vm3850_vm13 = vcmp.lt.f32.partialorder %v1054_v35, 0.0004427343  ;;  %2728 = vpow2.f32 %v3799_v25  ;;  %v3869_v51 = vld [vmem:[%s3335_s30 + $0x118] sm:$0xff] }
  0xb4   : > { %v1955_v49 = vsel %vm291_vm2, %v3726_v34, %v1011_v27  ;;  %v1020_v37 = vsel %vm3807_vm5, %v1017_v16, %v1014_v20  ;;  %v2721_v54 = vpop.eup %2720  ;;  %v1023_v8 = vmul.f32 0.6931472, %v2719_v58  ;;  %v1063_v23 = vand.u32 2147483647, %v3818_v22 }
  0xb5   : > { %2338 = vst [vmem:[%s3489_s17 + $0xc0] sm:$0xff] %v2210_v44  ;;  %v2083_v56 = vmax.f32 %v1955_v49, 0.0001  ;;  %v1956_v34 = vsel %vm292_vm4, %v3733_v32, %v1020_v37  ;;  %v1032_v47 = vmul.f32 0.6931472, %v2721_v54  ;;  %v1053_v6 = vmul.f32 %v2709_v21, %v1052_v10  ;;  %v3872_v32 = vld [vmem:[%s3335_s30 + $0x120] sm:$0xff] }
  0xb6   : > { %v2084_v7 = vmax.f32 %v1956_v34, 0.0001  ;;  %v588_v25 = vmul.f32 1.442695, %v427_v55  ;;  %v1029_v13 = vsel %vm3814_vm6, %v1026_v3, %v1023_v8  ;;  %v1061_v11 = vadd.f32 1.0, %v1060_v38 }
  0xb7   : > { %v2211_v12 = vmin.f32 %v2083_v56, 10000.0  ;;  %v428_v15 = vmin.f32 %v3856_v53, 20.0  ;;  %v2723_v62 = vpop.eup %2722  ;;  %v1957_v21 = vsel %vm293_vm7, %v3748_v63, %v1029_v13  ;;  %v1038_v55 = vsel %vm3831_vm9, %v1035_v19, %v1032_v47  ;;  %v3894_v19 = vld [vmem:[%s3335_s30 + $0x128] sm:$0xff] }
  0xb8   : > { %v2212_v9 = vmin.f32 %v2084_v7, 10000.0  ;;  %2730 = vpow2.f32 %v588_v25  ;;  %v2085_v30 = vmax.f32 %v1957_v21, 0.0001  ;;  %v1958_v14 = vsel %vm294_vm8, %v3753_v57, %v1038_v55  ;;  %v3926_v7 = vld [vmem:[%s3335_s30 + $0x148] sm:$0xff] }
  0xb9   : > { %2339 = vst [vmem:[%s3489_s17 + $0xc8] sm:$0xff] %v2211_v12  ;;  %v1041_v16 = vmul.f32 0.6931472, %v2723_v62  ;;  %v590_v60 = vmul.f32 1.442695, %v428_v15  ;;  %v429_v63 = vmin.f32 %v3869_v51, 20.0  ;;  %v1062_v57 = vmul.f32 %v3818_v22, %v1061_v11 }
  0xba   : > { %2340 = vst [vmem:[%s3489_s17 + $0xd0] sm:$0xff] %v2212_v9  ;;  %v2086_v28 = vmax.f32 %v1958_v14, 0.0001  ;;  %vm3884_vm14 = vcmp.lt.f32.partialorder %v1063_v23, 0.0004427343  ;;  %v430_v61 = vmin.f32 %v3872_v32, 20.0  ;;  %v2725_v3 = vpop.eup %2724 }
  0xbb   : > { %v2213_v17 = vmin.f32 %v2085_v30, 10000.0  ;;  %v1047_v29 = vsel %vm3837_vm11, %v1044_v46, %v1041_v16  ;;  %2732 = vpow2.f32 %v590_v60  ;;  %v2727_v4 = vpop.eup %2726  ;;  %v1050_v41 = vmul.f32 0.6931472, %v2725_v3 }
  0xbc   : > { %v2214_v45 = vmin.f32 %v2086_v28, 10000.0  ;;  %v1959_v18 = vsel %vm295_vm10, %v3756_v59, %v1047_v29  ;;  %v592_v24 = vmul.f32 1.442695, %v429_v63  ;;  %vm297_vm15 = vcmp.gt.f32.partialorder %v3764_v48, 20.0 }
  0xbd   : > { %2341 = vst [vmem:[%s3489_s17 + $0xd8] sm:$0xff] %v2213_v17  ;;  %v2087_v1 = vmax.f32 %v1959_v18, 0.0001  ;;  %v1059_v31 = vmul.f32 0.6931472, %v2727_v4  ;;  %v2729_v43 = vpop.eup %2728  ;;  %v1056_v22 = vsel %vm3850_vm13, %v1053_v6, %v1050_v41  ;;  %v431_v33 = vmin.f32 %v3894_v19, 20.0 }
  0xbe   : > { %2342 = vst [vmem:[%s3489_s17 + $0xe0] sm:$0xff] %v2214_v45  ;;  %2734 = vpow2.f32 %v592_v24  ;;  %v594_v35 = vmul.f32 1.442695, %v430_v61  ;;  %v1960_v40 = vsel %vm296_vm12, %v3761_v42, %v1056_v22  ;;  %v1066_v5 = vadd.f32 1.0, %v2729_v43  ;;  %v3917_v42 = vld [vmem:[%s3335_s30 + $0x138] sm:$0xff] }
  0xbf   : > { %v2215_v59 = vmin.f32 %v2087_v1, 10000.0  ;;  %v1065_v2 = vsel %vm3884_vm14, %v1062_v57, %v1059_v31  ;;  %v2088_v20 = vmax.f32 %v1960_v40, 0.0001  ;;  %v596_v44 = vmul.f32 1.442695, %v431_v33 }
  0xc0   : > { %v1961_v36 = vsel %vm297_vm15, %v3764_v48, %v1065_v2  ;;  %2736 = vlog2.f32 %v1066_v5  ;;  %v432_v27 = vmin.f32 %v3906_v39, 20.0  ;;  %v1069_v58 = vmul.f32 -0.5, %v2729_v43 }
  0xc1   : > { %2343 = vst [vmem:[%s3489_s17 + $0xe8] sm:$0xff] %v2215_v59  ;;  %v2089_v10 = vmax.f32 %v1961_v36, 0.0001  ;;  %v2216_v38 = vmin.f32 %v2088_v20, 10000.0  ;;  %2738 = vpow2.f32 %v594_v35  ;;  %v433_v34 = vmin.f32 %v3917_v42, 20.0 }
  0xc2   : > { %v2731_v46 = vpop.eup %2730  ;;  %2740 = vpow2.f32 %v596_v44  ;;  %v598_v48 = vmul.f32 1.442695, %v432_v27  ;;  %v1070_v8 = vadd.f32 1.0, %v1069_v58  ;;  %v1072_v47 = vand.u32 2147483647, %v2729_v43  ;;  %v3969_v44 = vld [vmem:[%s3335_s30 + $0x158] sm:$0xff] }
  0xc3   : > { %v2217_v49 = vmin.f32 %v2089_v10, 10000.0  ;;  %v1075_v37 = vadd.f32 1.0, %v2731_v46  ;;  %2344 = vst [vmem:[%s3489_s17 + $0xf0] sm:$0xff] %v2216_v38  ;;  %v1078_v56 = vmul.f32 -0.5, %v2731_v46  ;;  %v600_v25 = vmul.f32 1.442695, %v433_v34 }
  0xc4   : > { %v434_v12 = vmin.f32 %v3921_v50, 20.0  ;;  %vm298_vm0 = vcmp.gt.f32.partialorder %v3772_v52, 20.0  ;;  %vm299_vm1 = vcmp.gt.f32.partialorder %v3776_v0, 20.0  ;;  %v1081_v11 = vand.u32 2147483647, %v2731_v46 }
  0xc5   : > { %v2733_v54 = vpop.eup %2732  ;;  %2345 = vst [vmem:[%s3489_s17 + $0xf8] sm:$0xff] %v2217_v49  ;;  %2742 = vlog2.f32 %v1075_v37  ;;  %v1079_v15 = vadd.f32 1.0, %v1078_v56  ;;  %v1071_v21 = vmul.f32 %v2729_v43, %v1070_v8  ;;  %v435_v14 = vmin.f32 %v3926_v7, 20.0 }
  0xc6   : > { %v1084_v23 = vadd.f32 1.0, %v2733_v54  ;;  %2744 = vpow2.f32 %v598_v48  ;;  %v1087_v6 = vmul.f32 -0.5, %v2733_v54  ;;  %v1090_v55 = vand.u32 2147483647, %v2733_v54 }
  0xc7   : > { %v602_v30 = vmul.f32 1.442695, %v434_v12  ;;  %vm3932_vm2 = vcmp.lt.f32.partialorder %v1072_v47, 0.0004427343  ;;  %vm300_vm3 = vcmp.gt.f32.partialorder %v3856_v53, 20.0  ;;  %v1080_v29 = vmul.f32 %v2731_v46, %v1079_v15 }
  0xc8   : > { %v2735_v13 = vpop.eup %2734  ;;  %2746 = vlog2.f32 %v1084_v23  ;;  %v1088_v28 = vadd.f32 1.0, %v1087_v6  ;;  %vm3942_vm4 = vcmp.lt.f32.partialorder %v1081_v11, 0.0004427343  ;;  %v604_v17 = vmul.f32 1.442695, %v435_v14 }
  0xc9   : > { %v1093_v62 = vadd.f32 1.0, %v2735_v13  ;;  %v1096_v9 = vmul.f32 -0.5, %v2735_v13  ;;  %2748 = vpow2.f32 %v600_v25  ;;  %v1099_v4 = vand.u32 2147483647, %v2735_v13 }
  0xca   : > { %v2737_v16 = vpop.eup %2736  ;;  %vm3951_vm5 = vcmp.lt.f32.partialorder %v1090_v55, 0.0004427343  ;;  %vm301_vm6 = vcmp.gt.f32.partialorder %v3869_v51, 20.0  ;;  %v436_v1 = vmin.f32 %v3938_v26, 20.0  ;;  %v1089_v22 = vmul.f32 %v2733_v54, %v1088_v28 }
  0xcb   : > { %2750 = vlog2.f32 %v1093_v62  ;;  %v3940_v63 = vpop.eup %2738  ;;  %v1068_v61 = vmul.f32 0.6931472, %v2737_v16  ;;  %v1097_v57 = vadd.f32 1.0, %v1096_v9  ;;  %vm3963_vm7 = vcmp.lt.f32.partialorder %v1099_v4, 0.0004427343 }
  0xcc   : > { %2752 = vpow2.f32 %v602_v30  ;;  %v1102_v45 = vadd.f32 1.0, %v3940_v63  ;;  %v3947_v18 = vpop.eup %2740  ;;  %v1108_v35 = vand.u32 2147483647, %v3940_v63  ;;  %v1105_v2 = vmul.f32 -0.5, %v3940_v63 }
  0xcd   : > { %v1074_v41 = vsel %vm3932_vm2, %v1071_v21, %v1068_v61  ;;  %2754 = vpow2.f32 %v604_v17  ;;  %v1111_v5 = vadd.f32 1.0, %v3947_v18  ;;  %v1098_v20 = vmul.f32 %v2735_v13, %v1097_v57 }
  0xce   : > { %v1962_v43 = vsel %vm298_vm0, %v3772_v52, %v1074_v41  ;;  %2756 = vlog2.f32 %v1102_v45  ;;  %v1114_v10 = vmul.f32 -0.5, %v3947_v18  ;;  %vm302_vm8 = vcmp.gt.f32.partialorder %v3872_v32, 20.0 }
  0xcf   : > { %v2743_v31 = vpop.eup %2742  ;;  %v2090_v59 = vmax.f32 %v1962_v43, 0.0001  ;;  %2758 = vlog2.f32 %v1111_v5  ;;  %v606_v58 = vmul.f32 1.442695, %v436_v1  ;;  %v1106_v34 = vadd.f32 1.0, %v1105_v2  ;;  %v4028_v2 = vld [vmem:[%s3335_s30 + $0x160] sm:$0xff] }
  0xd0   : > { %v2745_v33 = vpop.eup %2744  ;;  %v1077_v40 = vmul.f32 0.6931472, %v2743_v31  ;;  %vm3978_vm9 = vcmp.lt.f32.partialorder %v1108_v35, 0.0004427343  ;;  %v437_v23 = vmin.f32 %v3969_v44, 20.0  ;;  %vm303_vm10 = vcmp.gt.f32.partialorder %v3894_v19, 20.0 }
  0xd1   : > { %v1120_v52 = vadd.f32 1.0, %v2745_v33  ;;  %v2218_v46 = vmin.f32 %v2090_v59, 10000.0  ;;  %v1123_v54 = vmul.f32 -0.5, %v2745_v33  ;;  %v1117_v25 = vand.u32 2147483647, %v3947_v18 }
  0xd2   : > { %v2747_v27 = vpop.eup %2746  ;;  %v1083_v38 = vsel %vm3942_vm4, %v1080_v29, %v1077_v40  ;;  %vm304_vm11 = vcmp.gt.f32.partialorder %v3906_v39, 20.0  ;;  %v1126_v30 = vand.u32 2147483647, %v2745_v33  ;;  %v1107_v60 = vmul.f32 %v3940_v63, %v1106_v34 }
  0xd3   : > { %v2749_v49 = vpop.eup %2748  ;;  %v1963_v37 = vsel %vm299_vm1, %v3776_v0, %v1083_v38  ;;  %v1086_v48 = vmul.f32 0.6931472, %v2747_v27  ;;  %2760 = vlog2.f32 %v1120_v52  ;;  %2346 = vst [vmem:[%s3489_s17 + $0x100] sm:$0xff] %v2218_v46  ;;  %v1115_v0 = vadd.f32 1.0, %v1114_v10 }
  0xd4   : > { %v2091_v56 = vmax.f32 %v1963_v37, 0.0001  ;;  %v1129_v12 = vadd.f32 1.0, %v2749_v49  ;;  %v1132_v9 = vmul.f32 -0.5, %v2749_v49  ;;  %v1124_v55 = vadd.f32 1.0, %v1123_v54  ;;  %v4045_v54 = vld [vmem:[%s3335_s30 + $0x170] sm:$0xff] }
  0xd5   : > { %v2751_v47 = vpop.eup %2750  ;;  %v1092_v6 = vsel %vm3951_vm5, %v1089_v22, %v1086_v48  ;;  %v1135_v28 = vand.u32 2147483647, %v2749_v49  ;;  %v1116_v29 = vmul.f32 %v3947_v18, %v1115_v0  ;;  %vm4004_vm12 = vcmp.lt.f32.partialorder %v1117_v25, 0.0004427343  ;;  %v4042_v48 = vld [vmem:[%s3335_s30 + $0x168] sm:$0xff] }
  0xd6   : > { %v3987_v13 = vpop.eup %2752  ;;  %v2219_v11 = vmin.f32 %v2091_v56, 10000.0  ;;  %v1964_v15 = vsel %vm300_vm3, %v3856_v53, %v1092_v6  ;;  %v1095_v62 = vmul.f32 0.6931472, %v2751_v47  ;;  %2762 = vlog2.f32 %v1129_v12 }
  0xd7   : > { %v2092_v21 = vmax.f32 %v1964_v15, 0.0001  ;;  %v3993_v14 = vpop.eup %2754  ;;  %v1138_v53 = vadd.f32 1.0, %v3987_v13  ;;  %vm305_vm13 = vcmp.gt.f32.partialorder %v3917_v42, 20.0  ;;  %v1133_v63 = vadd.f32 1.0, %v1132_v9  ;;  %v4055_v15 = vld [vmem:[%s3335_s30 + $0x178] sm:$0xff] }
  0xd8   : > { %2347 = vst [vmem:[%s3489_s17 + $0x108] sm:$0xff] %v2219_v11  ;;  %v1101_v16 = vsel %vm3963_vm7, %v1098_v20, %v1095_v62  ;;  %v2757_v61 = vpop.eup %2756  ;;  %v1125_v41 = vmul.f32 %v2745_v33, %v1124_v55  ;;  %vm4010_vm14 = vcmp.lt.f32.partialorder %v1126_v30, 0.0004427343  ;;  %v1147_v18 = vadd.f32 1.0, %v3993_v14  ;;  %v4064_v55 = vld [vmem:[%s3335_s30 + $0x180] sm:$0xff] }
  0xd9   : > { %v2220_v3 = vmin.f32 %v2092_v21, 10000.0  ;;  %v1965_v17 = vsel %vm301_vm6, %v3869_v51, %v1101_v16  ;;  %v1104_v45 = vmul.f32 0.6931472, %v2757_v61  ;;  %2764 = vlog2.f32 %v1138_v53  ;;  %v2759_v1 = vpop.eup %2758 }
  0xda   : > { %v2093_v4 = vmax.f32 %v1965_v17, 0.0001  ;;  %v1141_v51 = vmul.f32 -0.5, %v3987_v13  ;;  %vm4018_vm15 = vcmp.lt.f32.partialorder %v1135_v28, 0.0004427343  ;;  %2766 = vpow2.f32 %v606_v58 }
  0xdb   : > { %2348 = vst [vmem:[%s3489_s17 + $0x110] sm:$0xff] %v2220_v3  ;;  %v1110_v43 = vsel %vm3978_vm9, %v1107_v60, %v1104_v45  ;;  %v1113_v59 = vmul.f32 0.6931472, %v2759_v1  ;;  %vm306_vm0 = vcmp.gt.f32.partialorder %v3921_v50, 20.0  ;;  %2768 = vlog2.f32 %v1147_v18  ;;  %v4088_v1 = vld [vmem:[%s3335_s30 + $0x188] sm:$0xff] }
  0xdc   : > { %v2221_v31 = vmin.f32 %v2093_v4, 10000.0  ;;  %v1966_v33 = vsel %vm302_vm8, %v3872_v32, %v1110_v43  ;;  %v1150_v40 = vmul.f32 -0.5, %v3993_v14  ;;  %v1134_v36 = vmul.f32 %v2749_v49, %v1133_v63 }
  0xdd   : > { %v2761_v35 = vpop.eup %2760  ;;  %v2094_v5 = vmax.f32 %v1966_v33, 0.0001  ;;  %v1144_v10 = vand.u32 2147483647, %v3987_v13  ;;  %v1119_v32 = vsel %vm4004_vm12, %v1116_v29, %v1113_v59  ;;  %v1142_v52 = vadd.f32 1.0, %v1141_v51 }
  0xde   : > { %2349 = vst [vmem:[%s3489_s17 + $0x118] sm:$0xff] %v2221_v31  ;;  %v1122_v20 = vmul.f32 0.6931472, %v2761_v35  ;;  %v1153_v27 = vand.u32 2147483647, %v3993_v14  ;;  %v1967_v58 = vsel %vm303_vm10, %v3894_v19, %v1119_v32  ;;  %v438_v49 = vmin.f32 %v4028_v2, 20.0 }
  0xdf   : > { %v608_v46 = vmul.f32 1.442695, %v437_v23  ;;  %v2222_v38 = vmin.f32 %v2094_v5, 10000.0  ;;  %v2095_v34 = vmax.f32 %v1967_v58, 0.0001  ;;  %v1151_v23 = vadd.f32 1.0, %v1150_v40 }
  0xe0   : > { %v1128_v37 = vsel %vm4010_vm14, %v1125_v41, %v1122_v20  ;;  %v2763_v56 = vpop.eup %2762  ;;  %v610_v6 = vmul.f32 1.442695, %v438_v49  ;;  %v1143_v25 = vmul.f32 %v3987_v13, %v1142_v52  ;;  %v439_v12 = vmin.f32 %v4042_v48, 20.0  ;;  %v4091_v31 = vld [vmem:[%s3335_s30 + $0x190] sm:$0xff]  ;;  %v4100_v52 = vld [vmem:[%s3335_s30 + $0x198] sm:$0xff] }
  0xe1   : > { %v1968_v8 = vsel %vm304_vm11, %v3906_v39, %v1128_v37  ;;  %2770 = vpow2.f32 %v608_v46  ;;  %2350 = vst [vmem:[%s3489_s17 + $0x120] sm:$0xff] %v2222_v38  ;;  %v1131_v47 = vmul.f32 0.6931472, %v2763_v56  ;;  %v2223_v0 = vmin.f32 %v2095_v34, 10000.0  ;;  %v4103_v38 = vld [vmem:[%s3335_s30 + $0x1a0] sm:$0xff] }
  0xe2   : > { %v2096_v19 = vmax.f32 %v1968_v8, 0.0001  ;;  %v440_v11 = vmin.f32 %v4045_v54, 20.0  ;;  %vm4059_vm1 = vcmp.lt.f32.partialorder %v1144_v10, 0.0004427343  ;;  %2772 = vpow2.f32 %v610_v6 }
  0xe3   : > { %v2765_v62 = vpop.eup %2764  ;;  %v1137_v9 = vsel %vm4018_vm15, %v1134_v36, %v1131_v47  ;;  %2351 = vst [vmem:[%s3489_s17 + $0x128] sm:$0xff] %v2223_v0  ;;  %vm307_vm2 = vcmp.gt.f32.partialorder %v3926_v7, 20.0  ;;  %v612_v16 = vmul.f32 1.442695, %v439_v12  ;;  %v1152_v53 = vmul.f32 %v3993_v14, %v1151_v23 }
  0xe4   : > { %v2224_v39 = vmin.f32 %v2096_v19, 10000.0  ;;  %v1969_v13 = vsel %vm305_vm13, %v3917_v42, %v1137_v9  ;;  %v1140_v30 = vmul.f32 0.6931472, %v2765_v62  ;;  %v2767_v60 = vpop.eup %2766  ;;  %v614_v61 = vmul.f32 1.442695, %v440_v11  ;;  %v4132_v42 = vld [vmem:[%s3335_s30 + $0x1a8] sm:$0xff] }
  0xe5   : > { %v2097_v28 = vmax.f32 %v1969_v13, 0.0001  ;;  %v441_v3 = vmin.f32 %v4055_v15, 20.0  ;;  %v2769_v17 = vpop.eup %2768  ;;  %vm4076_vm3 = vcmp.lt.f32.partialorder %v1153_v27, 0.0004427343  ;;  %v1156_v57 = vadd.f32 1.0, %v2767_v60 }
  0xe6   : > { %2352 = vst [vmem:[%s3489_s17 + $0x130] sm:$0xff] %v2224_v39  ;;  %v1146_v29 = vsel %vm4059_vm1, %v1143_v25, %v1140_v30  ;;  %v442_v4 = vmin.f32 %v4064_v55, 20.0  ;;  %v1149_v63 = vmul.f32 0.6931472, %v2769_v17  ;;  %2774 = vpow2.f32 %v612_v16 }
  0xe7   : > { %v2225_v45 = vmin.f32 %v2097_v28, 10000.0  ;;  %v1970_v14 = vsel %vm306_vm0, %v3921_v50, %v1146_v29  ;;  %2776 = vlog2.f32 %v1156_v57  ;;  %v1159_v24 = vmul.f32 -0.5, %v2767_v60 }
  0xe8   : > { %v2098_v41 = vmax.f32 %v1970_v14, 0.0001  ;;  %v1155_v51 = vsel %vm4076_vm3, %v1152_v53, %v1149_v63  ;;  %2778 = vpow2.f32 %v614_v61  ;;  %v616_v18 = vmul.f32 1.442695, %v441_v3 }
  0xe9   : > { %2353 = vst [vmem:[%s3489_s17 + $0x138] sm:$0xff] %v2225_v45  ;;  %v1971_v50 = vsel %vm307_vm2, %v3926_v7, %v1155_v51  ;;  %v618_v35 = vmul.f32 1.442695, %v442_v4  ;;  %v1160_v40 = vadd.f32 1.0, %v1159_v24  ;;  %v443_v5 = vmin.f32 %v4088_v1, 20.0 }
  0xea   : > { %v2226_v22 = vmin.f32 %v2098_v41, 10000.0  ;;  %v2099_v33 = vmax.f32 %v1971_v50, 0.0001  ;;  %2780 = vpow2.f32 %v616_v18  ;;  %v444_v20 = vmin.f32 %v4091_v31, 20.0 }
  0xeb   : > { %v2771_v43 = vpop.eup %2770  ;;  %v1162_v27 = vand.u32 2147483647, %v2767_v60  ;;  %vm308_vm4 = vcmp.gt.f32.partialorder %v3938_v26, 20.0  ;;  %v620_v58 = vmul.f32 1.442695, %v443_v5  ;;  %v1161_v49 = vmul.f32 %v2767_v60, %v1160_v40 }
  0xec   : > { %v1165_v59 = vadd.f32 1.0, %v2771_v43  ;;  %2354 = vst [vmem:[%s3489_s17 + $0x140] sm:$0xff] %v2226_v22  ;;  %v2773_v36 = vpop.eup %2772  ;;  %v2227_v10 = vmin.f32 %v2099_v33, 10000.0  ;;  %v1168_v32 = vmul.f32 -0.5, %v2771_v43  ;;  %v622_v37 = vmul.f32 1.442695, %v444_v20 }
  0xed   : > { %v1174_v7 = vadd.f32 1.0, %v2773_v36  ;;  %v1177_v46 = vmul.f32 -0.5, %v2773_v36  ;;  %vm309_vm5 = vcmp.gt.f32.partialorder %v3969_v44, 20.0  ;;  %v1171_v56 = vand.u32 2147483647, %v2771_v43 }
  0xee   : > { %2782 = vlog2.f32 %v1165_v59  ;;  %2355 = vst [vmem:[%s3489_s17 + $0x148] sm:$0xff] %v2227_v10  ;;  %v445_v34 = vmin.f32 %v4100_v52, 20.0  ;;  %v1169_v23 = vadd.f32 1.0, %v1168_v32  ;;  %v1180_v19 = vand.u32 2147483647, %v2773_v36 }
  0xef   : > { %2784 = vpow2.f32 %v618_v35  ;;  %v446_v47 = vmin.f32 %v4103_v38, 20.0  ;;  %vm4110_vm6 = vcmp.lt.f32.partialorder %v1162_v27, 0.0004427343  ;;  %v1178_v25 = vadd.f32 1.0, %v1177_v46 }
  0xf0   : > { %2786 = vlog2.f32 %v1174_v7  ;;  %v2775_v8 = vpop.eup %2774  ;;  %vm310_vm7 = vcmp.gt.f32.partialorder %v4028_v2, 20.0  ;;  %v624_v21 = vmul.f32 1.442695, %v445_v34  ;;  %vm4117_vm8 = vcmp.lt.f32.partialorder %v1171_v56, 0.0004427343 }
  0xf1   : > { %2788 = vpow2.f32 %v620_v58  ;;  %v2777_v6 = vpop.eup %2776  ;;  %v1183_v12 = vadd.f32 1.0, %v2775_v8  ;;  %v1186_v11 = vmul.f32 -0.5, %v2775_v8  ;;  %v1189_v9 = vand.u32 2147483647, %v2775_v8 }
  0xf2   : > { %v4114_v62 = vpop.eup %2778  ;;  %v1158_v39 = vmul.f32 0.6931472, %v2777_v6  ;;  %2790 = vpow2.f32 %v622_v37  ;;  %v626_v16 = vmul.f32 1.442695, %v446_v47  ;;  %v1170_v28 = vmul.f32 %v2771_v43, %v1169_v23 }
  0xf3   : > { %2792 = vlog2.f32 %v1183_v12  ;;  %v1192_v30 = vadd.f32 1.0, %v4114_v62  ;;  %vm4124_vm9 = vcmp.lt.f32.partialorder %v1180_v19, 0.0004427343  ;;  %v1179_v17 = vmul.f32 %v2773_v36, %v1178_v25 }
  0xf4   : > { %v1164_v60 = vsel %vm4110_vm6, %v1161_v49, %v1158_v39  ;;  %2794 = vpow2.f32 %v624_v21  ;;  %v2781_v61 = vpop.eup %2780  ;;  %v1187_v29 = vadd.f32 1.0, %v1186_v11  ;;  %vm311_vm10 = vcmp.gt.f32.partialorder %v4042_v48, 20.0 }
  0xf5   : > { %v1972_v3 = vsel %vm308_vm4, %v3938_v26, %v1164_v60  ;;  %2796 = vlog2.f32 %v1192_v30  ;;  %vm4135_vm11 = vcmp.lt.f32.partialorder %v1189_v9, 0.0004427343  ;;  %v1195_v14 = vmul.f32 -0.5, %v4114_v62 }
  0xf6   : > { %v2100_v4 = vmax.f32 %v1972_v3, 0.0001  ;;  %v1201_v63 = vadd.f32 1.0, %v2781_v61  ;;  %v1198_v26 = vand.u32 2147483647, %v4114_v62  ;;  %v1204_v51 = vmul.f32 -0.5, %v2781_v61 }
  0xf7   : > { %2798 = vpow2.f32 %v626_v16  ;;  %vm312_vm12 = vcmp.gt.f32.partialorder %v4045_v54, 20.0  ;;  %v1207_v43 = vand.u32 2147483647, %v2781_v61  ;;  %v1188_v33 = vmul.f32 %v2775_v8, %v1187_v29 }
  0xf8   : > { %v2783_v57 = vpop.eup %2782  ;;  %v2228_v18 = vmin.f32 %v2100_v4, 10000.0  ;;  %2800 = vlog2.f32 %v1201_v63  ;;  %v447_v40 = vmin.f32 %v4132_v42, 20.0  ;;  %v1196_v10 = vadd.f32 1.0, %v1195_v14 }
  0xf9   : > { %v2785_v41 = vpop.eup %2784  ;;  %v1167_v24 = vmul.f32 0.6931472, %v2783_v57  ;;  %vm313_vm13 = vcmp.gt.f32.partialorder %v4055_v15, 20.0  ;;  %v1205_v27 = vadd.f32 1.0, %v1204_v51  ;;  %vm4157_vm14 = vcmp.lt.f32.partialorder %v1198_v26, 0.0004427343 }
  0xfa   : > { %v1210_v22 = vadd.f32 1.0, %v2785_v41  ;;  %v2787_v50 = vpop.eup %2786  ;;  %v1213_v59 = vmul.f32 -0.5, %v2785_v41  ;;  %2356 = vst [vmem:[%s3489_s17 + $0x150] sm:$0xff] %v2228_v18  ;;  %v1216_v7 = vand.u32 2147483647, %v2785_v41  ;;  %vm314_vm0 = vcmp.gt.f32.partialorder %v4064_v55, 20.0 }
  0xfb   : > { %v1173_v35 = vsel %vm4117_vm8, %v1170_v28, %v1167_v24  ;;  %v4145_v5 = vpop.eup %2788  ;;  %v1176_v36 = vmul.f32 0.6931472, %v2787_v50  ;;  %vm4161_vm15 = vcmp.lt.f32.partialorder %v1207_v43, 0.0004427343  ;;  %v1197_v25 = vmul.f32 %v4114_v62, %v1196_v10 }
  0xfc   : > { %v1973_v20 = vsel %vm309_vm5, %v3969_v44, %v1173_v35  ;;  %2802 = vlog2.f32 %v1210_v22  ;;  %v1219_v46 = vadd.f32 1.0, %v4145_v5  ;;  %v4153_v58 = vpop.eup %2790  ;;  %v1222_v56 = vmul.f32 -0.5, %v4145_v5 }
  0xfd   : > { %v2101_v32 = vmax.f32 %v1973_v20, 0.0001  ;;  %v1182_v37 = vsel %vm4124_vm9, %v1179_v17, %v1176_v36  ;;  %v2793_v34 = vpop.eup %2792  ;;  %v1214_v19 = vadd.f32 1.0, %v1213_v59  ;;  %v1228_v12 = vadd.f32 1.0, %v4153_v58  ;;  %v4211_v59 = vld [vmem:[%s3335_s30 + $0x1b0] sm:$0xff] }
  0xfe   : > { %v1974_v23 = vsel %vm310_vm7, %v4028_v2, %v1182_v37  ;;  %2804 = vlog2.f32 %v1219_v46  ;;  %v4170_v47 = vpop.eup %2794  ;;  %v1185_v0 = vmul.f32 0.6931472, %v2793_v34  ;;  %v1206_v39 = vmul.f32 %v2781_v61, %v1205_v27  ;;  %v4231_v37 = vld [vmem:[%s3335_s30 + $0x1b8] sm:$0xff] }
  0xff   : > { %v2229_v8 = vmin.f32 %v2101_v32, 10000.0  ;;  %v2102_v6 = vmax.f32 %v1974_v23, 0.0001  ;;  %v2797_v11 = vpop.eup %2796  ;;  %vm4175_vm1 = vcmp.lt.f32.partialorder %v1216_v7, 0.0004427343  ;;  %v1223_v2 = vadd.f32 1.0, %v1222_v56 }
 0x100   : > { %v1237_v21 = vadd.f32 1.0, %v4170_v47  ;;  %v1191_v30 = vsel %vm4135_vm11, %v1188_v33, %v1185_v0  ;;  %v1194_v16 = vmul.f32 0.6931472, %v2797_v11  ;;  %vm315_vm2 = vcmp.gt.f32.partialorder %v4088_v1, 20.0  ;;  %v4297_v32 = vld [vmem:[%s3335_s30 + $0x1f0] sm:$0xff] }
 0x101   : > { %2357 = vst [vmem:[%s3489_s17 + $0x158] sm:$0xff] %v2229_v8  ;;  %v2230_v13 = vmin.f32 %v2102_v6, 10000.0  ;;  %v1231_v62 = vmul.f32 -0.5, %v4153_v58  ;;  %v4184_v60 = vpop.eup %2798  ;;  %v1975_v28 = vsel %vm311_vm10, %v4042_v48, %v1191_v30  ;;  %v1215_v53 = vmul.f32 %v2785_v41, %v1214_v19  ;;  %v4243_v8 = vld [vmem:[%s3335_s30 + $0x1c0] sm:$0xff] }
 0x102   : > { %v1225_v61 = vand.u32 2147483647, %v4145_v5  ;;  %2806 = vlog2.f32 %v1228_v12  ;;  %v2801_v3 = vpop.eup %2800  ;;  %v2103_v17 = vmax.f32 %v1975_v28, 0.0001  ;;  %v1200_v29 = vsel %vm4157_vm14, %v1197_v25, %v1194_v16  ;;  %v4252_v12 = vld [vmem:[%s3335_s30 + $0x1c8] sm:$0xff]  ;;  %v4261_v28 = vld [vmem:[%s3335_s30 + $0x1d0] sm:$0xff] }
 0x103   : > { %2358 = vst [vmem:[%s3489_s17 + $0x160] sm:$0xff] %v2230_v13  ;;  %2808 = vlog2.f32 %v1237_v21  ;;  %v1240_v57 = vmul.f32 -0.5, %v4170_v47  ;;  %v1976_v4 = vsel %vm312_vm12, %v4045_v54, %v1200_v29  ;;  %v1203_v45 = vmul.f32 0.6931472, %v2801_v3  ;;  %v4269_v3 = vld [vmem:[%s3335_s30 + $0x1d8] sm:$0xff] }
 0x104   : > { %v1224_v48 = vmul.f32 %v4145_v5, %v1223_v2  ;;  %v1234_v14 = vand.u32 2147483647, %v4153_v58  ;;  %v2231_v41 = vmin.f32 %v2103_v17, 10000.0  ;;  %v2104_v24 = vmax.f32 %v1976_v4, 0.0001 }
 0x105   : > { %vm316_vm3 = vcmp.gt.f32.partialorder %v4091_v31, 20.0  ;;  %v1232_v26 = vadd.f32 1.0, %v1231_v62  ;;  %v1246_v51 = vadd.f32 1.0, %v4184_v60  ;;  %v1209_v18 = vsel %vm4161_vm15, %v1206_v39, %v1203_v45 }
 0x106   : > { %v2803_v63 = vpop.eup %2802  ;;  %vm317_vm4 = vcmp.gt.f32.partialorder %v4100_v52, 20.0  ;;  %v1243_v54 = vand.u32 2147483647, %v4170_v47  ;;  %v1249_v22 = vmul.f32 -0.5, %v4184_v60  ;;  %2359 = vst [vmem:[%s3489_s17 + $0x168] sm:$0xff] %v2231_v41  ;;  %v2232_v50 = vmin.f32 %v2104_v24, 10000.0 }
 0x107   : > { %v1212_v43 = vmul.f32 0.6931472, %v2803_v63  ;;  %v1977_v35 = vsel %vm313_vm13, %v4055_v15, %v1209_v18  ;;  %v1241_v33 = vadd.f32 1.0, %v1240_v57  ;;  %2810 = vlog2.f32 %v1246_v51  ;;  %v4281_v63 = vld [vmem:[%s3335_s30 + $0x1e0] sm:$0xff] }
 0x108   : > { %v2805_v5 = vpop.eup %2804  ;;  %v2105_v20 = vmax.f32 %v1977_v35, 0.0001  ;;  %vm4215_vm5 = vcmp.lt.f32.partialorder %v1225_v61, 0.0004427343  ;;  %vm4219_vm6 = vcmp.lt.f32.partialorder %v1234_v14, 0.0004427343  ;;  %v1233_v7 = vmul.f32 %v4153_v58, %v1232_v26 }
 0x109   : > { %v1218_v36 = vsel %vm4175_vm1, %v1215_v53, %v1212_v43  ;;  %2360 = vst [vmem:[%s3489_s17 + $0x170] sm:$0xff] %v2232_v50  ;;  %v1221_v27 = vmul.f32 0.6931472, %v2805_v5  ;;  %v628_v46 = vmul.f32 1.442695, %v447_v40  ;;  %vm318_vm8 = vcmp.gt.f32.partialorder %v4103_v38, 20.0 }
 0x10a   : > { %v1978_v15 = vsel %vm314_vm0, %v4064_v55, %v1218_v36  ;;  %v2233_v49 = vmin.f32 %v2105_v20, 10000.0  ;;  %vm4233_vm7 = vcmp.lt.f32.partialorder %v1243_v54, 0.0004427343  ;;  %v1250_v34 = vadd.f32 1.0, %v1249_v22  ;;  %v4292_v50 = vld [vmem:[%s3335_s30 + $0x1e8] sm:$0xff] }
 0x10b   : > { %v2106_v44 = vmax.f32 %v1978_v15, 0.0001  ;;  %v1227_v55 = vsel %vm4215_vm5, %v1224_v48, %v1221_v27  ;;  %v1242_v58 = vmul.f32 %v4170_v47, %v1241_v33  ;;  %2812 = vpow2.f32 %v628_v46 }
 0x10c   : > { %v448_v40 = vmin.f32 %v4211_v59, 20.0  ;;  %v2807_v23 = vpop.eup %2806  ;;  %2361 = vst [vmem:[%s3489_s17 + $0x178] sm:$0xff] %v2233_v49  ;;  %v1979_v6 = vsel %vm315_vm2, %v4088_v1, %v1227_v55  ;;  %v1252_v0 = vand.u32 2147483647, %v4184_v60  ;;  %v449_v25 = vmin.f32 %v4231_v37, 20.0 }
 0x10d   : > { %v2234_v19 = vmin.f32 %v2106_v44, 10000.0  ;;  %v2809_v47 = vpop.eup %2808  ;;  %v2107_v11 = vmax.f32 %v1979_v6, 0.0001  ;;  %v1230_v39 = vmul.f32 0.6931472, %v2807_v23  ;;  %v1251_v21 = vmul.f32 %v4184_v60, %v1250_v34 }
 0x10e   : > { %v630_v9 = vmul.f32 1.442695, %v448_v40  ;;  %v1239_v2 = vmul.f32 0.6931472, %v2809_v47  ;;  %v632_v13 = vmul.f32 1.442695, %v449_v25 }
 0x10f   : > { %2362 = vst [vmem:[%s3489_s17 + $0x180] sm:$0xff] %v2234_v19  ;;  %v450_v1 = vmin.f32 %v4243_v8, 20.0  ;;  %v2235_v30 = vmin.f32 %v2107_v11, 10000.0  ;;  %v1236_v16 = vsel %vm4219_vm6, %v1233_v7, %v1230_v39  ;;  %v451_v62 = vmin.f32 %v4252_v12, 20.0  ;;  %v4303_v25 = vld [vmem:[%s3335_s30 + $0x1f8] sm:$0xff] }
 0x110   : > { %2814 = vpow2.f32 %v630_v9  ;;  %v1980_v53 = vsel %vm316_vm3, %v4091_v31, %v1236_v16  ;;  %v1245_v60 = vsel %vm4233_vm7, %v1242_v58, %v1239_v2  ;;  %vm4275_vm9 = vcmp.lt.f32.partialorder %v1252_v0, 0.0004427343 }
 0x111   : > { %2816 = vpow2.f32 %v632_v13  ;;  %v634_v61 = vmul.f32 1.442695, %v450_v1  ;;  %v2811_v17 = vpop.eup %2810  ;;  %2363 = vst [vmem:[%s3489_s17 + $0x188] sm:$0xff] %v2235_v30  ;;  %v2108_v29 = vmax.f32 %v1980_v53, 0.0001  ;;  %v1981_v57 = vsel %vm317_vm4, %v4100_v52, %v1245_v60 }
 0x112   : > { %v636_v31 = vmul.f32 1.442695, %v451_v62  ;;  %v2109_v45 = vmax.f32 %v1981_v57, 0.0001  ;;  %v1248_v48 = vmul.f32 0.6931472, %v2811_v17 }
 0x113   : > { %2818 = vpow2.f32 %v634_v61  ;;  %v452_v14 = vmin.f32 %v4261_v28, 20.0  ;;  %v2236_v41 = vmin.f32 %v2108_v29, 10000.0  ;;  %v453_v24 = vmin.f32 %v4269_v3, 20.0 }
 0x114   : > { %2820 = vpow2.f32 %v636_v31  ;;  %v2237_v26 = vmin.f32 %v2109_v45, 10000.0  ;;  %v1254_v52 = vsel %vm4275_vm9, %v1251_v21, %v1248_v48  ;;  %v454_v22 = vmin.f32 %v4281_v63, 20.0 }
 0x115   : > { %v638_v51 = vmul.f32 1.442695, %v452_v14  ;;  %v2813_v18 = vpop.eup %2812  ;;  %2364 = vst [vmem:[%s3489_s17 + $0x190] sm:$0xff] %v2236_v41  ;;  %v1982_v43 = vsel %vm318_vm8, %v4103_v38, %v1254_v52  ;;  %v640_v54 = vmul.f32 1.442695, %v453_v24  ;;  %v455_v10 = vmin.f32 %v4292_v50, 20.0 }
 0x116   : > { %2365 = vst [vmem:[%s3489_s17 + $0x198] sm:$0xff] %v2237_v26  ;;  %v2110_v35 = vmax.f32 %v1982_v43, 0.0001  ;;  %v1255_v33 = vadd.f32 1.0, %v2813_v18  ;;  %v1258_v5 = vmul.f32 -0.5, %v2813_v18  ;;  %v456_v34 = vmin.f32 %v4297_v32, 20.0 }
 0x117   : > { %2822 = vpow2.f32 %v638_v51  ;;  %v642_v20 = vmul.f32 1.442695, %v454_v22  ;;  %v1261_v7 = vand.u32 2147483647, %v2813_v18  ;;  %vm319_vm10 = vcmp.gt.f32.partialorder %v4132_v42, 20.0 }
 0x118   : > { %v2238_v36 = vmin.f32 %v2110_v35, 10000.0  ;;  %2824 = vlog2.f32 %v1255_v33  ;;  %v1259_v27 = vadd.f32 1.0, %v1258_v5  ;;  %v644_v40 = vmul.f32 1.442695, %v455_v10 }
 0x119   : > { %2826 = vpow2.f32 %v640_v54  ;;  %vm4305_vm11 = vcmp.lt.f32.partialorder %v1261_v7, 0.0004427343  ;;  %vm320_vm12 = vcmp.gt.f32.partialorder %v4211_v59, 20.0  ;;  %v646_v13 = vmul.f32 1.442695, %v456_v34 }
 0x11a   : > { %v2815_v15 = vpop.eup %2814  ;;  %2366 = vst [vmem:[%s3489_s17 + $0x1a0] sm:$0xff] %v2238_v36  ;;  %2828 = vpow2.f32 %v642_v20  ;;  %v1260_v2 = vmul.f32 %v2813_v18, %v1259_v27  ;;  %vm321_vm14 = vcmp.gt.f32.partialorder %v4231_v37, 20.0  ;;  %v457_v16 = vmin.f32 %v4303_v25, 20.0 }
 0x11b   : > { %v2817_v38 = vpop.eup %2816  ;;  %v1264_v46 = vadd.f32 1.0, %v2815_v15  ;;  %v1267_v49 = vmul.f32 -0.5, %v2815_v15  ;;  %v1270_v58 = vand.u32 2147483647, %v2815_v15  ;;  %vm322_vm0 = vcmp.gt.f32.partialorder %v4243_v8, 20.0 }
 0x11c   : > { %v1273_v44 = vadd.f32 1.0, %v2817_v38  ;;  %v1276_v56 = vmul.f32 -0.5, %v2817_v38  ;;  %v1279_v6 = vand.u32 2147483647, %v2817_v38  ;;  %vm323_vm1 = vcmp.gt.f32.partialorder %v4252_v12, 20.0 }
 0x11d   : > { %v2819_v55 = vpop.eup %2818  ;;  %2830 = vlog2.f32 %v1264_v46  ;;  %v1268_v19 = vadd.f32 1.0, %v1267_v49  ;;  %vm4310_vm13 = vcmp.lt.f32.partialorder %v1270_v58, 0.0004427343  ;;  %v648_v41 = vmul.f32 1.442695, %v457_v16 }
 0x11e   : > { %v2821_v23 = vpop.eup %2820  ;;  %2832 = vlog2.f32 %v1273_v44  ;;  %v1282_v0 = vadd.f32 1.0, %v2819_v55  ;;  %v1277_v11 = vadd.f32 1.0, %v1276_v56  ;;  %v1285_v39 = vmul.f32 -0.5, %v2819_v55 }
 0x11f   : > { %v1291_v9 = vadd.f32 1.0, %v2821_v23  ;;  %v1294_v21 = vmul.f32 -0.5, %v2821_v23  ;;  %v1288_v30 = vand.u32 2147483647, %v2819_v55  ;;  %v1269_v53 = vmul.f32 %v2815_v15, %v1268_v19 }
 0x120   : > { %2834 = vlog2.f32 %v1282_v0  ;;  %vm4316_vm15 = vcmp.lt.f32.partialorder %v1279_v6, 0.0004427343  ;;  %v1297_v61 = vand.u32 2147483647, %v2821_v23  ;;  %v1278_v29 = vmul.f32 %v2817_v38, %v1277_v11 }
 0x121   : > { %2836 = vlog2.f32 %v1291_v9  ;;  %v2823_v62 = vpop.eup %2822  ;;  %v1286_v57 = vadd.f32 1.0, %v1285_v39  ;;  %v1295_v14 = vadd.f32 1.0, %v1294_v21  ;;  %vm4324_vm2 = vcmp.lt.f32.partialorder %v1288_v30, 0.0004427343 }
 0x122   : > { %2838 = vpow2.f32 %v644_v40  ;;  %v2825_v17 = vpop.eup %2824  ;;  %v1300_v4 = vadd.f32 1.0, %v2823_v62  ;;  %v1303_v31 = vmul.f32 -0.5, %v2823_v62  ;;  %v1306_v26 = vand.u32 2147483647, %v2823_v62 }
 0x123   : > { %v4321_v45 = vpop.eup %2826  ;;  %v1257_v48 = vmul.f32 0.6931472, %v2825_v17  ;;  %2840 = vpow2.f32 %v646_v13  ;;  %vm4333_vm3 = vcmp.lt.f32.partialorder %v1297_v61, 0.0004427343  ;;  %v1287_v15 = vmul.f32 %v2819_v55, %v1286_v57 }
 0x124   : > { %2842 = vlog2.f32 %v1300_v4  ;;  %v1309_v52 = vadd.f32 1.0, %v4321_v45  ;;  %v4329_v51 = vpop.eup %2828  ;;  %v1304_v54 = vadd.f32 1.0, %v1303_v31  ;;  %v1312_v33 = vmul.f32 -0.5, %v4321_v45 }
 0x125   : > { %v1263_v18 = vsel %vm4305_vm11, %v1260_v2, %v1257_v48  ;;  %2844 = vpow2.f32 %v648_v41  ;;  %v1318_v5 = vadd.f32 1.0, %v4329_v51  ;;  %v1296_v38 = vmul.f32 %v2821_v23, %v1295_v14  ;;  %v4468_v14 = vld [vmem:[%s3335_s30 + $0x238] sm:$0xff] }
 0x126   : > { %v1983_v35 = vsel %vm319_vm10, %v4132_v42, %v1263_v18  ;;  %2846 = vlog2.f32 %v1309_v52  ;;  %vm324_vm4 = vcmp.gt.f32.partialorder %v4261_v28, 20.0  ;;  %vm4343_vm5 = vcmp.lt.f32.partialorder %v1306_v26, 0.0004427343 }
 0x127   : > { %v2831_v22 = vpop.eup %2830  ;;  %v2111_v36 = vmax.f32 %v1983_v35, 0.0001  ;;  %2848 = vlog2.f32 %v1318_v5  ;;  %v1321_v42 = vmul.f32 -0.5, %v4329_v51  ;;  %v1305_v56 = vmul.f32 %v2823_v62, %v1304_v54 }
 0x128   : > { %v2833_v20 = vpop.eup %2832  ;;  %v1266_v10 = vmul.f32 0.6931472, %v2831_v22  ;;  %vm325_vm6 = vcmp.gt.f32.partialorder %v4269_v3, 20.0  ;;  %v1315_v34 = vand.u32 2147483647, %v4321_v45  ;;  %v1313_v19 = vadd.f32 1.0, %v1312_v33 }
 0x129   : > { %v1275_v27 = vmul.f32 0.6931472, %v2833_v20  ;;  %v2239_v49 = vmin.f32 %v2111_v36, 10000.0  ;;  %vm326_vm7 = vcmp.gt.f32.partialorder %v4281_v63, 20.0  ;;  %v1324_v39 = vand.u32 2147483647, %v4329_v51 }
 0x12a   : > { %v2835_v46 = vpop.eup %2834  ;;  %v1272_v44 = vsel %vm4310_vm13, %v1269_v53, %v1266_v10  ;;  %v1322_v2 = vadd.f32 1.0, %v1321_v42  ;;  %vm4385_vm8 = vcmp.lt.f32.partialorder %v1315_v34, 0.0004427343  ;;  %v4407_v20 = vld [vmem:[%s3335_s30 + $0x200] sm:$0xff]  ;;  %vm327_vm10 = vcmp.gt.f32.partialorder %v4292_v50, 20.0  ;;  %v4421_v42 = vld [vmem:[%s3335_s30 + $0x210] sm:$0xff] }
 0x12b   : > { %v2837_v55 = vpop.eup %2836  ;;  %v1984_v58 = vsel %vm320_vm12, %v4211_v59, %v1272_v44  ;;  %v1281_v40 = vsel %vm4316_vm15, %v1278_v29, %v1275_v27  ;;  %v1284_v23 = vmul.f32 0.6931472, %v2835_v46  ;;  %2367 = vst [vmem:[%s3489_s17 + $0x1a8] sm:$0xff] %v2239_v49  ;;  %vm4389_vm9 = vcmp.lt.f32.partialorder %v1324_v39, 0.0004427343 }
 0x12c   : > { %v4357_v6 = vpop.eup %2838  ;;  %v2112_v0 = vmax.f32 %v1984_v58, 0.0001  ;;  %v1985_v47 = vsel %vm321_vm14, %v4231_v37, %v1281_v40  ;;  %v1293_v11 = vmul.f32 0.6931472, %v2837_v55  ;;  %v1323_v52 = vmul.f32 %v4329_v51, %v1322_v2  ;;  %v4436_v40 = vld [vmem:[%s3335_s30 + $0x218] sm:$0xff] }
 0x12d   : > { %v2113_v59 = vmax.f32 %v1985_v47, 0.0001  ;;  %v1290_v9 = vsel %vm4324_vm2, %v1287_v15, %v1284_v23  ;;  %v1327_v21 = vadd.f32 1.0, %v4357_v6  ;;  %v4368_v13 = vpop.eup %2840  ;;  %v1330_v16 = vmul.f32 -0.5, %v4357_v6  ;;  %v4415_v15 = vld [vmem:[%s3335_s30 + $0x208] sm:$0xff] }
 0x12e   : > { %v2240_v1 = vmin.f32 %v2112_v0, 10000.0  ;;  %v1986_v37 = vsel %vm322_vm0, %v4243_v8, %v1290_v9  ;;  %v1299_v30 = vsel %vm4333_vm3, %v1296_v38, %v1293_v11  ;;  %v2843_v62 = vpop.eup %2842  ;;  %v1314_v8 = vmul.f32 %v4321_v45, %v1313_v19  ;;  %v4450_v9 = vld [vmem:[%s3335_s30 + $0x228] sm:$0xff] }
 0x12f   : > { %v2241_v53 = vmin.f32 %v2113_v59, 10000.0  ;;  %v2114_v60 = vmax.f32 %v1986_v37, 0.0001  ;;  %v1987_v61 = vsel %vm323_vm1, %v4252_v12, %v1299_v30  ;;  %2850 = vlog2.f32 %v1327_v21  ;;  %v4379_v17 = vpop.eup %2844 }
 0x130   : > { %2368 = vst [vmem:[%s3489_s17 + $0x1b0] sm:$0xff] %v2240_v1  ;;  %v2115_v29 = vmax.f32 %v1987_v61, 0.0001  ;;  %v1302_v57 = vmul.f32 0.6931472, %v2843_v62  ;;  %v1336_v4 = vadd.f32 1.0, %v4368_v13  ;;  %v2847_v31 = vpop.eup %2846 }
 0x131   : > { %2369 = vst [vmem:[%s3489_s17 + $0x1b8] sm:$0xff] %v2241_v53  ;;  %v2242_v48 = vmin.f32 %v2114_v60, 10000.0  ;;  %v1339_v41 = vmul.f32 -0.5, %v4368_v13  ;;  %v1311_v26 = vmul.f32 0.6931472, %v2847_v31  ;;  %v2849_v18 = vpop.eup %2848  ;;  %v1331_v54 = vadd.f32 1.0, %v1330_v16 }
 0x132   : > { %v2243_v24 = vmin.f32 %v2115_v29, 10000.0  ;;  %v1308_v45 = vsel %vm4343_vm5, %v1305_v56, %v1302_v57  ;;  %v1333_v22 = vand.u32 2147483647, %v4357_v6  ;;  %2852 = vlog2.f32 %v1336_v4  ;;  %v4459_v62 = vld [vmem:[%s3335_s30 + $0x230] sm:$0xff] }
 0x133   : > { %2370 = vst [vmem:[%s3489_s17 + $0x1c0] sm:$0xff] %v2242_v48  ;;  %v1988_v43 = vsel %vm324_vm4, %v4261_v28, %v1308_v45  ;;  %v1317_v33 = vsel %vm4385_vm8, %v1314_v8, %v1311_v26  ;;  %v1320_v5 = vmul.f32 0.6931472, %v2849_v18  ;;  %v1345_v51 = vadd.f32 1.0, %v4379_v17  ;;  %v4477_v45 = vld [vmem:[%s3335_s30 + $0x240] sm:$0xff]  ;;  %v4483_v18 = vld [vmem:[%s3335_s30 + $0x248] sm:$0xff] }
 0x134   : > { %2371 = vst [vmem:[%s3489_s17 + $0x1c8] sm:$0xff] %v2243_v24  ;;  %v2116_v35 = vmax.f32 %v1988_v43, 0.0001  ;;  %v1989_v28 = vsel %vm325_vm6, %v4269_v3, %v1317_v33  ;;  %v1340_v36 = vadd.f32 1.0, %v1339_v41  ;;  %v1342_v10 = vand.u32 2147483647, %v4368_v13 }
 0x135   : > { %v2117_v27 = vmax.f32 %v1989_v28, 0.0001  ;;  %v1326_v7 = vsel %vm4389_vm9, %v1323_v52, %v1320_v5  ;;  %vm328_vm11 = vcmp.gt.f32.partialorder %v4297_v32, 20.0  ;;  %2854 = vlog2.f32 %v1345_v51 }
 0x136   : > { %v2244_v38 = vmin.f32 %v2116_v35, 10000.0  ;;  %v1990_v3 = vsel %vm326_vm7, %v4281_v63, %v1326_v7  ;;  %vm4426_vm12 = vcmp.lt.f32.partialorder %v1333_v22, 0.0004427343  ;;  %v1348_v49 = vmul.f32 -0.5, %v4379_v17  ;;  %v4439_v63 = vld [vmem:[%s3335_s30 + $0x220] sm:$0xff] }
 0x137   : > { %v458_v44 = vmin.f32 %v4407_v20, 20.0  ;;  %v2245_v56 = vmin.f32 %v2117_v27, 10000.0  ;;  %v2118_v34 = vmax.f32 %v1990_v3, 0.0001  ;;  %v1332_v55 = vmul.f32 %v4357_v6, %v1331_v54 }
 0x138   : > { %2372 = vst [vmem:[%s3489_s17 + $0x1d0] sm:$0xff] %v2244_v38  ;;  %v459_v58 = vmin.f32 %v4415_v15, 20.0  ;;  %vm4441_vm13 = vcmp.lt.f32.partialorder %v1342_v10, 0.0004427343  ;;  %vm329_vm14 = vcmp.gt.f32.partialorder %v4303_v25, 20.0  ;;  %v460_v47 = vmin.f32 %v4421_v42, 20.0 }
 0x139   : > { %v2851_v23 = vpop.eup %2850  ;;  %v650_v0 = vmul.f32 1.442695, %v458_v44  ;;  %2373 = vst [vmem:[%s3489_s17 + $0x1d8] sm:$0xff] %v2245_v56  ;;  %v2246_v6 = vmin.f32 %v2118_v34, 10000.0  ;;  %v1341_v39 = vmul.f32 %v4368_v13, %v1340_v36  ;;  %v1349_v2 = vadd.f32 1.0, %v1348_v49  ;;  %v4496_v34 = vld [vmem:[%s3335_s30 + $0x250] sm:$0xff] }
 0x13a   : > { %v1329_v11 = vmul.f32 0.6931472, %v2851_v23  ;;  %v652_v59 = vmul.f32 1.442695, %v459_v58  ;;  %v654_v21 = vmul.f32 1.442695, %v460_v47 }
 0x13b   : > { %2856 = vpow2.f32 %v650_v0  ;;  %v461_v1 = vmin.f32 %v4436_v40, 20.0  ;;  %2374 = vst [vmem:[%s3489_s17 + $0x1e0] sm:$0xff] %v2246_v6  ;;  %v1351_v30 = vand.u32 2147483647, %v4379_v17  ;;  %v462_v16 = vmin.f32 %v4439_v63, 20.0 }
 0x13c   : > { %v1335_v37 = vsel %vm4426_vm12, %v1332_v55, %v1329_v11  ;;  %2858 = vpow2.f32 %v652_v59  ;;  %v2853_v13 = vpop.eup %2852  ;;  %v463_v61 = vmin.f32 %v4450_v9, 20.0  ;;  %v1350_v4 = vmul.f32 %v4379_v17, %v1349_v2 }
 0x13d   : > { %v1991_v53 = vsel %vm327_vm10, %v4292_v50, %v1335_v37  ;;  %2860 = vpow2.f32 %v654_v21  ;;  %v656_v60 = vmul.f32 1.442695, %v461_v1  ;;  %v1338_v57 = vmul.f32 0.6931472, %v2853_v13 }
 0x13e   : > { %v2119_v29 = vmax.f32 %v1991_v53, 0.0001  ;;  %v658_v8 = vmul.f32 1.442695, %v462_v16  ;;  %v660_v31 = vmul.f32 1.442695, %v463_v61 }
 0x13f   : > { %2862 = vpow2.f32 %v656_v60  ;;  %v464_v48 = vmin.f32 %v4459_v62, 20.0  ;;  %v2855_v12 = vpop.eup %2854  ;;  %v1344_v41 = vsel %vm4441_vm13, %v1341_v39, %v1338_v57  ;;  %vm4472_vm15 = vcmp.lt.f32.partialorder %v1351_v30, 0.0004427343 }
 0x140   : > { %v2247_v50 = vmin.f32 %v2119_v29, 10000.0  ;;  %2864 = vpow2.f32 %v658_v8  ;;  %v1992_v17 = vsel %vm328_vm11, %v4297_v32, %v1344_v41  ;;  %v1347_v26 = vmul.f32 0.6931472, %v2855_v12 }
 0x141   : > { %2866 = vpow2.f32 %v660_v31  ;;  %v662_v52 = vmul.f32 1.442695, %v464_v48  ;;  %v2120_v43 = vmax.f32 %v1992_v17, 0.0001  ;;  %v465_v54 = vmin.f32 %v4468_v14, 20.0 }
 0x142   : > { %2375 = vst [vmem:[%s3489_s17 + $0x1e8] sm:$0xff] %v2247_v50  ;;  %v1353_v22 = vsel %vm4472_vm15, %v1350_v4, %v1347_v26  ;;  %v466_v35 = vmin.f32 %v4477_v45, 20.0  ;;  %v467_v51 = vmin.f32 %v4483_v18, 20.0  ;;  %v468_v59 = vmin.f32 %v4496_v34, 20.0 }
 0x143   : > { %2868 = vpow2.f32 %v662_v52  ;;  %v2248_v33 = vmin.f32 %v2120_v43, 10000.0  ;;  %v1993_v32 = vsel %vm329_vm14, %v4303_v25, %v1353_v22  ;;  %v664_v5 = vmul.f32 1.442695, %v465_v54 }
 0x144   : > { %v2121_v36 = vmax.f32 %v1993_v32, 0.0001  ;;  %v4498_v55 = vmul.f32 1.442695, %v466_v35  ;;  %v4500_v58 = vmul.f32 1.442695, %v467_v51 }
 0x145   : > { %v2857_v28 = vpop.eup %2856  ;;  %2376 = vst [vmem:[%s3489_s17 + $0x1f0] sm:$0xff] %v2248_v33  ;;  %2870 = vpow2.f32 %v664_v5  ;;  %vm330_vm1 = vcmp.gt.f32.partialorder %v4407_v20, 20.0  ;;  %vm331_vm3 = vcmp.gt.f32.partialorder %v4415_v15, 20.0  ;;  %vm332_vm4 = vcmp.gt.f32.partialorder %v4421_v42, 20.0 }
 0x146   : > { %v2859_v10 = vpop.eup %2858  ;;  %v1354_v38 = vadd.f32 1.0, %v2857_v28  ;;  %v1357_v27 = vmul.f32 -0.5, %v2857_v28  ;;  %v1360_v7 = vand.u32 2147483647, %v2857_v28  ;;  %v2249_v46 = vmin.f32 %v2121_v36, 10000.0 }
 0x147   : > { %v2861_v3 = vpop.eup %2860  ;;  %v1363_v49 = vadd.f32 1.0, %v2859_v10  ;;  %v1366_v44 = vmul.f32 -0.5, %v2859_v10  ;;  %v1369_v56 = vand.u32 2147483647, %v2859_v10  ;;  %vm333_vm6 = vcmp.gt.f32.partialorder %v4436_v40, 20.0 }
 0x148   : > { %2872 = vlog2.f32 %v1354_v38  ;;  %v1372_v25 = vadd.f32 1.0, %v2861_v3  ;;  %2377 = vst [vmem:[%s3489_s17 + $0x1f8] sm:$0xff] %v2249_v46  ;;  %v1358_v19 = vadd.f32 1.0, %v1357_v27  ;;  %v1375_v47 = vmul.f32 -0.5, %v2861_v3 }
 0x149   : > { %v2863_v23 = vpop.eup %2862  ;;  %2874 = vlog2.f32 %v1363_v49  ;;  %v1367_v0 = vadd.f32 1.0, %v1366_v44  ;;  %vm4503_vm0 = vcmp.lt.f32.partialorder %v1360_v7, 0.0004427343  ;;  %vm4509_vm2 = vcmp.lt.f32.partialorder %v1369_v56, 0.0004427343 }
 0x14a   : > { %v2865_v6 = vpop.eup %2864  ;;  %2876 = vlog2.f32 %v1372_v25  ;;  %v1381_v39 = vadd.f32 1.0, %v2863_v23  ;;  %v1376_v1 = vadd.f32 1.0, %v1375_v47  ;;  %v1378_v37 = vand.u32 2147483647, %v2861_v3 }
 0x14b   : > { %v2867_v2 = vpop.eup %2866  ;;  %v1384_v30 = vmul.f32 -0.5, %v2863_v23  ;;  %v1387_v16 = vand.u32 2147483647, %v2863_v23  ;;  %v1390_v13 = vadd.f32 1.0, %v2865_v6  ;;  %v1393_v53 = vmul.f32 -0.5, %v2865_v6 }
 0x14c   : > { %2878 = vlog2.f32 %v1381_v39  ;;  %v1359_v61 = vmul.f32 %v2857_v28, %v1358_v19  ;;  %v1368_v29 = vmul.f32 %v2859_v10, %v1367_v0  ;;  %v1396_v8 = vand.u32 2147483647, %v2865_v6  ;;  %v4548_v19 = vld [vmem:[%s3335_s30 + $0x258] sm:$0xff] }
 0x14d   : > { %v2869_v60 = vpop.eup %2868  ;;  %v1385_v57 = vadd.f32 1.0, %v1384_v30  ;;  %2880 = vlog2.f32 %v1390_v13  ;;  %v1394_v4 = vadd.f32 1.0, %v1393_v53  ;;  %v1399_v31 = vadd.f32 1.0, %v2867_v2  ;;  %v4568_v13 = vld [vmem:[%s3335_s30 + $0x260] sm:$0xff] }
 0x14e   : > { %v1402_v48 = vmul.f32 -0.5, %v2867_v2  ;;  %v1377_v12 = vmul.f32 %v2861_v3, %v1376_v1  ;;  %vm4515_vm5 = vcmp.lt.f32.partialorder %v1378_v37, 0.0004427343  ;;  %v1405_v41 = vand.u32 2147483647, %v2867_v2 }
 0x14f   : > { %v1408_v24 = vadd.f32 1.0, %v2869_v60  ;;  %v4520_v17 = vpop.eup %2870  ;;  %vm4522_vm7 = vcmp.lt.f32.partialorder %v1387_v16, 0.0004427343  ;;  %2882 = vlog2.f32 %v1399_v31  ;;  %v1411_v43 = vmul.f32 -0.5, %v2869_v60 }
 0x150   : > { %v1403_v52 = vadd.f32 1.0, %v1402_v48  ;;  %v1386_v54 = vmul.f32 %v2863_v23, %v1385_v57  ;;  %vm334_vm8 = vcmp.gt.f32.partialorder %v4439_v63, 20.0  ;;  %v1414_v22 = vand.u32 2147483647, %v2869_v60 }
 0x151   : > { %2884 = vlog2.f32 %v1408_v24  ;;  %v1417_v35 = vadd.f32 1.0, %v4520_v17  ;;  %v1395_v32 = vmul.f32 %v2865_v6, %v1394_v4  ;;  %vm4528_vm9 = vcmp.lt.f32.partialorder %v1396_v8, 0.0004427343 }
 0x152   : > { %v2873_v33 = vpop.eup %2872  ;;  %v1412_v51 = vadd.f32 1.0, %v1411_v43  ;;  %v1420_v28 = vmul.f32 -0.5, %v4520_v17  ;;  %vm335_vm10 = vcmp.gt.f32.partialorder %v4450_v9, 20.0  ;;  %vm4534_vm11 = vcmp.lt.f32.partialorder %v1405_v41, 0.0004427343 }
 0x153   : > { %v2875_v36 = vpop.eup %2874  ;;  %v1356_v10 = vmul.f32 0.6931472, %v2873_v33  ;;  %2886 = vlog2.f32 %v1417_v35  ;;  %v1423_v27 = vand.u32 2147483647, %v4520_v17  ;;  %v1404_v46 = vmul.f32 %v2867_v2, %v1403_v52 }
 0x154   : > { %v2877_v7 = vpop.eup %2876  ;;  %v1365_v3 = vmul.f32 0.6931472, %v2875_v36  ;;  %vm336_vm12 = vcmp.gt.f32.partialorder %v4459_v62, 20.0  ;;  %vm4540_vm13 = vcmp.lt.f32.partialorder %v1414_v22, 0.0004427343  ;;  %v1413_v23 = vmul.f32 %v2869_v60, %v1412_v51  ;;  %v4596_v22 = vld [vmem:[%s3335_s30 + $0x268] sm:$0xff] }
 0x155   : > { %v670_v44 = vmul.f32 1.442695, %v468_v59  ;;  %v1362_v56 = vsel %vm4503_vm0, %v1359_v61, %v1356_v10  ;;  %v1374_v25 = vmul.f32 0.6931472, %v2877_v7  ;;  %2888 = vpow2.f32 %v4498_v55 }
 0x156   : > { %v2879_v0 = vpop.eup %2878  ;;  %v1994_v47 = vsel %vm330_vm1, %v4407_v20, %v1362_v56  ;;  %v1371_v6 = vsel %vm4509_vm2, %v1368_v29, %v1365_v3  ;;  %v1421_v39 = vadd.f32 1.0, %v1420_v28  ;;  %2890 = vpow2.f32 %v4500_v58 }
 0x157   : > { %v2122_v11 = vmax.f32 %v1994_v47, 0.0001  ;;  %v1995_v59 = vsel %vm331_vm3, %v4415_v15, %v1371_v6  ;;  %v1380_v55 = vsel %vm4515_vm5, %v1377_v12, %v1374_v25  ;;  %v1383_v2 = vmul.f32 0.6931472, %v2879_v0  ;;  %v2881_v1 = vpop.eup %2880  ;;  %v4613_v0 = vld [vmem:[%s3335_s30 + $0x270] sm:$0xff] }
 0x158   : > { %v2123_v37 = vmax.f32 %v1995_v59, 0.0001  ;;  %v1996_v20 = vsel %vm332_vm4, %v4421_v42, %v1380_v55  ;;  %2892 = vpow2.f32 %v670_v44  ;;  %v469_v21 = vmin.f32 %v4548_v19, 20.0 }
 0x159   : > { %v2250_v58 = vmin.f32 %v2122_v11, 10000.0  ;;  %v2124_v30 = vmax.f32 %v1996_v20, 0.0001  ;;  %v1389_v15 = vsel %vm4522_vm7, %v1386_v54, %v1383_v2  ;;  %v1392_v16 = vmul.f32 0.6931472, %v2881_v1  ;;  %v2883_v53 = vpop.eup %2882  ;;  %v4617_v11 = vld [vmem:[%s3335_s30 + $0x278] sm:$0xff] }
 0x15a   : > { %v2251_v60 = vmin.f32 %v2123_v37, 10000.0  ;;  %v1997_v61 = vsel %vm333_vm6, %v4436_v40, %v1389_v15  ;;  %v1422_v42 = vmul.f32 %v4520_v17, %v1421_v39  ;;  %v672_v29 = vmul.f32 1.442695, %v469_v21  ;;  %v4621_v1 = vld [vmem:[%s3335_s30 + $0x280] sm:$0xff]  ;;  %v4626_v21 = vld [vmem:[%s3335_s30 + $0x288] sm:$0xff] }
 0x15b   : > { %v2885_v57 = vpop.eup %2884  ;;  %2378 = vst [vmem:[%s3489_s17 + $0x200] sm:$0xff] %v2250_v58  ;;  %v2252_v8 = vmin.f32 %v2124_v30, 10000.0  ;;  %v2125_v4 = vmax.f32 %v1997_v61, 0.0001  ;;  %v1398_v31 = vsel %vm4528_vm9, %v1395_v32, %v1392_v16  ;;  %v1401_v48 = vmul.f32 0.6931472, %v2883_v53 }
 0x15c   : > { %2379 = vst [vmem:[%s3489_s17 + $0x208] sm:$0xff] %v2251_v60  ;;  %v1998_v12 = vsel %vm334_vm8, %v4439_v63, %v1398_v31  ;;  %v1410_v50 = vmul.f32 0.6931472, %v2885_v57  ;;  %2894 = vpow2.f32 %v672_v29  ;;  %v470_v40 = vmin.f32 %v4568_v13, 20.0  ;;  %v4636_v61 = vld [vmem:[%s3335_s30 + $0x290] sm:$0xff] }
 0x15d   : > { %v2887_v41 = vpop.eup %2886  ;;  %2380 = vst [vmem:[%s3489_s17 + $0x210] sm:$0xff] %v2252_v8  ;;  %v2253_v24 = vmin.f32 %v2125_v4, 10000.0  ;;  %v2126_v17 = vmax.f32 %v1998_v12, 0.0001  ;;  %v1407_v26 = vsel %vm4534_vm11, %v1404_v46, %v1401_v48  ;;  %vm4585_vm14 = vcmp.lt.f32.partialorder %v1423_v27, 0.0004427343 }
 0x15e   : > { %v1999_v63 = vsel %vm335_vm10, %v4450_v9, %v1407_v26  ;;  %v1416_v43 = vsel %vm4540_vm13, %v1413_v23, %v1410_v50  ;;  %vm337_vm15 = vcmp.gt.f32.partialorder %v4468_v14, 20.0  ;;  %v1419_v54 = vmul.f32 0.6931472, %v2887_v41 }
 0x15f   : > { %v2889_v35 = vpop.eup %2888  ;;  %2381 = vst [vmem:[%s3489_s17 + $0x218] sm:$0xff] %v2253_v24  ;;  %v2254_v33 = vmin.f32 %v2126_v17, 10000.0  ;;  %v2127_v32 = vmax.f32 %v1999_v63, 0.0001  ;;  %v2000_v5 = vsel %vm336_vm12, %v4459_v62, %v1416_v43  ;;  %v674_v10 = vmul.f32 1.442695, %v470_v40 }
 0x160   : > { %v2891_v51 = vpop.eup %2890  ;;  %v2128_v28 = vmax.f32 %v2000_v5, 0.0001  ;;  %v1425_v9 = vsel %vm4585_vm14, %v1422_v42, %v1419_v54  ;;  %v1426_v36 = vadd.f32 1.0, %v2889_v35  ;;  %v471_v3 = vmin.f32 %v4596_v22, 20.0 }
 0x161   : > { %2382 = vst [vmem:[%s3489_s17 + $0x220] sm:$0xff] %v2254_v33  ;;  %v2255_v38 = vmin.f32 %v2127_v32, 10000.0  ;;  %v2001_v27 = vsel %vm337_vm15, %v4468_v14, %v1425_v9  ;;  %v1435_v7 = vadd.f32 1.0, %v2891_v51  ;;  %v1429_v44 = vmul.f32 -0.5, %v2889_v35 }
 0x162   : > { %v4607_v46 = vpop.eup %2892  ;;  %v2256_v62 = vmin.f32 %v2128_v28, 10000.0  ;;  %v2129_v49 = vmax.f32 %v2001_v27, 0.0001  ;;  %2896 = vlog2.f32 %v1426_v36  ;;  %v1438_v25 = vmul.f32 -0.5, %v2891_v51 }
 0x163   : > { %2383 = vst [vmem:[%s3489_s17 + $0x228] sm:$0xff] %v2255_v38  ;;  %2898 = vlog2.f32 %v1435_v7  ;;  %v1444_v14 = vadd.f32 1.0, %v4607_v46  ;;  %v1432_v23 = vand.u32 2147483647, %v2889_v35  ;;  %v1430_v6 = vadd.f32 1.0, %v1429_v44 }
 0x164   : > { %2384 = vst [vmem:[%s3489_s17 + $0x230] sm:$0xff] %v2256_v62  ;;  %v2257_v56 = vmin.f32 %v2129_v49, 10000.0  ;;  %2900 = vpow2.f32 %v674_v10  ;;  %v676_v39 = vmul.f32 1.442695, %v471_v3  ;;  %v1441_v59 = vand.u32 2147483647, %v2891_v51 }
 0x165   : > { %2902 = vlog2.f32 %v1444_v14  ;;  %v1447_v55 = vmul.f32 -0.5, %v4607_v46  ;;  %vm338_vm0 = vcmp.gt.f32.partialorder %v4477_v45, 20.0  ;;  %v1439_v37 = vadd.f32 1.0, %v1438_v25  ;;  %v4669_v3 = vld [vmem:[%s3335_s30 + $0x298] sm:$0xff] }
 0x166   : > { %v2895_v47 = vpop.eup %2894  ;;  %2385 = vst [vmem:[%s3489_s17 + $0x238] sm:$0xff] %v2257_v56  ;;  %2904 = vpow2.f32 %v676_v39  ;;  %v472_v20 = vmin.f32 %v4613_v0, 20.0  ;;  %vm4628_vm1 = vcmp.lt.f32.partialorder %v1432_v23, 0.0004427343  ;;  %vm339_vm2 = vcmp.gt.f32.partialorder %v4483_v18, 20.0  ;;  %v4675_v56 = vld [vmem:[%s3335_s30 + $0x2a0] sm:$0xff] }
 0x167   : > { %v1453_v2 = vadd.f32 1.0, %v2895_v47  ;;  %v473_v30 = vmin.f32 %v4617_v11, 20.0  ;;  %v1431_v15 = vmul.f32 %v2889_v35, %v1430_v6  ;;  %v1456_v16 = vmul.f32 -0.5, %v2895_v47 }
 0x168   : > { %v678_v53 = vmul.f32 1.442695, %v472_v20  ;;  %v474_v60 = vmin.f32 %v4621_v1, 20.0  ;;  %vm4638_vm3 = vcmp.lt.f32.partialorder %v1441_v59, 0.0004427343  ;;  %v1448_v29 = vadd.f32 1.0, %v1447_v55 }
 0x169   : > { %2906 = vlog2.f32 %v1453_v2  ;;  %v680_v57 = vmul.f32 1.442695, %v473_v30  ;;  %v475_v8 = vmin.f32 %v4626_v21, 20.0  ;;  %v1440_v31 = vmul.f32 %v2891_v51, %v1439_v37 }
 0x16a   : > { %v1450_v48 = vand.u32 2147483647, %v4607_v46  ;;  %2908 = vpow2.f32 %v678_v53  ;;  %v682_v12 = vmul.f32 1.442695, %v474_v60  ;;  %v1459_v41 = vand.u32 2147483647, %v2895_v47 }
 0x16b   : > { %2910 = vpow2.f32 %v680_v57  ;;  %v684_v24 = vmul.f32 1.442695, %v475_v8  ;;  %v1457_v26 = vadd.f32 1.0, %v1456_v16  ;;  %v476_v52 = vmin.f32 %v4636_v61, 20.0 }
 0x16c   : > { %v2897_v4 = vpop.eup %2896  ;;  %2912 = vpow2.f32 %v682_v12  ;;  %vm340_vm4 = vcmp.gt.f32.partialorder %v4496_v34, 20.0  ;;  %v1449_v54 = vmul.f32 %v4607_v46, %v1448_v29  ;;  %vm4656_vm5 = vcmp.lt.f32.partialorder %v1450_v48, 0.0004427343 }
 0x16d   : > { %v2899_v50 = vpop.eup %2898  ;;  %v1428_v40 = vmul.f32 0.6931472, %v2897_v4  ;;  %2914 = vpow2.f32 %v684_v24  ;;  %vm4664_vm6 = vcmp.lt.f32.partialorder %v1459_v41, 0.0004427343  ;;  %v1458_v27 = vmul.f32 %v2895_v47, %v1457_v26  ;;  %v4708_v24 = vld [vmem:[%s3335_s30 + $0x2a8] sm:$0xff] }
 0x16e   : > { %v1437_v17 = vmul.f32 0.6931472, %v2899_v50  ;;  %v4645_v63 = vpop.eup %2900  ;;  %v686_v7 = vmul.f32 1.442695, %v476_v52  ;;  %vm341_vm7 = vcmp.gt.f32.partialorder %v4548_v19, 20.0  ;;  %v477_v39 = vmin.f32 %v4669_v3, 20.0 }
 0x16f   : > { %v1434_v43 = vsel %vm4628_vm1, %v1431_v15, %v1428_v40  ;;  %v2903_v35 = vpop.eup %2902  ;;  %v1462_v51 = vadd.f32 1.0, %v4645_v63  ;;  %vm342_vm8 = vcmp.gt.f32.partialorder %v4568_v13, 20.0  ;;  %v1468_v30 = vand.u32 2147483647, %v4645_v63 }
 0x170   : > { %v2002_v33 = vsel %vm338_vm0, %v4477_v45, %v1434_v43  ;;  %v1443_v32 = vsel %vm4638_vm3, %v1440_v31, %v1437_v17  ;;  %v1446_v36 = vmul.f32 0.6931472, %v2903_v35  ;;  %v2905_v45 = vpop.eup %2904  ;;  %vm343_vm9 = vcmp.gt.f32.partialorder %v4596_v22, 20.0 }
 0x171   : > { %v2130_v28 = vmax.f32 %v2002_v33, 0.0001  ;;  %v2003_v9 = vsel %vm339_vm2, %v4483_v18, %v1443_v32  ;;  %2916 = vlog2.f32 %v1462_v51  ;;  %v1465_v18 = vmul.f32 -0.5, %v4645_v63 }
 0x172   : > { %v2131_v38 = vmax.f32 %v2003_v9, 0.0001  ;;  %v1452_v49 = vsel %vm4656_vm5, %v1449_v54, %v1446_v36  ;;  %v1471_v44 = vadd.f32 1.0, %v2905_v45  ;;  %v1474_v6 = vmul.f32 -0.5, %v2905_v45 }
 0x173   : > { %v2907_v46 = vpop.eup %2906  ;;  %v2258_v62 = vmin.f32 %v2130_v28, 10000.0  ;;  %v2004_v14 = vsel %vm340_vm4, %v4496_v34, %v1452_v49  ;;  %v478_v34 = vmin.f32 %v4675_v56, 20.0  ;;  %v1466_v58 = vadd.f32 1.0, %v1465_v18 }
 0x174   : > { %v2259_v25 = vmin.f32 %v2131_v38, 10000.0  ;;  %v1455_v23 = vmul.f32 0.6931472, %v2907_v46  ;;  %v2132_v47 = vmax.f32 %v2004_v14, 0.0001  ;;  %2918 = vlog2.f32 %v1471_v44  ;;  %v2909_v59 = vpop.eup %2908 }
 0x175   : > { %2386 = vst [vmem:[%s3489_s17 + $0x240] sm:$0xff] %v2258_v62  ;;  %2920 = vpow2.f32 %v686_v7  ;;  %v4688_v2 = vpop.eup %2910  ;;  %v1477_v53 = vand.u32 2147483647, %v2905_v45  ;;  %v1480_v60 = vadd.f32 1.0, %v2909_v59  ;;  %v1483_v42 = vmul.f32 -0.5, %v2909_v59 }
 0x176   : > { %2387 = vst [vmem:[%s3489_s17 + $0x248] sm:$0xff] %v2259_v25  ;;  %v1461_v55 = vsel %vm4664_vm6, %v1458_v27, %v1455_v23  ;;  %v2260_v37 = vmin.f32 %v2132_v47, 10000.0  ;;  %v4692_v15 = vpop.eup %2912  ;;  %v1475_v57 = vadd.f32 1.0, %v1474_v6  ;;  %v1486_v8 = vand.u32 2147483647, %v2909_v59  ;;  %v4744_v23 = vld [vmem:[%s3335_s30 + $0x2b0] sm:$0xff] }
 0x177   : > { %v2005_v20 = vsel %vm341_vm7, %v4548_v19, %v1461_v55  ;;  %v4695_v29 = vpop.eup %2914  ;;  %v1489_v19 = vadd.f32 1.0, %v4688_v2  ;;  %v688_v4 = vmul.f32 1.442695, %v477_v39  ;;  %2922 = vlog2.f32 %v1480_v60 }
 0x178   : > { %v2133_v16 = vmax.f32 %v2005_v20, 0.0001  ;;  %2388 = vst [vmem:[%s3489_s17 + $0x250] sm:$0xff] %v2260_v37  ;;  %v1492_v48 = vmul.f32 -0.5, %v4688_v2  ;;  %v1495_v12 = vand.u32 2147483647, %v4688_v2  ;;  %v1467_v50 = vmul.f32 %v4645_v63, %v1466_v58 }
 0x179   : > { %vm4702_vm10 = vcmp.lt.f32.partialorder %v1468_v30, 0.0004427343  ;;  %2924 = vlog2.f32 %v1489_v19  ;;  %v1498_v41 = vadd.f32 1.0, %v4692_v15  ;;  %vm4711_vm11 = vcmp.lt.f32.partialorder %v1477_v53, 0.0004427343 }
 0x17a   : > { %v2261_v31 = vmin.f32 %v2133_v16, 10000.0  ;;  %v1484_v52 = vadd.f32 1.0, %v1483_v42  ;;  %v1507_v43 = vadd.f32 1.0, %v4695_v29  ;;  %v690_v54 = vmul.f32 1.442695, %v478_v34 }
 0x17b   : > { %v2917_v17 = vpop.eup %2916  ;;  %v1476_v35 = vmul.f32 %v2905_v45, %v1475_v57  ;;  %vm344_vm12 = vcmp.gt.f32.partialorder %v4613_v0, 20.0  ;;  %2926 = vlog2.f32 %v1498_v41  ;;  %v1501_v33 = vmul.f32 -0.5, %v4692_v15 }
 0x17c   : > { %2389 = vst [vmem:[%s3489_s17 + $0x258] sm:$0xff] %v2261_v31  ;;  %v1464_v63 = vmul.f32 0.6931472, %v2917_v17  ;;  %vm4718_vm13 = vcmp.lt.f32.partialorder %v1486_v8, 0.0004427343  ;;  %vm345_vm14 = vcmp.gt.f32.partialorder %v4617_v11, 20.0  ;;  %2928 = vlog2.f32 %v1507_v43 }
 0x17d   : > { %v1493_v5 = vadd.f32 1.0, %v1492_v48  ;;  %vm4723_vm15 = vcmp.lt.f32.partialorder %v1495_v12, 0.0004427343  ;;  %v1510_v36 = vmul.f32 -0.5, %v4695_v29  ;;  %2930 = vpow2.f32 %v688_v4  ;;  %v4767_v31 = vld [vmem:[%s3335_s30 + $0x2b8] sm:$0xff] }
 0x17e   : > { %v2919_v28 = vpop.eup %2918  ;;  %v1470_v9 = vsel %vm4702_vm10, %v1467_v50, %v1464_v63  ;;  %v479_v10 = vmin.f32 %v4708_v24, 20.0  ;;  %v1485_v7 = vmul.f32 %v2909_v59, %v1484_v52  ;;  %vm346_vm0 = vcmp.gt.f32.partialorder %v4621_v1, 20.0  ;;  %v4786_v63 = vld [vmem:[%s3335_s30 + $0x2c0] sm:$0xff] }
 0x17f   : > { %v4731_v45 = vpop.eup %2920  ;;  %v2006_v38 = vsel %vm342_vm8, %v4568_v13, %v1470_v9  ;;  %v1473_v27 = vmul.f32 0.6931472, %v2919_v28  ;;  %v1504_v46 = vand.u32 2147483647, %v4692_v15  ;;  %v1502_v49 = vadd.f32 1.0, %v1501_v33 }
 0x180   : > { %v2134_v62 = vmax.f32 %v2006_v38, 0.0001  ;;  %v1516_v18 = vadd.f32 1.0, %v4731_v45  ;;  %v1519_v44 = vmul.f32 -0.5, %v4731_v45  ;;  %v1513_v14 = vand.u32 2147483647, %v4695_v29 }
 0x181   : > { %v1479_v25 = vsel %vm4711_vm11, %v1476_v35, %v1473_v27  ;;  %2932 = vpow2.f32 %v690_v54  ;;  %v692_v13 = vmul.f32 1.442695, %v479_v10  ;;  %v1511_v39 = vadd.f32 1.0, %v1510_v36  ;;  %v2923_v59 = vpop.eup %2922 }
 0x182   : > { %v2262_v47 = vmin.f32 %v2134_v62, 10000.0  ;;  %v2007_v6 = vsel %vm343_vm9, %v4596_v22, %v1479_v25  ;;  %2934 = vlog2.f32 %v1516_v18  ;;  %v1494_v34 = vmul.f32 %v4688_v2, %v1493_v5 }
 0x183   : > { %v2135_v55 = vmax.f32 %v2007_v6, 0.0001  ;;  %v1520_v37 = vadd.f32 1.0, %v1519_v44  ;;  %2936 = vpow2.f32 %v692_v13  ;;  %v2925_v20 = vpop.eup %2924  ;;  %v1482_v58 = vmul.f32 0.6931472, %v2923_v59 }
 0x184   : > { %2390 = vst [vmem:[%s3489_s17 + $0x260] sm:$0xff] %v2262_v47  ;;  %vm4751_vm1 = vcmp.lt.f32.partialorder %v1504_v46, 0.0004427343  ;;  %vm347_vm2 = vcmp.gt.f32.partialorder %v4626_v21, 20.0  ;;  %v480_v22 = vmin.f32 %v4744_v23, 20.0  ;;  %v1503_v60 = vmul.f32 %v4692_v15, %v1502_v49 }
 0x185   : > { %v2263_v16 = vmin.f32 %v2135_v55, 10000.0  ;;  %v1491_v53 = vmul.f32 0.6931472, %v2925_v20  ;;  %vm4758_vm3 = vcmp.lt.f32.partialorder %v1513_v14, 0.0004427343  ;;  %v2927_v42 = vpop.eup %2926  ;;  %v1488_v57 = vsel %vm4718_vm13, %v1485_v7, %v1482_v58  ;;  %v4812_v14 = vld [vmem:[%s3335_s30 + $0x2c8] sm:$0xff] }
 0x186   : > { %v1512_v8 = vmul.f32 %v4695_v29, %v1511_v39  ;;  %v1522_v19 = vand.u32 2147483647, %v4731_v45  ;;  %v694_v4 = vmul.f32 1.442695, %v480_v22  ;;  %v2929_v48 = vpop.eup %2928  ;;  %v2008_v15 = vsel %vm344_vm12, %v4613_v0, %v1488_v57  ;;  %v4819_v55 = vld [vmem:[%s3335_s30 + $0x2d0] sm:$0xff]  ;;  %v4826_v20 = vld [vmem:[%s3335_s30 + $0x2d8] sm:$0xff] }
 0x187   : > { %2391 = vst [vmem:[%s3489_s17 + $0x268] sm:$0xff] %v2263_v16  ;;  %v1497_v12 = vsel %vm4723_vm15, %v1494_v34, %v1491_v53  ;;  %v1500_v50 = vmul.f32 0.6931472, %v2927_v42  ;;  %v1521_v40 = vmul.f32 %v4731_v45, %v1520_v37  ;;  %v4776_v41 = vpop.eup %2930  ;;  %v2136_v29 = vmax.f32 %v2008_v15, 0.0001  ;;  %v4833_v57 = vld [vmem:[%s3335_s30 + $0x2e0] sm:$0xff] }
 0x188   : > { %v2009_v17 = vsel %vm345_vm14, %v4617_v11, %v1497_v12  ;;  %v1509_v26 = vmul.f32 0.6931472, %v2929_v48  ;;  %2938 = vpow2.f32 %v694_v4  ;;  %v1525_v43 = vadd.f32 1.0, %v4776_v41 }
 0x189   : > { %v2137_v52 = vmax.f32 %v2009_v17, 0.0001  ;;  %v1506_v0 = vsel %vm4751_vm1, %v1503_v60, %v1500_v50  ;;  %v481_v54 = vmin.f32 %v4767_v31, 20.0  ;;  %v2264_v35 = vmin.f32 %v2136_v29, 10000.0  ;;  %v4849_v17 = vld [vmem:[%s3335_s30 + $0x2e8] sm:$0xff] }
 0x18a   : > { %v2010_v33 = vsel %vm346_vm0, %v4621_v1, %v1506_v0  ;;  %v1515_v11 = vsel %vm4758_vm3, %v1512_v8, %v1509_v26  ;;  %v1528_v32 = vmul.f32 -0.5, %v4776_v41  ;;  %2940 = vlog2.f32 %v1525_v43 }
 0x18b   : > { %v2933_v5 = vpop.eup %2932  ;;  %v2265_v51 = vmin.f32 %v2137_v52, 10000.0  ;;  %v2138_v28 = vmax.f32 %v2010_v33, 0.0001  ;;  %v2011_v9 = vsel %vm347_vm2, %v4626_v21, %v1515_v11  ;;  %2392 = vst [vmem:[%s3489_s17 + $0x270] sm:$0xff] %v2264_v35  ;;  %vm4798_vm4 = vcmp.lt.f32.partialorder %v1522_v19, 0.0004427343 }
 0x18c   : > { %v2935_v36 = vpop.eup %2934  ;;  %v2139_v10 = vmax.f32 %v2011_v9, 0.0001  ;;  %v1534_v1 = vadd.f32 1.0, %v2933_v5  ;;  %v482_v38 = vmin.f32 %v4786_v63, 20.0  ;;  %vm348_vm5 = vcmp.gt.f32.partialorder %v4636_v61, 20.0 }
 0x18d   : > { %v4803_v27 = vpop.eup %2936  ;;  %2393 = vst [vmem:[%s3489_s17 + $0x278] sm:$0xff] %v2265_v51  ;;  %v2266_v7 = vmin.f32 %v2138_v28, 10000.0  ;;  %v1518_v21 = vmul.f32 0.6931472, %v2935_v36  ;;  %v696_v46 = vmul.f32 1.442695, %v481_v54 }
 0x18e   : > { %v2267_v62 = vmin.f32 %v2139_v10, 10000.0  ;;  %2942 = vlog2.f32 %v1534_v1  ;;  %v1543_v49 = vadd.f32 1.0, %v4803_v27  ;;  %v1529_v44 = vadd.f32 1.0, %v1528_v32 }
 0x18f   : > { %2394 = vst [vmem:[%s3489_s17 + $0x280] sm:$0xff] %v2266_v7  ;;  %v1524_v18 = vsel %vm4798_vm4, %v1521_v40, %v1518_v21  ;;  %v1537_v25 = vmul.f32 -0.5, %v2933_v5  ;;  %v1546_v47 = vmul.f32 -0.5, %v4803_v27  ;;  %v698_v6 = vmul.f32 1.442695, %v482_v38 }
 0x190   : > { %2395 = vst [vmem:[%s3489_s17 + $0x288] sm:$0xff] %v2267_v62  ;;  %v2012_v13 = vsel %vm348_vm5, %v4636_v61, %v1524_v18  ;;  %2944 = vlog2.f32 %v1543_v49  ;;  %v1531_v59 = vand.u32 2147483647, %v4776_v41  ;;  %vm349_vm6 = vcmp.gt.f32.partialorder %v4669_v3, 20.0 }
 0x191   : > { %v2140_v39 = vmax.f32 %v2012_v13, 0.0001  ;;  %2946 = vpow2.f32 %v696_v46  ;;  %v1540_v37 = vand.u32 2147483647, %v2933_v5  ;;  %v483_v61 = vmin.f32 %v4812_v14, 20.0 }
 0x192   : > { %v4821_v34 = vpop.eup %2938  ;;  %2948 = vpow2.f32 %v698_v6  ;;  %v1530_v30 = vmul.f32 %v4776_v41, %v1529_v44  ;;  %v1538_v22 = vadd.f32 1.0, %v1537_v25  ;;  %v1547_v53 = vadd.f32 1.0, %v1546_v47 }
 0x193   : > { %v2268_v58 = vmin.f32 %v2140_v39, 10000.0  ;;  %v1552_v16 = vadd.f32 1.0, %v4821_v34  ;;  %v1555_v60 = vmul.f32 -0.5, %v4821_v34  ;;  %v700_v2 = vmul.f32 1.442695, %v483_v61  ;;  %v4884_v61 = vld [vmem:[%s3335_s30 + $0x2f0] sm:$0xff] }
 0x194   : > { %v484_v42 = vmin.f32 %v4819_v55, 20.0  ;;  %v2941_v8 = vpop.eup %2940  ;;  %vm4836_vm7 = vcmp.lt.f32.partialorder %v1531_v59, 0.0004427343  ;;  %vm350_vm8 = vcmp.gt.f32.partialorder %v4675_v56, 20.0  ;;  %v485_v4 = vmin.f32 %v4826_v20, 20.0 }
 0x195   : > { %2396 = vst [vmem:[%s3489_s17 + $0x290] sm:$0xff] %v2268_v58  ;;  %2950 = vlog2.f32 %v1552_v16  ;;  %v1527_v48 = vmul.f32 0.6931472, %v2941_v8  ;;  %v1549_v15 = vand.u32 2147483647, %v4803_v27  ;;  %v1539_v50 = vmul.f32 %v2933_v5, %v1538_v22  ;;  %v4892_v16 = vld [vmem:[%s3335_s30 + $0x2f8] sm:$0xff] }
 0x196   : > { %2952 = vpow2.f32 %v700_v2  ;;  %v702_v12 = vmul.f32 1.442695, %v484_v42  ;;  %vm4843_vm9 = vcmp.lt.f32.partialorder %v1540_v37, 0.0004427343  ;;  %v704_v41 = vmul.f32 1.442695, %v485_v4 }
 0x197   : > { %v486_v29 = vmin.f32 %v4833_v57, 20.0  ;;  %v1533_v52 = vsel %vm4836_vm7, %v1530_v30, %v1527_v48  ;;  %v1548_v0 = vmul.f32 %v4803_v27, %v1547_v53  ;;  %v1556_v43 = vadd.f32 1.0, %v1555_v60  ;;  %v4925_v5 = vld [vmem:[%s3335_s30 + $0x300] sm:$0xff] }
 0x198   : > { %v2943_v26 = vpop.eup %2942  ;;  %2954 = vpow2.f32 %v702_v12  ;;  %v2013_v54 = vsel %vm349_vm6, %v4669_v3, %v1533_v52  ;;  %vm351_vm10 = vcmp.gt.f32.partialorder %v4708_v24, 20.0  ;;  %vm4858_vm11 = vcmp.lt.f32.partialorder %v1549_v15, 0.0004427343 }
 0x199   : > { %v1536_v35 = vmul.f32 0.6931472, %v2943_v26  ;;  %2956 = vpow2.f32 %v704_v41  ;;  %v706_v33 = vmul.f32 1.442695, %v486_v29  ;;  %v2141_v32 = vmax.f32 %v2013_v54, 0.0001 }
 0x19a   : > { %v2945_v11 = vpop.eup %2944  ;;  %v487_v51 = vmin.f32 %v4849_v17, 20.0  ;;  %v1558_v3 = vand.u32 2147483647, %v4821_v34  ;;  %v1557_v21 = vmul.f32 %v4821_v34, %v1556_v43  ;;  %vm352_vm13 = vcmp.gt.f32.partialorder %v4744_v23, 20.0 }
 0x19b   : > { %v2947_v28 = vpop.eup %2946  ;;  %v1542_v9 = vsel %vm4843_vm9, %v1539_v50, %v1536_v35  ;;  %v1545_v36 = vmul.f32 0.6931472, %v2945_v11  ;;  %2958 = vpow2.f32 %v706_v33  ;;  %v2269_v45 = vmin.f32 %v2141_v32, 10000.0 }
 0x19c   : > { %v2949_v10 = vpop.eup %2948  ;;  %v2014_v1 = vsel %vm350_vm8, %v4675_v56, %v1542_v9  ;;  %v1561_v38 = vadd.f32 1.0, %v2947_v28  ;;  %v1564_v49 = vmul.f32 -0.5, %v2947_v28  ;;  %v708_v18 = vmul.f32 1.442695, %v487_v51 }
 0x19d   : > { %v2142_v27 = vmax.f32 %v2014_v1, 0.0001  ;;  %v1551_v7 = vsel %vm4858_vm11, %v1548_v0, %v1545_v36  ;;  %v1570_v46 = vadd.f32 1.0, %v2949_v10  ;;  %2397 = vst [vmem:[%s3489_s17 + $0x298] sm:$0xff] %v2269_v45  ;;  %vm4876_vm12 = vcmp.lt.f32.partialorder %v1558_v3, 0.0004427343 }
 0x19e   : > { %v2015_v62 = vsel %vm351_vm10, %v4708_v24, %v1551_v7  ;;  %2960 = vlog2.f32 %v1561_v38  ;;  %v1573_v39 = vmul.f32 -0.5, %v2949_v10  ;;  %vm353_vm14 = vcmp.gt.f32.partialorder %v4767_v31, 20.0 }
 0x19f   : > { %v2951_v44 = vpop.eup %2950  ;;  %v2270_v56 = vmin.f32 %v2142_v27, 10000.0  ;;  %v2143_v25 = vmax.f32 %v2015_v62, 0.0001  ;;  %2962 = vlog2.f32 %v1570_v46  ;;  %v1567_v59 = vand.u32 2147483647, %v2947_v28 }
 0x1a0   : > { %v2953_v47 = vpop.eup %2952  ;;  %v1554_v6 = vmul.f32 0.6931472, %v2951_v44  ;;  %v1565_v22 = vadd.f32 1.0, %v1564_v49  ;;  %vm354_vm15 = vcmp.gt.f32.partialorder %v4786_v63, 20.0  ;;  %2964 = vpow2.f32 %v708_v18 }
 0x1a1   : > { %2398 = vst [vmem:[%s3489_s17 + $0x2a0] sm:$0xff] %v2270_v56  ;;  %v2271_v24 = vmin.f32 %v2143_v25, 10000.0  ;;  %v1579_v34 = vadd.f32 1.0, %v2953_v47  ;;  %v1582_v37 = vmul.f32 -0.5, %v2953_v47  ;;  %v1576_v2 = vand.u32 2147483647, %v2949_v10 }
 0x1a2   : > { %v4886_v58 = vpop.eup %2954  ;;  %v1560_v30 = vsel %vm4876_vm12, %v1557_v21, %v1554_v6  ;;  %v1585_v42 = vand.u32 2147483647, %v2953_v47  ;;  %v1574_v19 = vadd.f32 1.0, %v1573_v39  ;;  %v488_v48 = vmin.f32 %v4884_v61, 20.0 }
 0x1a3   : > { %v4894_v53 = vpop.eup %2956  ;;  %2399 = vst [vmem:[%s3489_s17 + $0x2a8] sm:$0xff] %v2271_v24  ;;  %v2016_v60 = vsel %vm352_vm13, %v4744_v23, %v1560_v30  ;;  %2966 = vlog2.f32 %v1579_v34  ;;  %v1588_v4 = vadd.f32 1.0, %v4886_v58  ;;  %vm4904_vm0 = vcmp.lt.f32.partialorder %v1567_v59, 0.0004427343  ;;  %v4952_v24 = vld [vmem:[%s3335_s30 + $0x308] sm:$0xff] }
 0x1a4   : > { %v2144_v8 = vmax.f32 %v2016_v60, 0.0001  ;;  %v1583_v50 = vadd.f32 1.0, %v1582_v37  ;;  %v1597_v40 = vadd.f32 1.0, %v4894_v53  ;;  %v489_v23 = vmin.f32 %v4892_v16, 20.0 }
 0x1a5   : > { %v4902_v15 = vpop.eup %2958  ;;  %v1566_v29 = vmul.f32 %v2947_v28, %v1565_v22  ;;  %vm355_vm1 = vcmp.gt.f32.partialorder %v4812_v14, 20.0  ;;  %2968 = vlog2.f32 %v1588_v4  ;;  %v1591_v26 = vmul.f32 -0.5, %v4886_v58 }
 0x1a6   : > { %v2272_v41 = vmin.f32 %v2144_v8, 10000.0  ;;  %vm4912_vm2 = vcmp.lt.f32.partialorder %v1576_v2, 0.0004427343  ;;  %vm4916_vm3 = vcmp.lt.f32.partialorder %v1585_v42, 0.0004427343  ;;  %2970 = vlog2.f32 %v1597_v40 }
 0x1a7   : > { %v1606_v43 = vadd.f32 1.0, %v4902_v15  ;;  %v1575_v35 = vmul.f32 %v2949_v10, %v1574_v19  ;;  %v1594_v33 = vand.u32 2147483647, %v4886_v58  ;;  %v1600_v11 = vmul.f32 -0.5, %v4894_v53 }
 0x1a8   : > { %v2961_v54 = vpop.eup %2960  ;;  %2400 = vst [vmem:[%s3489_s17 + $0x2b0] sm:$0xff] %v2272_v41  ;;  %v710_v32 = vmul.f32 1.442695, %v488_v48  ;;  %v1584_v9 = vmul.f32 %v2953_v47, %v1583_v50  ;;  %vm356_vm4 = vcmp.gt.f32.partialorder %v4819_v55, 20.0  ;;  %v712_v36 = vmul.f32 1.442695, %v489_v23 }
 0x1a9   : > { %v2963_v51 = vpop.eup %2962  ;;  %v1563_v28 = vmul.f32 0.6931472, %v2961_v54  ;;  %2972 = vlog2.f32 %v1606_v43  ;;  %v1592_v45 = vadd.f32 1.0, %v1591_v26  ;;  %vm357_vm5 = vcmp.gt.f32.partialorder %v4826_v20, 20.0  ;;  %v4978_v41 = vld [vmem:[%s3335_s30 + $0x310] sm:$0xff] }
 0x1aa   : > { %v1572_v3 = vmul.f32 0.6931472, %v2963_v51  ;;  %v1609_v10 = vmul.f32 -0.5, %v4902_v15  ;;  %2974 = vpow2.f32 %v710_v32  ;;  %v1603_v38 = vand.u32 2147483647, %v4894_v53  ;;  %v4934_v7 = vpop.eup %2964 }
 0x1ab   : > { %v1569_v1 = vsel %vm4904_vm0, %v1566_v29, %v1563_v28  ;;  %2976 = vpow2.f32 %v712_v36  ;;  %v490_v27 = vmin.f32 %v4925_v5, 20.0  ;;  %vm4941_vm6 = vcmp.lt.f32.partialorder %v1594_v33, 0.0004427343 }
 0x1ac   : > { %v2017_v21 = vsel %vm353_vm14, %v4767_v31, %v1569_v1  ;;  %v1578_v46 = vsel %vm4912_vm2, %v1575_v35, %v1572_v3  ;;  %v1601_v49 = vadd.f32 1.0, %v1600_v11  ;;  %v1612_v25 = vand.u32 2147483647, %v4902_v15  ;;  %v4997_v3 = vld [vmem:[%s3335_s30 + $0x318] sm:$0xff] }
 0x1ad   : > { %v2967_v18 = vpop.eup %2966  ;;  %v2145_v44 = vmax.f32 %v2017_v21, 0.0001  ;;  %v2018_v56 = vsel %vm354_vm15, %v4786_v63, %v1578_v46  ;;  %v1615_v13 = vadd.f32 1.0, %v4934_v7  ;;  %v1593_v6 = vmul.f32 %v4886_v58, %v1592_v45 }
 0x1ae   : > { %v2146_v31 = vmax.f32 %v2018_v56, 0.0001  ;;  %v1581_v47 = vmul.f32 0.6931472, %v2967_v18  ;;  %v1610_v39 = vadd.f32 1.0, %v1609_v10  ;;  %v1618_v34 = vmul.f32 -0.5, %v4934_v7 }
 0x1af   : > { %v2273_v59 = vmin.f32 %v2145_v44, 10000.0  ;;  %2978 = vlog2.f32 %v1615_v13  ;;  %v714_v37 = vmul.f32 1.442695, %v490_v27  ;;  %v2969_v30 = vpop.eup %2968  ;;  %v1602_v60 = vmul.f32 %v4894_v53, %v1601_v49 }
 0x1b0   : > { %v2274_v63 = vmin.f32 %v2146_v31, 10000.0  ;;  %v1587_v22 = vsel %vm4916_vm3, %v1584_v9, %v1581_v47  ;;  %vm4958_vm7 = vcmp.lt.f32.partialorder %v1603_v38, 0.0004427343  ;;  %v2971_v58 = vpop.eup %2970  ;;  %v1590_v8 = vmul.f32 0.6931472, %v2969_v30  ;;  %v5000_v38 = vld [vmem:[%s3335_s30 + $0x320] sm:$0xff] }
 0x1b1   : > { %2401 = vst [vmem:[%s3489_s17 + $0x2b8] sm:$0xff] %v2273_v59  ;;  %v2019_v42 = vsel %vm355_vm1, %v4812_v14, %v1587_v22  ;;  %2980 = vpow2.f32 %v714_v37  ;;  %v491_v19 = vmin.f32 %v4952_v24, 20.0  ;;  %v1599_v48 = vmul.f32 0.6931472, %v2971_v58  ;;  %v5025_v37 = vld [vmem:[%s3335_s30 + $0x330] sm:$0xff]  ;;  %v5030_v22 = vld [vmem:[%s3335_s30 + $0x338] sm:$0xff] }
 0x1b2   : > { %2402 = vst [vmem:[%s3489_s17 + $0x2c0] sm:$0xff] %v2274_v63  ;;  %v2147_v4 = vmax.f32 %v2019_v42, 0.0001  ;;  %vm358_vm8 = vcmp.gt.f32.partialorder %v4833_v57, 20.0  ;;  %v1611_v53 = vmul.f32 %v4902_v15, %v1610_v39  ;;  %v1596_v50 = vsel %vm4941_vm6, %v1593_v6, %v1590_v8  ;;  %v5019_v6 = vld [vmem:[%s3335_s30 + $0x328] sm:$0xff]  ;;  %v5038_v58 = vld [vmem:[%s3335_s30 + $0x340] sm:$0xff] }
 0x1b3   : > { %v2973_v12 = vpop.eup %2972  ;;  %vm4972_vm9 = vcmp.lt.f32.partialorder %v1612_v25, 0.0004427343  ;;  %v1619_v14 = vadd.f32 1.0, %v1618_v34  ;;  %v1621_v23 = vand.u32 2147483647, %v4934_v7  ;;  %v2020_v15 = vsel %vm356_vm4, %v4819_v55, %v1596_v50 }
 0x1b4   : > { %v2975_v29 = vpop.eup %2974  ;;  %v2275_v26 = vmin.f32 %v2147_v4, 10000.0  ;;  %v1605_v52 = vsel %vm4958_vm7, %v1602_v60, %v1599_v48  ;;  %v1608_v0 = vmul.f32 0.6931472, %v2973_v12  ;;  %v2148_v54 = vmax.f32 %v2020_v15, 0.0001 }
 0x1b5   : > { %v2977_v43 = vpop.eup %2976  ;;  %v2021_v35 = vsel %vm357_vm5, %v4826_v20, %v1605_v52  ;;  %v1624_v33 = vadd.f32 1.0, %v2975_v29  ;;  %v716_v11 = vmul.f32 1.442695, %v491_v19  ;;  %v492_v28 = vmin.f32 %v4978_v41, 20.0 }
 0x1b6   : > { %2403 = vst [vmem:[%s3489_s17 + $0x2c8] sm:$0xff] %v2275_v26  ;;  %v2149_v32 = vmax.f32 %v2021_v35, 0.0001  ;;  %v1614_v55 = vsel %vm4972_vm9, %v1611_v53, %v1608_v0  ;;  %v1633_v51 = vadd.f32 1.0, %v2977_v43  ;;  %v2276_v9 = vmin.f32 %v2148_v54, 10000.0 }
 0x1b7   : > { %v2022_v36 = vsel %vm358_vm8, %v4833_v57, %v1614_v55  ;;  %v1620_v20 = vmul.f32 %v4934_v7, %v1619_v14  ;;  %2982 = vlog2.f32 %v1624_v33  ;;  %v1627_v1 = vmul.f32 -0.5, %v2975_v29 }
 0x1b8   : > { %v2277_v45 = vmin.f32 %v2149_v32, 10000.0  ;;  %v2150_v10 = vmax.f32 %v2022_v36, 0.0001  ;;  %2984 = vlog2.f32 %v1633_v51  ;;  %2404 = vst [vmem:[%s3489_s17 + $0x2d0] sm:$0xff] %v2276_v9  ;;  %vm359_vm10 = vcmp.gt.f32.partialorder %v4849_v17, 20.0 }
 0x1b9   : > { %v2979_v27 = vpop.eup %2978  ;;  %vm5004_vm11 = vcmp.lt.f32.partialorder %v1621_v23, 0.0004427343  ;;  %v1636_v57 = vmul.f32 -0.5, %v2977_v43  ;;  %2986 = vpow2.f32 %v716_v11  ;;  %v718_v62 = vmul.f32 1.442695, %v492_v28 }
 0x1ba   : > { %2405 = vst [vmem:[%s3489_s17 + $0x2d8] sm:$0xff] %v2277_v45  ;;  %v2278_v7 = vmin.f32 %v2150_v10, 10000.0  ;;  %v1617_v46 = vmul.f32 0.6931472, %v2979_v27  ;;  %v493_v49 = vmin.f32 %v4997_v3, 20.0  ;;  %vm360_vm12 = vcmp.gt.f32.partialorder %v4884_v61, 20.0 }
 0x1bb   : > { %v5010_v18 = vpop.eup %2980  ;;  %v1630_v44 = vand.u32 2147483647, %v2975_v29  ;;  %v494_v56 = vmin.f32 %v5000_v38, 20.0  ;;  %v1628_v13 = vadd.f32 1.0, %v1627_v1  ;;  %v1639_v31 = vand.u32 2147483647, %v2977_v43 }
 0x1bc   : > { %2406 = vst [vmem:[%s3489_s17 + $0x2e0] sm:$0xff] %v2278_v7  ;;  %v1623_v25 = vsel %vm5004_vm11, %v1620_v20, %v1617_v46  ;;  %v1642_v47 = vadd.f32 1.0, %v5010_v18  ;;  %v1637_v59 = vadd.f32 1.0, %v1636_v57  ;;  %2988 = vpow2.f32 %v718_v62  ;;  %v5066_v7 = vld [vmem:[%s3335_s30 + $0x348] sm:$0xff] }
 0x1bd   : > { %v2023_v39 = vsel %vm359_vm10, %v4849_v17, %v1623_v25  ;;  %v720_v34 = vmul.f32 1.442695, %v493_v49  ;;  %vm361_vm13 = vcmp.gt.f32.partialorder %v4892_v16, 20.0  ;;  %v1645_v63 = vmul.f32 -0.5, %v5010_v18 }
 0x1be   : > { %v2151_v30 = vmax.f32 %v2023_v39, 0.0001  ;;  %2990 = vlog2.f32 %v1642_v47  ;;  %vm5032_vm14 = vcmp.lt.f32.partialorder %v1630_v44, 0.0004427343  ;;  %v722_v17 = vmul.f32 1.442695, %v494_v56 }
 0x1bf   : > { %2992 = vpow2.f32 %v720_v34  ;;  %v495_v2 = vmin.f32 %v5019_v6, 20.0  ;;  %v1629_v8 = vmul.f32 %v2975_v29, %v1628_v13  ;;  %vm5040_vm15 = vcmp.lt.f32.partialorder %v1639_v31, 0.0004427343 }
 0x1c0   : > { %v2279_v42 = vmin.f32 %v2151_v30, 10000.0  ;;  %v496_v4 = vmin.f32 %v5025_v37, 20.0  ;;  %v1638_v53 = vmul.f32 %v2977_v43, %v1637_v59  ;;  %2994 = vpow2.f32 %v722_v17 }
 0x1c1   : > { %v2983_v48 = vpop.eup %2982  ;;  %v724_v12 = vmul.f32 1.442695, %v495_v2  ;;  %v497_v50 = vmin.f32 %v5030_v22, 20.0  ;;  %v1646_v23 = vadd.f32 1.0, %v1645_v63  ;;  %v498_v15 = vmin.f32 %v5038_v58, 20.0 }
 0x1c2   : > { %v2985_v40 = vpop.eup %2984  ;;  %2407 = vst [vmem:[%s3489_s17 + $0x2e8] sm:$0xff] %v2279_v42  ;;  %v1626_v14 = vmul.f32 0.6931472, %v2983_v48  ;;  %v726_v26 = vmul.f32 1.442695, %v496_v4  ;;  %vm362_vm0 = vcmp.gt.f32.partialorder %v4925_v5, 20.0 }
 0x1c3   : > { %v2987_v29 = vpop.eup %2986  ;;  %v1635_v52 = vmul.f32 0.6931472, %v2985_v40  ;;  %2996 = vpow2.f32 %v724_v12  ;;  %v728_v0 = vmul.f32 1.442695, %v497_v50  ;;  %v1648_v54 = vand.u32 2147483647, %v5010_v18 }
 0x1c4   : > { %v1632_v43 = vsel %vm5032_vm14, %v1629_v8, %v1626_v14  ;;  %v1651_v35 = vadd.f32 1.0, %v2987_v29  ;;  %v1654_v33 = vmul.f32 -0.5, %v2987_v29  ;;  %2998 = vpow2.f32 %v726_v26 }
 0x1c5   : > { %v2024_v11 = vsel %vm360_vm12, %v4884_v61, %v1632_v43  ;;  %v1641_v32 = vsel %vm5040_vm15, %v1638_v53, %v1635_v52  ;;  %v730_v55 = vmul.f32 1.442695, %v498_v15  ;;  %v1647_v9 = vmul.f32 %v5010_v18, %v1646_v23 }
 0x1c6   : > { %v2152_v51 = vmax.f32 %v2024_v11, 0.0001  ;;  %v2025_v28 = vsel %vm361_vm13, %v4892_v16, %v1641_v32  ;;  %3000 = vlog2.f32 %v1651_v35  ;;  %v2989_v36 = vpop.eup %2988  ;;  %v1655_v45 = vadd.f32 1.0, %v1654_v33 }
 0x1c7   : > { %v2153_v20 = vmax.f32 %v2025_v28, 0.0001  ;;  %v1657_v10 = vand.u32 2147483647, %v2987_v29  ;;  %3002 = vpow2.f32 %v728_v0  ;;  %vm5061_vm1 = vcmp.lt.f32.partialorder %v1648_v54, 0.0004427343 }
 0x1c8   : > { %v2991_v61 = vpop.eup %2990  ;;  %v2280_v1 = vmin.f32 %v2152_v51, 10000.0  ;;  %v1660_v21 = vadd.f32 1.0, %v2989_v36  ;;  %v1663_v57 = vmul.f32 -0.5, %v2989_v36  ;;  %vm363_vm2 = vcmp.gt.f32.partialorder %v4952_v24, 20.0 }
 0x1c9   : > { %v2993_v16 = vpop.eup %2992  ;;  %v2281_v46 = vmin.f32 %v2153_v20, 10000.0  ;;  %v1644_v62 = vmul.f32 0.6931472, %v2991_v61  ;;  %3004 = vpow2.f32 %v730_v55  ;;  %v1666_v49 = vand.u32 2147483647, %v2989_v36 }
 0x1ca   : > { %2408 = vst [vmem:[%s3489_s17 + $0x2f0] sm:$0xff] %v2280_v1  ;;  %3006 = vlog2.f32 %v1660_v21  ;;  %v1669_v18 = vadd.f32 1.0, %v2993_v16  ;;  %v1672_v44 = vmul.f32 -0.5, %v2993_v16  ;;  %v2995_v56 = vpop.eup %2994  ;;  %v1656_v13 = vmul.f32 %v2987_v29, %v1655_v45 }
 0x1cb   : > { %2409 = vst [vmem:[%s3489_s17 + $0x2f8] sm:$0xff] %v2281_v46  ;;  %v1650_v25 = vsel %vm5061_vm1, %v1647_v9, %v1644_v62  ;;  %vm5073_vm3 = vcmp.lt.f32.partialorder %v1657_v10, 0.0004427343  ;;  %v499_v47 = vmin.f32 %v5066_v7, 20.0  ;;  %v1664_v59 = vadd.f32 1.0, %v1663_v57  ;;  %v5113_v46 = vld [vmem:[%s3335_s30 + $0x350] sm:$0xff] }
 0x1cc   : > { %v2026_v39 = vsel %vm362_vm0, %v4925_v5, %v1650_v25  ;;  %3008 = vlog2.f32 %v1669_v18  ;;  %v1675_v34 = vand.u32 2147483647, %v2993_v16  ;;  %vm364_vm4 = vcmp.gt.f32.partialorder %v4978_v41, 20.0  ;;  %v5196_v18 = vld [vmem:[%s3335_s30 + $0x388] sm:$0xff] }
 0x1cd   : > { %v2997_v30 = vpop.eup %2996  ;;  %v2154_v63 = vmax.f32 %v2026_v39, 0.0001  ;;  %v1673_v60 = vadd.f32 1.0, %v1672_v44  ;;  %v1678_v17 = vadd.f32 1.0, %v2995_v56  ;;  %v1681_v2 = vmul.f32 -0.5, %v2995_v56 }
 0x1ce   : > { %vm5082_vm5 = vcmp.lt.f32.partialorder %v1666_v49, 0.0004427343  ;;  %v1684_v8 = vand.u32 2147483647, %v2995_v56  ;;  %v1687_v19 = vadd.f32 1.0, %v2997_v30  ;;  %v1690_v4 = vmul.f32 -0.5, %v2997_v30  ;;  %v2999_v48 = vpop.eup %2998 }
 0x1cf   : > { %v2282_v5 = vmin.f32 %v2154_v63, 10000.0  ;;  %vm365_vm6 = vcmp.gt.f32.partialorder %v4997_v3, 20.0  ;;  %3010 = vlog2.f32 %v1678_v17  ;;  %v1693_v53 = vand.u32 2147483647, %v2997_v30 }
 0x1d0   : > { %v732_v12 = vmul.f32 1.442695, %v499_v47  ;;  %v3001_v50 = vpop.eup %3000  ;;  %v1665_v40 = vmul.f32 %v2989_v36, %v1664_v59  ;;  %vm5087_vm7 = vcmp.lt.f32.partialorder %v1675_v34, 0.0004427343  ;;  %3012 = vlog2.f32 %v1687_v19 }
 0x1d1   : > { %v1696_v23 = vadd.f32 1.0, %v2999_v48  ;;  %v3003_v26 = vpop.eup %3002  ;;  %2410 = vst [vmem:[%s3489_s17 + $0x300] sm:$0xff] %v2282_v5  ;;  %v1653_v15 = vmul.f32 0.6931472, %v3001_v50  ;;  %v1674_v29 = vmul.f32 %v2993_v16, %v1673_v60  ;;  %v1682_v52 = vadd.f32 1.0, %v1681_v2 }
 0x1d2   : > { %v1699_v0 = vmul.f32 -0.5, %v2999_v48  ;;  %vm366_vm8 = vcmp.gt.f32.partialorder %v5000_v38, 20.0  ;;  %vm5093_vm9 = vcmp.lt.f32.partialorder %v1684_v8, 0.0004427343  ;;  %v1691_v54 = vadd.f32 1.0, %v1690_v4 }
 0x1d3   : > { %3014 = vlog2.f32 %v1696_v23  ;;  %v1705_v35 = vadd.f32 1.0, %v3003_v26  ;;  %v5097_v33 = vpop.eup %3004  ;;  %v1659_v11 = vsel %vm5073_vm3, %v1656_v13, %v1653_v15  ;;  %vm367_vm10 = vcmp.gt.f32.partialorder %v5019_v6, 20.0  ;;  %v5126_v13 = vld [vmem:[%s3335_s30 + $0x358] sm:$0xff] }
 0x1d4   : > { %vm5102_vm11 = vcmp.lt.f32.partialorder %v1693_v53, 0.0004427343  ;;  %v1702_v55 = vand.u32 2147483647, %v2999_v48  ;;  %v1708_v51 = vmul.f32 -0.5, %v3003_v26  ;;  %v3007_v28 = vpop.eup %3006  ;;  %v2027_v9 = vsel %vm363_vm2, %v4952_v24, %v1659_v11 }
 0x1d5   : > { %v1700_v36 = vadd.f32 1.0, %v1699_v0  ;;  %3016 = vlog2.f32 %v1705_v35  ;;  %v1714_v20 = vadd.f32 1.0, %v5097_v33  ;;  %v2155_v45 = vmax.f32 %v2027_v9, 0.0001  ;;  %v5159_v0 = vld [vmem:[%s3335_s30 + $0x368] sm:$0xff] }
 0x1d6   : > { %v1662_v10 = vmul.f32 0.6931472, %v3007_v28  ;;  %v1683_v61 = vmul.f32 %v2995_v56, %v1682_v52  ;;  %vm368_vm12 = vcmp.gt.f32.partialorder %v5025_v37, 20.0  ;;  %v1711_v1 = vand.u32 2147483647, %v3003_v26  ;;  %v3009_v27 = vpop.eup %3008 }
 0x1d7   : > { %v1692_v21 = vmul.f32 %v2997_v30, %v1691_v54  ;;  %v1709_v57 = vadd.f32 1.0, %v1708_v51  ;;  %3018 = vlog2.f32 %v1714_v20  ;;  %v1717_v16 = vmul.f32 -0.5, %v5097_v33 }
 0x1d8   : > { %v2283_v24 = vmin.f32 %v2155_v45, 10000.0  ;;  %v1668_v62 = vsel %vm5082_vm5, %v1665_v40, %v1662_v10  ;;  %v1671_v49 = vmul.f32 0.6931472, %v3009_v27  ;;  %vm5117_vm13 = vcmp.lt.f32.partialorder %v1702_v55, 0.0004427343  ;;  %v5179_v45 = vld [vmem:[%s3335_s30 + $0x370] sm:$0xff] }
 0x1d9   : > { %vm369_vm14 = vcmp.gt.f32.partialorder %v5030_v22, 20.0  ;;  %v2028_v44 = vsel %vm364_vm4, %v4978_v41, %v1668_v62  ;;  %v1701_v56 = vmul.f32 %v2999_v48, %v1700_v36  ;;  %v1718_v25 = vadd.f32 1.0, %v1717_v16  ;;  %v3011_v31 = vpop.eup %3010  ;;  %v5138_v41 = vld [vmem:[%s3335_s30 + $0x360] sm:$0xff] }
 0x1da   : > { %3020 = vpow2.f32 %v732_v12  ;;  %2411 = vst [vmem:[%s3489_s17 + $0x308] sm:$0xff] %v2283_v24  ;;  %v2156_v47 = vmax.f32 %v2028_v44, 0.0001  ;;  %v1677_v39 = vsel %vm5087_vm7, %v1674_v29, %v1671_v49  ;;  %vm5131_vm15 = vcmp.lt.f32.partialorder %v1711_v1, 0.0004427343  ;;  %v3013_v30 = vpop.eup %3012  ;;  %v5193_v49 = vld [vmem:[%s3335_s30 + $0x380] sm:$0xff] }
 0x1db   : > { %vm370_vm0 = vcmp.gt.f32.partialorder %v5038_v58, 20.0  ;;  %v500_v34 = vmin.f32 %v5113_v46, 20.0  ;;  %v2029_v63 = vsel %vm365_vm6, %v4997_v3, %v1677_v39  ;;  %v1680_v60 = vmul.f32 0.6931472, %v3011_v31 }
 0x1dc   : > { %v1710_v17 = vmul.f32 %v3003_v26, %v1709_v57  ;;  %v1720_v2 = vand.u32 2147483647, %v5097_v33  ;;  %v2284_v42 = vmin.f32 %v2156_v47, 10000.0  ;;  %v2157_v8 = vmax.f32 %v2029_v63, 0.0001  ;;  %v5188_v57 = vld [vmem:[%s3335_s30 + $0x378] sm:$0xff] }
 0x1dd   : > { %v1689_v19 = vmul.f32 0.6931472, %v3013_v30  ;;  %v501_v4 = vmin.f32 %v5126_v13, 20.0  ;;  %v3015_v48 = vpop.eup %3014  ;;  %v1686_v5 = vsel %vm5093_vm9, %v1683_v61, %v1680_v60  ;;  %v1719_v53 = vmul.f32 %v5097_v33, %v1718_v25 }
 0x1de   : > { %v734_v12 = vmul.f32 1.442695, %v500_v34  ;;  %v502_v3 = vmin.f32 %v5138_v41, 20.0  ;;  %2412 = vst [vmem:[%s3489_s17 + $0x310] sm:$0xff] %v2284_v42  ;;  %v2285_v50 = vmin.f32 %v2157_v8, 10000.0  ;;  %v2030_v40 = vsel %vm366_vm8, %v5000_v38, %v1686_v5 }
 0x1df   : > { %v1695_v14 = vsel %vm5102_vm11, %v1692_v21, %v1689_v19  ;;  %v1698_v23 = vmul.f32 0.6931472, %v3015_v48  ;;  %v3017_v26 = vpop.eup %3016  ;;  %v2158_v15 = vmax.f32 %v2030_v40, 0.0001  ;;  %v736_v52 = vmul.f32 1.442695, %v501_v4 }
 0x1e0   : > { %v2031_v29 = vsel %vm367_vm10, %v5019_v6, %v1695_v14  ;;  %3022 = vpow2.f32 %v734_v12  ;;  %2413 = vst [vmem:[%s3489_s17 + $0x318] sm:$0xff] %v2285_v50  ;;  %v1707_v54 = vmul.f32 0.6931472, %v3017_v26  ;;  %v738_v35 = vmul.f32 1.442695, %v502_v3  ;;  %v5205_v4 = vld [vmem:[%s3335_s30 + $0x390] sm:$0xff] }
 0x1e1   : > { %v2159_v43 = vmax.f32 %v2031_v29, 0.0001  ;;  %v1704_v38 = vsel %vm5117_vm13, %v1701_v56, %v1698_v23  ;;  %v3019_v33 = vpop.eup %3018  ;;  %v2286_v11 = vmin.f32 %v2158_v15, 10000.0  ;;  %vm5167_vm1 = vcmp.lt.f32.partialorder %v1720_v2, 0.0004427343  ;;  %v5214_v26 = vld [vmem:[%s3335_s30 + $0x398] sm:$0xff] }
 0x1e2   : > { %v2032_v6 = vsel %vm368_vm12, %v5025_v37, %v1704_v38  ;;  %3024 = vpow2.f32 %v736_v52  ;;  %v1713_v28 = vsel %vm5131_vm15, %v1710_v17, %v1707_v54  ;;  %v1716_v9 = vmul.f32 0.6931472, %v3019_v33 }
 0x1e3   : > { %v2287_v55 = vmin.f32 %v2159_v43, 10000.0  ;;  %v2160_v51 = vmax.f32 %v2032_v6, 0.0001  ;;  %2414 = vst [vmem:[%s3489_s17 + $0x320] sm:$0xff] %v2286_v11  ;;  %v2033_v20 = vsel %vm369_vm14, %v5030_v22, %v1713_v28  ;;  %3026 = vpow2.f32 %v738_v35 }
 0x1e4   : > { %v3021_v36 = vpop.eup %3020  ;;  %v503_v37 = vmin.f32 %v5159_v0, 20.0  ;;  %v2161_v61 = vmax.f32 %v2033_v20, 0.0001  ;;  %v1722_v1 = vsel %vm5167_vm1, %v1719_v53, %v1716_v9  ;;  %v504_v62 = vmin.f32 %v5179_v45, 20.0 }
 0x1e5   : > { %2415 = vst [vmem:[%s3489_s17 + $0x328] sm:$0xff] %v2287_v55  ;;  %v2288_v10 = vmin.f32 %v2160_v51, 10000.0  ;;  %v1723_v27 = vadd.f32 1.0, %v3021_v36  ;;  %v2034_v21 = vsel %vm370_vm0, %v5038_v58, %v1722_v1  ;;  %v1726_v44 = vmul.f32 -0.5, %v3021_v36 }
 0x1e6   : > { %v740_v22 = vmul.f32 1.442695, %v503_v37  ;;  %v2289_v16 = vmin.f32 %v2161_v61, 10000.0  ;;  %v2162_v24 = vmax.f32 %v2034_v21, 0.0001  ;;  %v505_v58 = vmin.f32 %v5188_v57, 20.0 }
 0x1e7   : > { %2416 = vst [vmem:[%s3489_s17 + $0x330] sm:$0xff] %v2288_v10  ;;  %3028 = vlog2.f32 %v1723_v27  ;;  %v742_v25 = vmul.f32 1.442695, %v504_v62  ;;  %v506_v47 = vmin.f32 %v5193_v49, 20.0  ;;  %v507_v39 = vmin.f32 %v5196_v18, 20.0 }
 0x1e8   : > { %3030 = vpow2.f32 %v740_v22  ;;  %2417 = vst [vmem:[%s3489_s17 + $0x338] sm:$0xff] %v2289_v16  ;;  %v2290_v56 = vmin.f32 %v2162_v24, 10000.0  ;;  %v1729_v59 = vand.u32 2147483647, %v3021_v36  ;;  %v1727_v63 = vadd.f32 1.0, %v1726_v44 }
 0x1e9   : > { %3032 = vpow2.f32 %v742_v25  ;;  %v744_v60 = vmul.f32 1.442695, %v505_v58  ;;  %v746_v17 = vmul.f32 1.442695, %v506_v47  ;;  %vm371_vm2 = vcmp.gt.f32.partialorder %v5066_v7, 20.0 }
 0x1ea   : > { %v3023_v31 = vpop.eup %3022  ;;  %2418 = vst [vmem:[%s3489_s17 + $0x340] sm:$0xff] %v2290_v56  ;;  %v748_v19 = vmul.f32 1.442695, %v507_v39  ;;  %v1728_v12 = vmul.f32 %v3021_v36, %v1727_v63  ;;  %vm5207_vm3 = vcmp.lt.f32.partialorder %v1729_v59, 0.0004427343  ;;  %vm372_vm4 = vcmp.gt.f32.partialorder %v5113_v46, 20.0 }
 0x1eb   : > { %v1732_v34 = vadd.f32 1.0, %v3023_v31  ;;  %v1735_v8 = vmul.f32 -0.5, %v3023_v31  ;;  %v1738_v48 = vand.u32 2147483647, %v3023_v31  ;;  %v508_v23 = vmin.f32 %v5205_v4, 20.0 }
 0x1ec   : > { %v3025_v30 = vpop.eup %3024  ;;  %vm373_vm5 = vcmp.gt.f32.partialorder %v5126_v13, 20.0  ;;  %vm374_vm7 = vcmp.gt.f32.partialorder %v5138_v41, 20.0  ;;  %v509_v32 = vmin.f32 %v5214_v26, 20.0  ;;  %vm375_vm10 = vcmp.gt.f32.partialorder %v5159_v0, 20.0 }
 0x1ed   : > { %3034 = vlog2.f32 %v1732_v34  ;;  %v1741_v2 = vadd.f32 1.0, %v3025_v30  ;;  %v3027_v42 = vpop.eup %3026  ;;  %v1744_v5 = vmul.f32 -0.5, %v3025_v30  ;;  %v1747_v40 = vand.u32 2147483647, %v3025_v30  ;;  %v5255_v34 = vld [vmem:[%s3335_s30 + $0x3a0] sm:$0xff] }
 0x1ee   : > { %3036 = vpow2.f32 %v744_v60  ;;  %v1750_v53 = vadd.f32 1.0, %v3027_v42  ;;  %v1753_v14 = vmul.f32 -0.5, %v3027_v42  ;;  %v1736_v52 = vadd.f32 1.0, %v1735_v8 }
 0x1ef   : > { %3038 = vlog2.f32 %v1741_v2  ;;  %vm5217_vm6 = vcmp.lt.f32.partialorder %v1738_v48, 0.0004427343  ;;  %v1745_v38 = vadd.f32 1.0, %v1744_v5  ;;  %v1756_v11 = vand.u32 2147483647, %v3027_v42 }
 0x1f0   : > { %3040 = vpow2.f32 %v746_v17  ;;  %v750_v6 = vmul.f32 1.442695, %v508_v23  ;;  %vm5230_vm8 = vcmp.lt.f32.partialorder %v1747_v40, 0.0004427343  ;;  %v1754_v9 = vadd.f32 1.0, %v1753_v14 }
 0x1f1   : > { %v3029_v50 = vpop.eup %3028  ;;  %3042 = vlog2.f32 %v1750_v53  ;;  %v1737_v20 = vmul.f32 %v3023_v31, %v1736_v52  ;;  %v1746_v1 = vmul.f32 %v3025_v30, %v1745_v38  ;;  %v752_v21 = vmul.f32 1.442695, %v509_v32 }
 0x1f2   : > { %v3031_v15 = vpop.eup %3030  ;;  %v1725_v29 = vmul.f32 0.6931472, %v3029_v50  ;;  %3044 = vpow2.f32 %v748_v19  ;;  %vm5237_vm9 = vcmp.lt.f32.partialorder %v1756_v11, 0.0004427343  ;;  %v1755_v44 = vmul.f32 %v3027_v42, %v1754_v9 }
 0x1f3   : > { %v1759_v54 = vadd.f32 1.0, %v3031_v15  ;;  %v1762_v35 = vmul.f32 -0.5, %v3031_v15  ;;  %v5225_v55 = vpop.eup %3032  ;;  %v1765_v37 = vand.u32 2147483647, %v3031_v15  ;;  %vm376_vm12 = vcmp.gt.f32.partialorder %v5179_v45, 20.0 }
 0x1f4   : > { %v1731_v33 = vsel %vm5207_vm3, %v1728_v12, %v1725_v29  ;;  %v1768_v10 = vadd.f32 1.0, %v5225_v55  ;;  %v1771_v56 = vmul.f32 -0.5, %v5225_v55  ;;  %v1774_v17 = vand.u32 2147483647, %v5225_v55 }
 0x1f5   : > { %v2035_v51 = vsel %vm371_vm2, %v5066_v7, %v1731_v33  ;;  %3046 = vlog2.f32 %v1759_v54  ;;  %v1763_v27 = vadd.f32 1.0, %v1762_v35  ;;  %vm5250_vm11 = vcmp.lt.f32.partialorder %v1765_v37, 0.0004427343 }
 0x1f6   : > { %v2163_v36 = vmax.f32 %v2035_v51, 0.0001  ;;  %3048 = vpow2.f32 %v750_v6  ;;  %v1772_v5 = vadd.f32 1.0, %v1771_v56  ;;  %v510_v12 = vmin.f32 %v5255_v34, 20.0 }
 0x1f7   : > { %v3035_v61 = vpop.eup %3034  ;;  %3050 = vlog2.f32 %v1768_v10  ;;  %v1764_v60 = vmul.f32 %v3031_v15, %v1763_v27  ;;  %vm377_vm13 = vcmp.gt.f32.partialorder %v5188_v57, 20.0  ;;  %vm5277_vm14 = vcmp.lt.f32.partialorder %v1774_v17, 0.0004427343 }
 0x1f8   : > { %v5235_v22 = vpop.eup %3036  ;;  %v2291_v7 = vmin.f32 %v2163_v36, 10000.0  ;;  %v1734_v16 = vmul.f32 0.6931472, %v3035_v61  ;;  %3052 = vpow2.f32 %v752_v21  ;;  %v1773_v33 = vmul.f32 %v5225_v55, %v1772_v5 }
 0x1f9   : > { %v3039_v62 = vpop.eup %3038  ;;  %v1777_v25 = vadd.f32 1.0, %v5235_v22  ;;  %v1780_v58 = vmul.f32 -0.5, %v5235_v22  ;;  %v1783_v11 = vand.u32 2147483647, %v5235_v22  ;;  %vm378_vm15 = vcmp.gt.f32.partialorder %v5193_v49, 20.0 }
 0x1fa   : > { %v5245_v31 = vpop.eup %3040  ;;  %2419 = vst [vmem:[%s3489_s17 + $0x348] sm:$0xff] %v2291_v7  ;;  %v1740_v47 = vsel %vm5217_vm6, %v1737_v20, %v1734_v16  ;;  %v1743_v39 = vmul.f32 0.6931472, %v3039_v62  ;;  %vm379_vm0 = vcmp.gt.f32.partialorder %v5196_v18, 20.0  ;;  %v754_v27 = vmul.f32 1.442695, %v510_v12 }
 0x1fb   : > { %v3043_v30 = vpop.eup %3042  ;;  %v2036_v63 = vsel %vm372_vm4, %v5113_v46, %v1740_v47  ;;  %3054 = vlog2.f32 %v1777_v25  ;;  %v1786_v48 = vadd.f32 1.0, %v5245_v31  ;;  %v1781_v53 = vadd.f32 1.0, %v1780_v58  ;;  %v5399_v47 = vld [vmem:[%s3335_s30 + $0x3e0] sm:$0xff] }
 0x1fc   : > { %v5262_v2 = vpop.eup %3044  ;;  %v2164_v42 = vmax.f32 %v2036_v63, 0.0001  ;;  %v1749_v8 = vsel %vm5230_vm8, %v1746_v1, %v1743_v39  ;;  %v1752_v19 = vmul.f32 0.6931472, %v3043_v30  ;;  %v1789_v15 = vmul.f32 -0.5, %v5245_v31  ;;  %v5323_v39 = vld [vmem:[%s3335_s30 + $0x3a8] sm:$0xff] }
 0x1fd   : > { %v2037_v46 = vsel %vm373_vm5, %v5126_v13, %v1749_v8  ;;  %3056 = vlog2.f32 %v1786_v48  ;;  %v1795_v29 = vadd.f32 1.0, %v5262_v2  ;;  %v1798_v54 = vmul.f32 -0.5, %v5262_v2 }
 0x1fe   : > { %v2292_v3 = vmin.f32 %v2164_v42, 10000.0  ;;  %v2165_v50 = vmax.f32 %v2037_v46, 0.0001  ;;  %v1758_v40 = vsel %vm5237_vm9, %v1755_v44, %v1752_v19  ;;  %v1792_v28 = vand.u32 2147483647, %v5245_v31 }
 0x1ff   : > { %v3047_v14 = vpop.eup %3046  ;;  %v2038_v23 = vsel %vm374_vm7, %v5138_v41, %v1758_v40  ;;  %v1782_v41 = vmul.f32 %v5235_v22, %v1781_v53  ;;  %3058 = vlog2.f32 %v1795_v29  ;;  %v1790_v20 = vadd.f32 1.0, %v1789_v15  ;;  %v5352_v40 = vld [vmem:[%s3335_s30 + $0x3c0] sm:$0xff] }
 0x200   : > { %2420 = vst [vmem:[%s3489_s17 + $0x350] sm:$0xff] %v2292_v3  ;;  %v2293_v52 = vmin.f32 %v2165_v50, 10000.0  ;;  %v2166_v43 = vmax.f32 %v2038_v23, 0.0001  ;;  %v1761_v38 = vmul.f32 0.6931472, %v3047_v14  ;;  %v5285_v35 = vpop.eup %3048 }
 0x201   : > { %v3051_v6 = vpop.eup %3050  ;;  %v1804_v9 = vadd.f32 1.0, %v5285_v35  ;;  %v1801_v37 = vand.u32 2147483647, %v5262_v2  ;;  %v1799_v1 = vadd.f32 1.0, %v1798_v54  ;;  %vm5306_vm1 = vcmp.lt.f32.partialorder %v1783_v11, 0.0004427343 }
 0x202   : > { %2421 = vst [vmem:[%s3489_s17 + $0x358] sm:$0xff] %v2293_v52  ;;  %v2294_v32 = vmin.f32 %v2166_v43, 10000.0  ;;  %v1767_v51 = vsel %vm5250_vm11, %v1764_v60, %v1761_v38  ;;  %v1770_v36 = vmul.f32 0.6931472, %v3051_v6  ;;  %v5300_v10 = vpop.eup %3052  ;;  %v1807_v7 = vmul.f32 -0.5, %v5285_v35  ;;  %v5337_v60 = vld [vmem:[%s3335_s30 + $0x3b8] sm:$0xff] }
 0x203   : > { %v2039_v55 = vsel %vm375_vm10, %v5159_v0, %v1767_v51  ;;  %3060 = vlog2.f32 %v1804_v9  ;;  %v1813_v16 = vadd.f32 1.0, %v5300_v10  ;;  %v1816_v56 = vmul.f32 -0.5, %v5300_v10  ;;  %v5367_v11 = vld [vmem:[%s3335_s30 + $0x3c8] sm:$0xff]  ;;  %v5370_v6 = vld [vmem:[%s3335_s30 + $0x3d0] sm:$0xff] }
 0x204   : > { %2422 = vst [vmem:[%s3489_s17 + $0x360] sm:$0xff] %v2294_v32  ;;  %v2167_v61 = vmax.f32 %v2039_v55, 0.0001  ;;  %v1776_v22 = vsel %vm5277_vm14, %v1773_v33, %v1770_v36  ;;  %v1791_v58 = vmul.f32 %v5245_v31, %v1790_v20  ;;  %vm5317_vm2 = vcmp.lt.f32.partialorder %v1792_v28, 0.0004427343  ;;  %v5334_v31 = vld [vmem:[%s3335_s30 + $0x3b0] sm:$0xff] }
 0x205   : > { %v3055_v21 = vpop.eup %3054  ;;  %v2040_v62 = vsel %vm376_vm12, %v5179_v45, %v1776_v22  ;;  %vm380_vm3 = vcmp.gt.f32.partialorder %v5205_v4, 20.0  ;;  %3062 = vlog2.f32 %v1813_v16  ;;  %v1800_v30 = vmul.f32 %v5262_v2, %v1799_v1 }
 0x206   : > { %v2295_v24 = vmin.f32 %v2167_v61, 10000.0  ;;  %v1779_v44 = vmul.f32 0.6931472, %v3055_v21  ;;  %v2168_v25 = vmax.f32 %v2040_v62, 0.0001  ;;  %3064 = vpow2.f32 %v754_v27 }
 0x207   : > { %v3057_v59 = vpop.eup %3056  ;;  %vm5329_vm4 = vcmp.lt.f32.partialorder %v1801_v37, 0.0004427343  ;;  %v1808_v19 = vadd.f32 1.0, %v1807_v7  ;;  %v1810_v2 = vand.u32 2147483647, %v5285_v35  ;;  %vm381_vm5 = vcmp.gt.f32.partialorder %v5214_v26, 20.0 }
 0x208   : > { %2423 = vst [vmem:[%s3489_s17 + $0x368] sm:$0xff] %v2295_v24  ;;  %v1785_v45 = vsel %vm5306_vm1, %v1782_v41, %v1779_v44  ;;  %v2296_v17 = vmin.f32 %v2168_v25, 10000.0  ;;  %v1788_v8 = vmul.f32 0.6931472, %v3057_v59  ;;  %v1817_v46 = vadd.f32 1.0, %v1816_v56  ;;  %v5389_v7 = vld [vmem:[%s3335_s30 + $0x3d8] sm:$0xff] }
 0x209   : > { %v2041_v42 = vsel %vm377_vm13, %v5188_v57, %v1785_v45  ;;  %v511_v5 = vmin.f32 %v5323_v39, 20.0  ;;  %v3059_v53 = vpop.eup %3058  ;;  %v1819_v3 = vand.u32 2147483647, %v5300_v10  ;;  %v512_v57 = vmin.f32 %v5334_v31, 20.0 }
 0x20a   : > { %v2169_v48 = vmax.f32 %v2041_v42, 0.0001  ;;  %2424 = vst [vmem:[%s3489_s17 + $0x370] sm:$0xff] %v2296_v17  ;;  %v1794_v12 = vsel %vm5317_vm2, %v1791_v58, %v1788_v8  ;;  %v513_v50 = vmin.f32 %v5337_v60, 20.0  ;;  %v1797_v13 = vmul.f32 0.6931472, %v3059_v53 }
 0x20b   : > { %v2042_v23 = vsel %vm378_vm15, %v5193_v49, %v1794_v12  ;;  %v756_v15 = vmul.f32 1.442695, %v511_v5  ;;  %v1809_v52 = vmul.f32 %v5285_v35, %v1808_v19  ;;  %v758_v43 = vmul.f32 1.442695, %v512_v57  ;;  %v5405_v57 = vld [vmem:[%s3335_s30 + $0x3e8] sm:$0xff] }
 0x20c   : > { %v2297_v14 = vmin.f32 %v2169_v48, 10000.0  ;;  %v2170_v29 = vmax.f32 %v2042_v23, 0.0001  ;;  %v760_v38 = vmul.f32 1.442695, %v513_v50  ;;  %v1803_v33 = vsel %vm5329_vm4, %v1800_v30, %v1797_v13 }
 0x20d   : > { %v3061_v54 = vpop.eup %3060  ;;  %vm5361_vm6 = vcmp.lt.f32.partialorder %v1810_v2, 0.0004427343  ;;  %3066 = vpow2.f32 %v756_v15  ;;  %v514_v49 = vmin.f32 %v5352_v40, 20.0  ;;  %v2043_v32 = vsel %vm379_vm0, %v5196_v18, %v1803_v33 }
 0x20e   : > { %2425 = vst [vmem:[%s3489_s17 + $0x378] sm:$0xff] %v2297_v14  ;;  %v2298_v35 = vmin.f32 %v2170_v29, 10000.0  ;;  %v1806_v51 = vmul.f32 0.6931472, %v3061_v54  ;;  %3068 = vpow2.f32 %v758_v43  ;;  %v2171_v28 = vmax.f32 %v2043_v32, 0.0001 }
 0x20f   : > { %v1818_v9 = vmul.f32 %v5300_v10, %v1817_v46  ;;  %3070 = vpow2.f32 %v760_v38  ;;  %v762_v55 = vmul.f32 1.442695, %v514_v49  ;;  %v3063_v36 = vpop.eup %3062  ;;  %vm5379_vm7 = vcmp.lt.f32.partialorder %v1819_v3, 0.0004427343 }
 0x210   : > { %2426 = vst [vmem:[%s3489_s17 + $0x380] sm:$0xff] %v2298_v35  ;;  %v1812_v20 = vsel %vm5361_vm6, %v1809_v52, %v1806_v51  ;;  %v515_v18 = vmin.f32 %v5367_v11, 20.0  ;;  %v516_v61 = vmin.f32 %v5370_v6, 20.0  ;;  %v3065_v1 = vpop.eup %3064  ;;  %v2299_v27 = vmin.f32 %v2171_v28, 10000.0 }
 0x211   : > { %v2044_v10 = vsel %vm380_vm3, %v5205_v4, %v1812_v20  ;;  %v1815_v21 = vmul.f32 0.6931472, %v3063_v36  ;;  %3072 = vpow2.f32 %v762_v55  ;;  %v1822_v0 = vadd.f32 1.0, %v3065_v1 }
 0x212   : > { %v2172_v22 = vmax.f32 %v2044_v10, 0.0001  ;;  %2427 = vst [vmem:[%s3489_s17 + $0x388] sm:$0xff] %v2299_v27  ;;  %v764_v24 = vmul.f32 1.442695, %v515_v18  ;;  %v1825_v4 = vmul.f32 -0.5, %v3065_v1 }
 0x213   : > { %v1821_v16 = vsel %vm5379_vm7, %v1818_v9, %v1815_v21  ;;  %v766_v62 = vmul.f32 1.442695, %v516_v61  ;;  %3074 = vlog2.f32 %v1822_v0  ;;  %v517_v58 = vmin.f32 %v5389_v7, 20.0 }
 0x214   : > { %v2300_v44 = vmin.f32 %v2172_v22, 10000.0  ;;  %v2045_v56 = vsel %vm381_vm5, %v5214_v26, %v1821_v16  ;;  %3076 = vpow2.f32 %v764_v24  ;;  %v1828_v30 = vand.u32 2147483647, %v3065_v1 }
 0x215   : > { %v2173_v25 = vmax.f32 %v2045_v56, 0.0001  ;;  %3078 = vpow2.f32 %v766_v62  ;;  %v768_v63 = vmul.f32 1.442695, %v517_v58  ;;  %v1826_v42 = vadd.f32 1.0, %v1825_v4 }
 0x216   : > { %2428 = vst [vmem:[%s3489_s17 + $0x390] sm:$0xff] %v2300_v44  ;;  %v518_v19 = vmin.f32 %v5399_v47, 20.0  ;;  %vm382_vm8 = vcmp.gt.f32.partialorder %v5255_v34, 20.0  ;;  %vm5408_vm9 = vcmp.lt.f32.partialorder %v1828_v30, 0.0004427343  ;;  %vm383_vm10 = vcmp.gt.f32.partialorder %v5323_v39, 20.0 }
 0x217   : > { %v3067_v59 = vpop.eup %3066  ;;  %v2301_v45 = vmin.f32 %v2173_v25, 10000.0  ;;  %3080 = vpow2.f32 %v768_v63  ;;  %v1827_v52 = vmul.f32 %v3065_v1, %v1826_v42  ;;  %v519_v54 = vmin.f32 %v5405_v57, 20.0 }
 0x218   : > { %v3069_v17 = vpop.eup %3068  ;;  %v1831_v8 = vadd.f32 1.0, %v3067_v59  ;;  %v1834_v26 = vmul.f32 -0.5, %v3067_v59  ;;  %v1837_v2 = vand.u32 2147483647, %v3067_v59  ;;  %v770_v29 = vmul.f32 1.442695, %v518_v19 }
 0x219   : > { %v3071_v48 = vpop.eup %3070  ;;  %2429 = vst [vmem:[%s3489_s17 + $0x398] sm:$0xff] %v2301_v45  ;;  %v1840_v46 = vadd.f32 1.0, %v3069_v17  ;;  %v1843_v5 = vmul.f32 -0.5, %v3069_v17  ;;  %v1846_v12 = vand.u32 2147483647, %v3069_v17  ;;  %vm384_vm12 = vcmp.gt.f32.partialorder %v5334_v31, 20.0 }
 0x21a   : > { %3082 = vlog2.f32 %v1831_v8  ;;  %v1835_v53 = vadd.f32 1.0, %v1834_v26  ;;  %v1849_v3 = vadd.f32 1.0, %v3071_v48  ;;  %v1852_v23 = vmul.f32 -0.5, %v3071_v48 }
 0x21b   : > { %v3073_v50 = vpop.eup %3072  ;;  %3084 = vlog2.f32 %v1840_v46  ;;  %v1844_v14 = vadd.f32 1.0, %v1843_v5  ;;  %vm5413_vm11 = vcmp.lt.f32.partialorder %v1837_v2, 0.0004427343  ;;  %vm5419_vm13 = vcmp.lt.f32.partialorder %v1846_v12, 0.0004427343 }
 0x21c   : > { %3086 = vlog2.f32 %v1849_v3  ;;  %v1858_v15 = vadd.f32 1.0, %v3073_v50  ;;  %v1861_v38 = vmul.f32 -0.5, %v3073_v50  ;;  %v1836_v41 = vmul.f32 %v3067_v59, %v1835_v53  ;;  %v5447_v59 = vld [vmem:[%s3335_s30 + $0x3f0] sm:$0xff]  ;;  %v5460_v53 = vld [vmem:[%s3335_s30 + $0x3f8] sm:$0xff] }
 0x21d   : > { %v3075_v33 = vpop.eup %3074  ;;  %v1855_v35 = vand.u32 2147483647, %v3071_v48  ;;  %v1845_v28 = vmul.f32 %v3069_v17, %v1844_v14  ;;  %vm385_vm14 = vcmp.gt.f32.partialorder %v5337_v60, 20.0  ;;  %v1853_v9 = vadd.f32 1.0, %v1852_v23 }
 0x21e   : > { %3088 = vlog2.f32 %v1858_v15  ;;  %v3077_v32 = vpop.eup %3076  ;;  %v1824_v51 = vmul.f32 0.6931472, %v3075_v33  ;;  %v1864_v55 = vand.u32 2147483647, %v3073_v50  ;;  %v1862_v20 = vadd.f32 1.0, %v1861_v38 }
 0x21f   : > { %v5424_v36 = vpop.eup %3078  ;;  %v1867_v37 = vadd.f32 1.0, %v3077_v32  ;;  %v1870_v18 = vmul.f32 -0.5, %v3077_v32  ;;  %3090 = vpow2.f32 %v770_v29  ;;  %vm386_vm15 = vcmp.gt.f32.partialorder %v5352_v40, 20.0 }
 0x220   : > { %v1830_v61 = vsel %vm5408_vm9, %v1827_v52, %v1824_v51  ;;  %v1873_v1 = vand.u32 2147483647, %v3077_v32  ;;  %v1876_v27 = vadd.f32 1.0, %v5424_v36  ;;  %v1879_v10 = vmul.f32 -0.5, %v5424_v36 }
 0x221   : > { %v2046_v21 = vsel %vm382_vm8, %v5255_v34, %v1830_v61  ;;  %vm5434_vm0 = vcmp.lt.f32.partialorder %v1855_v35, 0.0004427343  ;;  %3092 = vlog2.f32 %v1867_v37  ;;  %v1871_v0 = vadd.f32 1.0, %v1870_v18  ;;  %v5438_v16 = vpop.eup %3080 }
 0x222   : > { %v2174_v24 = vmax.f32 %v2046_v21, 0.0001  ;;  %v1854_v62 = vmul.f32 %v3071_v48, %v1853_v9  ;;  %3094 = vlog2.f32 %v1876_v27  ;;  %v772_v44 = vmul.f32 1.442695, %v519_v54 }
 0x223   : > { %v1863_v4 = vmul.f32 %v3073_v50, %v1862_v20  ;;  %vm5440_vm1 = vcmp.lt.f32.partialorder %v1864_v55, 0.0004427343  ;;  %v1885_v34 = vadd.f32 1.0, %v5438_v16  ;;  %v1888_v58 = vmul.f32 -0.5, %v5438_v16 }
 0x224   : > { %v3083_v56 = vpop.eup %3082  ;;  %v2302_v30 = vmin.f32 %v2174_v24, 10000.0  ;;  %vm387_vm2 = vcmp.gt.f32.partialorder %v5367_v11, 20.0  ;;  %vm5450_vm3 = vcmp.lt.f32.partialorder %v1873_v1, 0.0004427343  ;;  %v1880_v42 = vadd.f32 1.0, %v1879_v10 }
 0x225   : > { %v3085_v45 = vpop.eup %3084  ;;  %v1833_v63 = vmul.f32 0.6931472, %v3083_v56  ;;  %v1872_v19 = vmul.f32 %v3077_v32, %v1871_v0  ;;  %v1882_v48 = vand.u32 2147483647, %v5424_v36  ;;  %3096 = vlog2.f32 %v1885_v34 }
 0x226   : > { %v3087_v8 = vpop.eup %3086  ;;  %v1842_v26 = vmul.f32 0.6931472, %v3085_v45  ;;  %2430 = vst [vmem:[%s3489_s17 + $0x3a0] sm:$0xff] %v2302_v30  ;;  %3098 = vpow2.f32 %v772_v44  ;;  %v520_v5 = vmin.f32 %v5447_v59, 20.0  ;;  %v1889_v14 = vadd.f32 1.0, %v1888_v58 }
 0x227   : > { %v1839_v2 = vsel %vm5413_vm11, %v1836_v41, %v1833_v63  ;;  %v1851_v46 = vmul.f32 0.6931472, %v3087_v8  ;;  %v1891_v23 = vand.u32 2147483647, %v5438_v16  ;;  %v521_v33 = vmin.f32 %v5460_v53, 20.0 }
 0x228   : > { %v3089_v12 = vpop.eup %3088  ;;  %v2047_v3 = vsel %vm383_vm10, %v5323_v39, %v1839_v2  ;;  %v1848_v50 = vsel %vm5419_vm13, %v1845_v28, %v1842_v26  ;;  %v774_v54 = vmul.f32 1.442695, %v520_v5  ;;  %v1881_v9 = vmul.f32 %v5424_v36, %v1880_v42 }
 0x229   : > { %v2175_v13 = vmax.f32 %v2047_v3, 0.0001  ;;  %v2048_v15 = vsel %vm384_vm12, %v5334_v31, %v1848_v50  ;;  %v1857_v29 = vsel %vm5434_vm0, %v1854_v62, %v1851_v46  ;;  %v1860_v52 = vmul.f32 0.6931472, %v3089_v12  ;;  %v3091_v43 = vpop.eup %3090 }
 0x22a   : > { %v2176_v38 = vmax.f32 %v2048_v15, 0.0001  ;;  %v2049_v39 = vsel %vm385_vm14, %v5337_v60, %v1857_v29  ;;  %v1894_v35 = vadd.f32 1.0, %v3091_v43  ;;  %vm5483_vm4 = vcmp.lt.f32.partialorder %v1882_v48, 0.0004427343 }
 0x22b   : > { %v2303_v41 = vmin.f32 %v2175_v13, 10000.0  ;;  %v2177_v49 = vmax.f32 %v2049_v39, 0.0001  ;;  %v1866_v31 = vsel %vm5440_vm1, %v1863_v4, %v1860_v52  ;;  %v3093_v32 = vpop.eup %3092  ;;  %vm388_vm5 = vcmp.gt.f32.partialorder %v5370_v6, 20.0 }
 0x22c   : > { %v2304_v51 = vmin.f32 %v2176_v38, 10000.0  ;;  %v2050_v28 = vsel %vm386_vm15, %v5352_v40, %v1866_v31  ;;  %v3095_v55 = vpop.eup %3094  ;;  %v1869_v18 = vmul.f32 0.6931472, %v3093_v32  ;;  %3100 = vlog2.f32 %v1894_v35 }
 0x22d   : > { %2431 = vst [vmem:[%s3489_s17 + $0x3a8] sm:$0xff] %v2303_v41  ;;  %v2305_v20 = vmin.f32 %v2177_v49, 10000.0  ;;  %v2178_v37 = vmax.f32 %v2050_v28, 0.0001  ;;  %v1878_v61 = vmul.f32 0.6931472, %v3095_v55  ;;  %3102 = vpow2.f32 %v774_v54 }
 0x22e   : > { %2432 = vst [vmem:[%s3489_s17 + $0x3b0] sm:$0xff] %v2304_v51  ;;  %v1897_v1 = vmul.f32 -0.5, %v3091_v43  ;;  %v1875_v36 = vsel %vm5450_vm3, %v1872_v19, %v1869_v18  ;;  %v1890_v27 = vmul.f32 %v5438_v16, %v1889_v14  ;;  %v776_v10 = vmul.f32 1.442695, %v521_v33 }
 0x22f   : > { %2433 = vst [vmem:[%s3489_s17 + $0x3b8] sm:$0xff] %v2305_v20  ;;  %v2306_v40 = vmin.f32 %v2178_v37, 10000.0  ;;  %v3097_v21 = vpop.eup %3096  ;;  %v2051_v22 = vsel %vm387_vm2, %v5367_v11, %v1875_v36  ;;  %v1884_v0 = vsel %vm5483_vm4, %v1881_v9, %v1878_v61  ;;  %vm389_vm6 = vcmp.gt.f32.partialorder %v5389_v7, 20.0 }
 0x230   : > { %vm1892_vm7 = vcmp.lt.f32.partialorder %v1891_v23, 0.0004427343  ;;  %v3099_v24 = vpop.eup %3098  ;;  %v2179_v62 = vmax.f32 %v2051_v22, 0.0001  ;;  %v2052_v16 = vsel %vm388_vm5, %v5370_v6, %v1884_v0  ;;  %v1887_v44 = vmul.f32 0.6931472, %v3097_v21 }
 0x231   : > { %2434 = vst [vmem:[%s3489_s17 + $0x3c0] sm:$0xff] %v2306_v40  ;;  %3104 = vpow2.f32 %v776_v10  ;;  %v2180_v56 = vmax.f32 %v2052_v16, 0.0001  ;;  %v1898_v4 = vadd.f32 1.0, %v1897_v1  ;;  %v1903_v11 = vadd.f32 1.0, %v3099_v24 }
 0x232   : > { %v2307_v25 = vmin.f32 %v2179_v62, 10000.0  ;;  %v1893_v34 = vsel %vm1892_vm7, %v1890_v27, %v1887_v44  ;;  %v1900_v58 = vand.u32 2147483647, %v3091_v43  ;;  %v1906_v17 = vmul.f32 -0.5, %v3099_v24 }
 0x233   : > { %v2308_v45 = vmin.f32 %v2180_v56, 10000.0  ;;  %v2053_v30 = vsel %vm389_vm6, %v5389_v7, %v1893_v34  ;;  %3106 = vlog2.f32 %v1903_v11  ;;  %v1899_v42 = vmul.f32 %v3091_v43, %v1898_v4 }
 0x234   : > { %2435 = vst [vmem:[%s3489_s17 + $0x3c8] sm:$0xff] %v2307_v25  ;;  %v2181_v63 = vmax.f32 %v2053_v30, 0.0001  ;;  %vm1901_vm8 = vcmp.lt.f32.partialorder %v1900_v58, 0.0004427343  ;;  %vm390_vm9 = vcmp.gt.f32.partialorder %v5399_v47, 20.0 }
 0x235   : > { %2436 = vst [vmem:[%s3489_s17 + $0x3d0] sm:$0xff] %v2308_v45  ;;  %v1907_v48 = vadd.f32 1.0, %v1906_v17  ;;  %v1909_v5 = vand.u32 2147483647, %v3099_v24  ;;  %vm391_vm11 = vcmp.gt.f32.partialorder %v5405_v57, 20.0  ;;  %vm392_vm13 = vcmp.gt.f32.partialorder %v5447_v59, 20.0 }
 0x236   : > { %v3101_v8 = vpop.eup %3100  ;;  %v2309_v6 = vmin.f32 %v2181_v63, 10000.0  ;;  %vm393_vm15 = vcmp.gt.f32.partialorder %v5460_v53, 20.0 }
 0x237   : > { %v3103_v26 = vpop.eup %3102  ;;  %v1896_v19 = vmul.f32 0.6931472, %v3101_v8  ;;  %v1908_v23 = vmul.f32 %v3099_v24, %v1907_v48  ;;  %vm1910_vm10 = vcmp.lt.f32.partialorder %v1909_v5, 0.0004427343 }
 0x238   : > { %2437 = vst [vmem:[%s3489_s17 + $0x3d8] sm:$0xff] %v2309_v6  ;;  %v1912_v2 = vadd.f32 1.0, %v3103_v26  ;;  %v1915_v50 = vmul.f32 -0.5, %v3103_v26  ;;  %v1918_v39 = vand.u32 2147483647, %v3103_v26 }
 0x239   : > { %v1902_v46 = vsel %vm1901_vm8, %v1899_v42, %v1896_v19 }
 0x23a   : > { %v2054_v12 = vsel %vm390_vm9, %v5399_v47, %v1902_v46  ;;  %3108 = vlog2.f32 %v1912_v2  ;;  %v1916_v43 = vadd.f32 1.0, %v1915_v50  ;;  %vm1919_vm12 = vcmp.lt.f32.partialorder %v1918_v39, 0.0004427343 }
 0x23b   : > { %v3105_v7 = vpop.eup %3104  ;;  %v2182_v3 = vmax.f32 %v2054_v12, 0.0001 }
 0x23c   : > { %v1921_v14 = vadd.f32 1.0, %v3105_v7  ;;  %v1924_v52 = vmul.f32 -0.5, %v3105_v7  ;;  %v1917_v41 = vmul.f32 %v3103_v26, %v1916_v43  ;;  %v1927_v49 = vand.u32 2147483647, %v3105_v7 }
 0x23d   : > { %v3107_v13 = vpop.eup %3106  ;;  %v2310_v15 = vmin.f32 %v2182_v3, 10000.0 }
 0x23e   : > { %3110 = vlog2.f32 %v1921_v14  ;;  %v1905_v29 = vmul.f32 0.6931472, %v3107_v13  ;;  %v1925_v33 = vadd.f32 1.0, %v1924_v52  ;;  %vm1928_vm14 = vcmp.lt.f32.partialorder %v1927_v49, 0.0004427343 }
 0x23f   : > { %2438 = vst [vmem:[%s3489_s17 + $0x3e0] sm:$0xff] %v2310_v15 }
 0x240   : > { %v1911_v38 = vsel %vm1910_vm10, %v1908_v23, %v1905_v29  ;;  %v1926_v51 = vmul.f32 %v3105_v7, %v1925_v33 }
 0x241   : > { %v2055_v47 = vsel %vm391_vm11, %v5405_v57, %v1911_v38 }
 0x242   : > { %v2183_v54 = vmax.f32 %v2055_v47, 0.0001 }
 0x244   : > { %v3109_v31 = vpop.eup %3108  ;;  %v2311_v35 = vmin.f32 %v2183_v54, 10000.0 }
 0x245   : > { %v1914_v32 = vmul.f32 0.6931472, %v3109_v31 }
 0x246   : > { %2439 = vst [vmem:[%s3489_s17 + $0x3e8] sm:$0xff] %v2311_v35 }
 0x247   : > { %v1920_v9 = vsel %vm1919_vm12, %v1917_v41, %v1914_v32 }
 0x248   : > { %v3111_v28 = vpop.eup %3110  ;;  %v2056_v57 = vsel %vm392_vm13, %v5447_v59, %v1920_v9 }
 0x249   : > { %v1923_v60 = vmul.f32 0.6931472, %v3111_v28  ;;  %v2184_v55 = vmax.f32 %v2056_v57, 0.0001 }
 0x24b   : > { %v1929_v20 = vsel %vm1928_vm14, %v1926_v51, %v1923_v60  ;;  %v2312_v37 = vmin.f32 %v2184_v55, 10000.0 }
 0x24c   : > { %v2057_v18 = vsel %vm393_vm15, %v5460_v53, %v1929_v20 }
 0x24d   : > { %v2185_v61 = vmax.f32 %v2057_v18, 0.0001  ;;  %2440 = vst [vmem:[%s3489_s17 + $0x3f0] sm:$0xff] %v2312_v37 }
 0x24f   : > { %v2313_v59 = vmin.f32 %v2185_v61, 10000.0 }
 0x251   : > { %2441 = vst [vmem:[%s3489_s17 + $0x3f8] sm:$0xff] %v2313_v59 }
 0x252   : > { %3155 = shalt.err (!%p3152_p1)
}
 0x253   : > { %s3156_s13 = scalar_lea.hbm %s5524_s2, 16384  ;;  %s3160_s20 = scalar_lea.hbm %s5571_s1, 65536 }
 0x254   : > { %p3157_p3 = scmp.ne.s32.totalorder %s5524_s2, %s3156_s13  ;;  %p3161_p0 = scmp.lt.u32.totalorder %s5524_s2, %s5571_s1 }
 0x255   : > { %p3162_p2 = scmp.lt.u32.totalorder %s3160_s20, %s3156_s13  ;;  %p3164_p6 = scmp.lt.u32.totalorder %s3156_s13, %s5524_s2 }
 0x256   : > { %p3158_p4 = pnand %p3157_p3, %p5824_p10 }
 0x257   : > { %p3163_p7 = por %p3162_p2, %p3161_p0 }
 0x258   : > { %p3159_p5 = pneg %p3158_p4 }
 0x259   : > { %p3165_p11 = por %p3164_p6, %p3163_p7 }
 0x25b   : > { %p3166_p12 = pnand %p3165_p11, %p3159_p5 }
 0x25d   : > { %3169 = shalt.err (!%p3166_p12)
}
 0x25e   : > { %s3214_s24 = smov 512   ;;  %s3215_s26 = smov 32  }
 0x25f   : > { %2552 = dma.vmem_to_hbm [thread:$0]  (%p5824_p10), %s5526_s27, 16384, %s5524_s2, %s2443_s3, %s3214_s24, %s3214_s24, %s3215_s26  }
 0x260 PF: > { %p2563_p8 = scmp.ge.s32.totalorder %s3208_s9, 2  ;;  %s2472_s30 = sand.u32 1, %s3196_s6  }
 0x261   : > { %p5825_p9 = scmp.ne.s32.totalorder %s5576_s19, 0  ;;  %s2473_s17 = scalar_lea.sflag [#allocation4], %s2472_s30 }
 0x263   : > { %p2559_p13 = pnand %p2563_p8, %p5825_p9 }
 0x265   : > { %3191 = dma.done.wait (!%p2559_p13), %s2473_s17, 16384  }
 0x266   : > { %3193 = vsyncadd (!%p2559_p13), %s2473_s17, 4294950912  ;;  %p14_p1 = scmp.ge.s32.totalorder %s3251_s12, 6   ;;  %s5826_s6 = smov %s3200_s7 }
 0x267   : > { %s5827_s7 = smov %s3204_s8  ;;  %s5828_s8 = smov %s3263_s15 }
 0x268   : > { %s5829_s9 = smov %s3251_s12  ;;  %16 = sbr.rel (!%p14_p1) target bundleno = 5 (0x5), region = 69 }
 0x26f   :  { %2478 = vsyncpa [#allocation3], 1 }
 0x270   :  { %2480 = vsyncpa [#allocation3 + $0x1], 1 }
 0x271   :  { %2481 = vsyncpa [#allocation4], 1 }
 0x272   :  { %2483 = vsyncpa [#allocation4 + $0x1], 1 }

</bundles_post_ra>
